<compile_context>
chip_gen: v6e
topology: v6e:2x2x1
jax: 0.10.0
libtpu: 0.0.40
codegen_flags: <defaults>
</compile_context>

<pallas_src>
import jax
import jax.numpy as jnp
import numpy as np
from jax.experimental import pallas as pl
from jax.experimental.pallas import tpu as pltpu

# LeNet5 architecture constants (from the PyTorch module).
KH = KW = 5
C_IN, C1_OUT, C2_OUT = 3, 16, 32
FC1_OUT, FC2_OUT, NUM_CLASSES = 120, 84, 10
LANES = 128


def _round_up(x, m):
    return (x + m - 1) // m * m


# ----------------------------- Pallas kernels ------------------------------ #

def _conv_pool_kernel(p00_ref, p01_ref, p10_ref, p11_ref, w_ref, b_ref, o_ref):
    """Fused conv-as-matmul + bias + ReLU + 2x2 maxpool.

    The four inputs are the im2col patch matrices of the four pool offsets
    (dy,dx) in {0,1}^2, so max-pooling is an elementwise max of the four
    matmul results.  relu(max(.)+b) == max over offsets of relu(conv+b).
    """
    w = w_ref[...]
    y00 = jnp.dot(p00_ref[...], w, preferred_element_type=jnp.float32)
    y01 = jnp.dot(p01_ref[...], w, preferred_element_type=jnp.float32)
    y10 = jnp.dot(p10_ref[...], w, preferred_element_type=jnp.float32)
    y11 = jnp.dot(p11_ref[...], w, preferred_element_type=jnp.float32)
    y = jnp.maximum(jnp.maximum(y00, y01), jnp.maximum(y10, y11)) + b_ref[...]
    o_ref[...] = jnp.maximum(y, 0.0).astype(o_ref.dtype)


def _fc_stack_kernel(x_ref, w1_ref, b1_ref, w2_ref, b2_ref, w3_ref, b3_ref, o_ref):
    """fc1 -> ReLU -> fc2 -> ReLU -> fc3, all intermediates resident in VMEM."""
    h = jnp.dot(x_ref[...], w1_ref[...], preferred_element_type=jnp.float32) + b1_ref[...]
    h = jnp.maximum(h, 0.0)
    h = jnp.dot(h, w2_ref[...], preferred_element_type=jnp.float32) + b2_ref[...]
    h = jnp.maximum(h, 0.0)
    h = jnp.dot(h, w3_ref[...], preferred_element_type=jnp.float32) + b3_ref[...]
    o_ref[...] = h.astype(o_ref.dtype)


# ------------------------------ call wrappers ------------------------------- #

def _conv_pool_call(mats, w2d, b2d, tm_cap=512):
    """mats: 4 x [M, K] pool-offset patch matrices; w2d: [K, OC]; b2d: [1, OC]."""
    m, k = mats[0].shape
    oc = w2d.shape[1]
    tm = min(tm_cap, _round_up(m, 8))          # multiple of 8, modest tile (v5e/v7x)
    m_pad = _round_up(m, tm)
    if m_pad > m:
        mats = [jnp.pad(a, ((0, m_pad - m), (0, 0))) for a in mats]
    row_spec = pl.BlockSpec((tm, k), lambda i: (i, 0))
    out = pl.pallas_call(
        _conv_pool_kernel,
        out_shape=jax.ShapeDtypeStruct((m_pad, oc), jnp.float32),
        grid=(m_pad // tm,),
        in_specs=[row_spec, row_spec, row_spec, row_spec,
                  pl.BlockSpec((k, oc), lambda i: (0, 0)),
                  pl.BlockSpec((1, oc), lambda i: (0, 0))],
        out_specs=pl.BlockSpec((tm, oc), lambda i: (i, 0)),
        compiler_params=pltpu.CompilerParams(dimension_semantics=("parallel",)),
    )(*mats, w2d, b2d)
    return out[:m] if m_pad > m else out


def _fc_stack_call(x, pp, tm_cap=256):
    """x: [M, 3200] features (conv2's padded-lane layout); returns [M, 128]."""
    m, k = x.shape
    tm = min(tm_cap, _round_up(m, 8))
    m_pad = _round_up(m, tm)
    if m_pad > m:
        x = jnp.pad(x, ((0, m_pad - m), (0, 0)))
    n_out = pp["fc3_w"].shape[1]

    def full(a):
        return pl.BlockSpec(a.shape, lambda i: (0, 0))

    out = pl.pallas_call(
        _fc_stack_kernel,
        out_shape=jax.ShapeDtypeStruct((m_pad, n_out), jnp.float32),
        grid=(m_pad // tm,),
        in_specs=[pl.BlockSpec((tm, k), lambda i: (i, 0)),
                  full(pp["fc1_w"]), full(pp["fc1_b"]),
                  full(pp["fc2_w"]), full(pp["fc2_b"]),
                  full(pp["fc3_w"]), full(pp["fc3_b"])],
        out_specs=pl.BlockSpec((tm, n_out), lambda i: (i, 0)),
        compiler_params=pltpu.CompilerParams(dimension_semantics=("parallel",)),
    )(x, pp["fc1_w"], pp["fc1_b"], pp["fc2_w"], pp["fc2_b"],
      pp["fc3_w"], pp["fc3_b"])
    return out[:m] if m_pad > m else out


# --------------------------- host-side patch build --------------------------- #

def _pool_patch_matrices(x, kh, kw):
    """x: [N,H,W,C] -> four [N*PH*PW, kh*kw*C] patch matrices (one per pool offset).

    Row order is (n, ph, pw); feature order is (ki, kj, c).  Together the four
    matrices hold exactly the rows of the full im2col (no lane padding).
    """
    n, h, w, c = x.shape
    oh, ow = h - kh + 1, w - kw + 1
    ph, pw = oh // 2, ow // 2
    cols = [x[:, i:i + oh, j:j + ow, :] for i in range(kh) for j in range(kw)]
    patches = jnp.concatenate(cols, axis=-1)                   # [n, oh, ow, kh*kw*c]
    k = kh * kw * c
    mats = [patches[:, dy:dy + 2 * ph:2, dx:dx + 2 * pw:2, :].reshape(n * ph * pw, k)
            for dy in (0, 1) for dx in (0, 1)]
    return mats, ph, pw


# ------------------------- one-time parameter prep --------------------------- #

def prepare_params(params):
    """Hoisted weight re-layout: called once, outside the jitted forward."""
    f32 = jnp.float32

    def conv_prep(w, b, oc_store):
        oc, ic, kh, kw = w.shape
        w2d = jnp.transpose(w, (2, 3, 1, 0)).reshape(kh * kw * ic, oc)  # rows=(ki,kj,c)
        if oc_store > oc:
            w2d = jnp.pad(w2d, ((0, 0), (0, oc_store - oc)))
            b = jnp.pad(b, (0, oc_store - oc))
        return w2d.astype(f32), b.reshape(1, oc_store).astype(f32)

    # conv1 stores only its 16 real channels; conv2 stores a dense 128-lane slab
    # whose padded channel layout is folded into fc1's prepped weight below.
    c1w, c1b = conv_prep(params["conv1_w"], params["conv1_b"], C1_OUT)   # [75,16]
    c2w, c2b = conv_prep(params["conv2_w"], params["conv2_b"], LANES)    # [400,128]

    # fc1: fold PyTorch's (C,H,W) flatten AND the 128-lane-padded conv2 output
    # layout into the weight: kernel feature index = (h*5 + w)*128 + c.
    w1 = params["fc1_w"].reshape(FC1_OUT, C2_OUT, 5, 5)
    w1 = jnp.transpose(w1, (2, 3, 1, 0))                                 # [5,5,32,120]
    w1 = jnp.pad(w1, ((0, 0), (0, 0), (0, LANES - C2_OUT), (0, LANES - FC1_OUT)))
    w1 = w1.reshape(5 * 5 * LANES, LANES)                                # [3200,128]
    b1 = jnp.pad(params["fc1_b"], (0, LANES - FC1_OUT)).reshape(1, LANES)

    w2 = jnp.pad(params["fc2_w"].T, ((0, LANES - FC1_OUT), (0, LANES - FC2_OUT)))
    b2 = jnp.pad(params["fc2_b"], (0, LANES - FC2_OUT)).reshape(1, LANES)
    w3 = jnp.pad(params["fc3_w"].T, ((0, LANES - FC2_OUT), (0, LANES - NUM_CLASSES)))
    b3 = jnp.pad(params["fc3_b"], (0, LANES - NUM_CLASSES)).reshape(1, LANES)

    return dict(conv1_w=c1w, conv1_b=c1b, conv2_w=c2w, conv2_b=c2b,
                fc1_w=w1.astype(f32), fc1_b=b1.astype(f32),
                fc2_w=w2.astype(f32), fc2_b=b2.astype(f32),
                fc3_w=w3.astype(f32), fc3_b=b3.astype(f32))


# -------------------------------- forward ------------------------------------ #

def lenet5_forward(x_nchw, pp):
    n = x_nchw.shape[0]
    x = jnp.transpose(x_nchw, (0, 2, 3, 1)).astype(jnp.float32)      # NCHW -> NHWC

    # conv1 + ReLU + 2x2 maxpool : one fused Pallas kernel
    mats, ph, pw = _pool_patch_matrices(x, KH, KW)
    y = _conv_pool_call(mats, pp["conv1_w"], pp["conv1_b"])          # [n*14*14, 16]
    x = y.reshape(n, ph, pw, C1_OUT)                                 # [n,14,14,16]

    # conv2 + ReLU + 2x2 maxpool : one fused Pallas kernel
    mats, ph, pw = _pool_patch_matrices(x, KH, KW)
    y = _conv_pool_call(mats, pp["conv2_w"], pp["conv2_b"])          # [n*25, 128]

    # Flatten is a free row-major reshape; the (C,H,W) permutation + channel
    # padding is already folded into fc1's prepped weight layout.
    feats = y.reshape(n, ph * pw * y.shape[-1])                      # [n, 3200]

    # fc1 -> ReLU -> fc2 -> ReLU -> fc3 : one fused Pallas kernel
    out = _fc_stack_call(feats, pp)                                  # [n, 128]
    return out[:, :NUM_CLASSES]


# ------------------------------ reference & test ------------------------------ #

def lenet5_reference(x, params):
    """Pure-JAX replica of the PyTorch forward (for numerical verification)."""
    dn = ("NCHW", "OIHW", "NCHW")

    def pool2(y):
        n, c, h, w = y.shape
        return y.reshape(n, c, h // 2, 2, w // 2, 2).max(axis=(3, 5))

    y = jax.lax.conv_general_dilated(x, params["conv1_w"], (1, 1), "VALID",
                                     dimension_numbers=dn)
    y = pool2(jax.nn.relu(y + params["conv1_b"][None, :, None, None]))
    y = jax.lax.conv_general_dilated(y, params["conv2_w"], (1, 1), "VALID",
                                     dimension_numbers=dn)
    y = pool2(jax.nn.relu(y + params["conv2_b"][None, :, None, None]))
    y = y.reshape(y.shape[0], -1)
    y = jax.nn.relu(y @ params["fc1_w"].T + params["fc1_b"])
    y = jax.nn.relu(y @ params["fc2_w"].T + params["fc2_b"])
    return y @ params["fc3_w"].T + params["fc3_b"]


def init_params(key):
    """Deterministic synthetic parameters with PyTorch-layout shapes."""
    ks = jax.random.split(key, 10)

    def nrm(k, shape, scale=0.05):
        return (scale * jax.random.normal(k, shape)).astype(jnp.float32)

    return {
        "conv1_w": nrm(ks[0], (C1_OUT, C_IN, KH, KW)),
        "conv1_b": nrm(ks[1], (C1_OUT,)),
        "conv2_w": nrm(ks[2], (C2_OUT, C1_OUT, KH, KW)),
        "conv2_b": nrm(ks[3], (C2_OUT,)),
        "fc1_w":   nrm(ks[4], (FC1_OUT, C2_OUT * 5 * 5)),
        "fc1_b":   nrm(ks[5], (FC1_OUT,)),
        "fc2_w":   nrm(ks[6], (FC2_OUT, FC1_OUT)),
        "fc2_b":   nrm(ks[7], (FC2_OUT,)),
        "fc3_w":   nrm(ks[8], (NUM_CLASSES, FC2_OUT)),
        "fc3_b":   nrm(ks[9], (NUM_CLASSES,)),
    }


if __name__ == "__main__":
    key = jax.random.PRNGKey(0)
    kx, kp = jax.random.split(key)
    # fc1 expects 32*5*5 features -> spatial input must be 32x32, 3 channels.
    x = jax.random.normal(kx, (2, 3, 32, 32), dtype=jnp.float32)
    params = init_params(kp)
    pp = prepare_params(params)           # one-time weight re-layout, outside jit

    fwd = jax.jit(lenet5_forward)
    out = jax.block_until_ready(fwd(x, pp))
    assert out.shape == (2, NUM_CLASSES) and out.dtype == jnp.float32

    ref = jax.block_until_ready(lenet5_reference(x, params))
    np.testing.assert_allclose(np.asarray(out), np.asarray(ref), rtol=2e-2, atol=2e-2)
    print("KERNEL_OK")
</pallas_src>

<mosaic_0001>
module attributes {stable_mosaic.version = 11 : i64} {
  func.func @_conv_pool_kernel(%arg0: i32, %arg1: memref<392x75xf32, #tpu.memory_space<vmem>>, %arg2: memref<392x75xf32, #tpu.memory_space<vmem>>, %arg3: memref<392x75xf32, #tpu.memory_space<vmem>>, %arg4: memref<392x75xf32, #tpu.memory_space<vmem>>, %arg5: memref<75x16xf32, #tpu.memory_space<vmem>>, %arg6: memref<1x16xf32, #tpu.memory_space<vmem>>, %arg7: memref<392x16xf32, #tpu.memory_space<vmem>>) attributes {dimension_semantics = [#tpu.dimension_semantics<parallel>], iteration_bounds = array<i64: 1>, scalar_prefetch = 0 : i64, scratch_operands = 0 : i64, tpu.core_type = #tpu.core_type<tc>, window_params = [{transform_indices = @transform_0, window_bounds = array<i64: 392, 75>}, {transform_indices = @transform_1, window_bounds = array<i64: 392, 75>}, {transform_indices = @transform_2, window_bounds = array<i64: 392, 75>}, {transform_indices = @transform_3, window_bounds = array<i64: 392, 75>}, {pipeline_mode = #tpu.pipeline_mode<synchronous>, transform_indices = @transform_4, window_bounds = array<i64: 75, 16>}, {pipeline_mode = #tpu.pipeline_mode<synchronous>, transform_indices = @transform_5, window_bounds = array<i64: 1, 16>}, {transform_indices = @transform_6, window_bounds = array<i64: 392, 16>}]} {
    %c0 = arith.constant 0 : index
    %c0_0 = arith.constant 0 : index
    %0 = vector.load %arg5[%c0, %c0_0] : memref<75x16xf32, #tpu.memory_space<vmem>>, vector<75x16xf32>
    %c0_1 = arith.constant 0 : index
    %c0_2 = arith.constant 0 : index
    %1 = vector.load %arg1[%c0_1, %c0_2] : memref<392x75xf32, #tpu.memory_space<vmem>>, vector<392x75xf32>
    %cst = arith.constant dense<0.000000e+00> : vector<392x16xf32>
    %2 = tpu.matmul %1, %0, %cst {dimension_numbers = #tpu.dot_dimension_numbers<[1], [0], [0], [1], [0, 0, 1, 1], [], []>} : vector<392x75xf32>, vector<75x16xf32>, vector<392x16xf32> -> vector<392x16xf32>
    %c0_3 = arith.constant 0 : index
    %c0_4 = arith.constant 0 : index
    %3 = vector.load %arg2[%c0_3, %c0_4] : memref<392x75xf32, #tpu.memory_space<vmem>>, vector<392x75xf32>
    %cst_5 = arith.constant dense<0.000000e+00> : vector<392x16xf32>
    %4 = tpu.matmul %3, %0, %cst_5 {dimension_numbers = #tpu.dot_dimension_numbers<[1], [0], [0], [1], [0, 0, 1, 1], [], []>} : vector<392x75xf32>, vector<75x16xf32>, vector<392x16xf32> -> vector<392x16xf32>
    %c0_6 = arith.constant 0 : index
    %c0_7 = arith.constant 0 : index
    %5 = vector.load %arg3[%c0_6, %c0_7] : memref<392x75xf32, #tpu.memory_space<vmem>>, vector<392x75xf32>
    %cst_8 = arith.constant dense<0.000000e+00> : vector<392x16xf32>
    %6 = tpu.matmul %5, %0, %cst_8 {dimension_numbers = #tpu.dot_dimension_numbers<[1], [0], [0], [1], [0, 0, 1, 1], [], []>} : vector<392x75xf32>, vector<75x16xf32>, vector<392x16xf32> -> vector<392x16xf32>
    %c0_9 = arith.constant 0 : index
    %c0_10 = arith.constant 0 : index
    %7 = vector.load %arg4[%c0_9, %c0_10] : memref<392x75xf32, #tpu.memory_space<vmem>>, vector<392x75xf32>
    %cst_11 = arith.constant dense<0.000000e+00> : vector<392x16xf32>
    %8 = tpu.matmul %7, %0, %cst_11 {dimension_numbers = #tpu.dot_dimension_numbers<[1], [0], [0], [1], [0, 0, 1, 1], [], []>} : vector<392x75xf32>, vector<75x16xf32>, vector<392x16xf32> -> vector<392x16xf32>
    %9 = arith.maximumf %2, %4 : vector<392x16xf32>
    %10 = arith.maximumf %6, %8 : vector<392x16xf32>
    %11 = arith.maximumf %9, %10 : vector<392x16xf32>
    %c0_12 = arith.constant 0 : index
    %c0_13 = arith.constant 0 : index
    %12 = vector.load %arg6[%c0_12, %c0_13] : memref<1x16xf32, #tpu.memory_space<vmem>>, vector<1x16xf32>
    %13 = vector.broadcast %12 : vector<1x16xf32> to vector<392x16xf32>
    %14 = arith.addf %11, %13 : vector<392x16xf32>
    %cst_14 = arith.constant 0.000000e+00 : f32
    %15 = vector.broadcast %cst_14 : f32 to vector<392x16xf32>
    %16 = arith.maximumf %14, %15 : vector<392x16xf32>
    %c0_15 = arith.constant 0 : index
    %c0_16 = arith.constant 0 : index
    %17 = vector.load %arg7[%c0_15, %c0_16] : memref<392x16xf32, #tpu.memory_space<vmem>>, vector<392x16xf32>
    tpu.vector_store %arg7[%c0_15, %c0_16], %16 {strides = array<i32>} : memref<392x16xf32, #tpu.memory_space<vmem>>, vector<392x16xf32>,
    return
  }
  func.func @transform_0(%arg0: i32) -> (i32, i32) {
    %c0_i32 = arith.constant 0 : i32
    %c0_i32_0 = arith.constant 0 : i32
    return %arg0, %c0_i32 : i32, i32
  }
  func.func @transform_1(%arg0: i32) -> (i32, i32) {
    %c0_i32 = arith.constant 0 : i32
    %c0_i32_0 = arith.constant 0 : i32
    return %arg0, %c0_i32 : i32, i32
  }
  func.func @transform_2(%arg0: i32) -> (i32, i32) {
    %c0_i32 = arith.constant 0 : i32
    %c0_i32_0 = arith.constant 0 : i32
    return %arg0, %c0_i32 : i32, i32
  }
  func.func @transform_3(%arg0: i32) -> (i32, i32) {
    %c0_i32 = arith.constant 0 : i32
    %c0_i32_0 = arith.constant 0 : i32
    return %arg0, %c0_i32 : i32, i32
  }
  func.func @transform_4(%arg0: i32) -> (i32, i32) {
    %c0_i32 = arith.constant 0 : i32
    %c0_i32_0 = arith.constant 0 : i32
    %c0_i32_1 = arith.constant 0 : i32
    return %c0_i32, %c0_i32_0 : i32, i32
  }
  func.func @transform_5(%arg0: i32) -> (i32, i32) {
    %c0_i32 = arith.constant 0 : i32
    %c0_i32_0 = arith.constant 0 : i32
    %c0_i32_1 = arith.constant 0 : i32
    return %c0_i32, %c0_i32_0 : i32, i32
  }
  func.func @transform_6(%arg0: i32) -> (i32, i32) {
    %c0_i32 = arith.constant 0 : i32
    %c0_i32_0 = arith.constant 0 : i32
    return %arg0, %c0_i32 : i32, i32
  }
}

module attributes {stable_mosaic.version = 11 : i64} {
  func.func @_conv_pool_kernel(%arg0: i32, %arg1: memref<56x400xf32, #tpu.memory_space<vmem>>, %arg2: memref<56x400xf32, #tpu.memory_space<vmem>>, %arg3: memref<56x400xf32, #tpu.memory_space<vmem>>, %arg4: memref<56x400xf32, #tpu.memory_space<vmem>>, %arg5: memref<400x128xf32, #tpu.memory_space<vmem>>, %arg6: memref<1x128xf32, #tpu.memory_space<vmem>>, %arg7: memref<56x128xf32, #tpu.memory_space<vmem>>) attributes {dimension_semantics = [#tpu.dimension_semantics<parallel>], iteration_bounds = array<i64: 1>, scalar_prefetch = 0 : i64, scratch_operands = 0 : i64, tpu.core_type = #tpu.core_type<tc>, window_params = [{transform_indices = @transform_0, window_bounds = array<i64: 56, 400>}, {transform_indices = @transform_1, window_bounds = array<i64: 56, 400>}, {transform_indices = @transform_2, window_bounds = array<i64: 56, 400>}, {transform_indices = @transform_3, window_bounds = array<i64: 56, 400>}, {pipeline_mode = #tpu.pipeline_mode<synchronous>, transform_indices = @transform_4, window_bounds = array<i64: 400, 128>}, {pipeline_mode = #tpu.pipeline_mode<synchronous>, transform_indices = @transform_5, window_bounds = array<i64: 1, 128>}, {transform_indices = @transform_6, window_bounds = array<i64: 56, 128>}]} {
    %c0 = arith.constant 0 : index
    %c0_0 = arith.constant 0 : index
    %0 = vector.load %arg5[%c0, %c0_0] : memref<400x128xf32, #tpu.memory_space<vmem>>, vector<400x128xf32>
    %c0_1 = arith.constant 0 : index
    %c0_2 = arith.constant 0 : index
    %1 = vector.load %arg1[%c0_1, %c0_2] : memref<56x400xf32, #tpu.memory_space<vmem>>, vector<56x400xf32>
    %cst = arith.constant dense<0.000000e+00> : vector<56x128xf32>
    %2 = tpu.matmul %1, %0, %cst {dimension_numbers = #tpu.dot_dimension_numbers<[1], [0], [0], [1], [0, 0, 1, 1], [], []>} : vector<56x400xf32>, vector<400x128xf32>, vector<56x128xf32> -> vector<56x128xf32>
    %c0_3 = arith.constant 0 : index
    %c0_4 = arith.constant 0 : index
    %3 = vector.load %arg2[%c0_3, %c0_4] : memref<56x400xf32, #tpu.memory_space<vmem>>, vector<56x400xf32>
    %cst_5 = arith.constant dense<0.000000e+00> : vector<56x128xf32>
    %4 = tpu.matmul %3, %0, %cst_5 {dimension_numbers = #tpu.dot_dimension_numbers<[1], [0], [0], [1], [0, 0, 1, 1], [], []>} : vector<56x400xf32>, vector<400x128xf32>, vector<56x128xf32> -> vector<56x128xf32>
    %c0_6 = arith.constant 0 : index
    %c0_7 = arith.constant 0 : index
    %5 = vector.load %arg3[%c0_6, %c0_7] : memref<56x400xf32, #tpu.memory_space<vmem>>, vector<56x400xf32>
    %cst_8 = arith.constant dense<0.000000e+00> : vector<56x128xf32>
    %6 = tpu.matmul %5, %0, %cst_8 {dimension_numbers = #tpu.dot_dimension_numbers<[1], [0], [0], [1], [0, 0, 1, 1], [], []>} : vector<56x400xf32>, vector<400x128xf32>, vector<56x128xf32> -> vector<56x128xf32>
    %c0_9 = arith.constant 0 : index
    %c0_10 = arith.constant 0 : index
    %7 = vector.load %arg4[%c0_9, %c0_10] : memref<56x400xf32, #tpu.memory_space<vmem>>, vector<56x400xf32>
    %cst_11 = arith.constant dense<0.000000e+00> : vector<56x128xf32>
    %8 = tpu.matmul %7, %0, %cst_11 {dimension_numbers = #tpu.dot_dimension_numbers<[1], [0], [0], [1], [0, 0, 1, 1], [], []>} : vector<56x400xf32>, vector<400x128xf32>, vector<56x128xf32> -> vector<56x128xf32>
    %9 = arith.maximumf %2, %4 : vector<56x128xf32>
    %10 = arith.maximumf %6, %8 : vector<56x128xf32>
    %11 = arith.maximumf %9, %10 : vector<56x128xf32>
    %c0_12 = arith.constant 0 : index
    %c0_13 = arith.constant 0 : index
    %12 = vector.load %arg6[%c0_12, %c0_13] : memref<1x128xf32, #tpu.memory_space<vmem>>, vector<1x128xf32>
    %13 = vector.broadcast %12 : vector<1x128xf32> to vector<56x128xf32>
    %14 = arith.addf %11, %13 : vector<56x128xf32>
    %cst_14 = arith.constant 0.000000e+00 : f32
    %15 = vector.broadcast %cst_14 : f32 to vector<56x128xf32>
    %16 = arith.maximumf %14, %15 : vector<56x128xf32>
    %c0_15 = arith.constant 0 : index
    %c0_16 = arith.constant 0 : index
    %17 = vector.load %arg7[%c0_15, %c0_16] : memref<56x128xf32, #tpu.memory_space<vmem>>, vector<56x128xf32>
    tpu.vector_store %arg7[%c0_15, %c0_16], %16 {strides = array<i32>} : memref<56x128xf32, #tpu.memory_space<vmem>>, vector<56x128xf32>,
    return
  }
  func.func @transform_0(%arg0: i32) -> (i32, i32) {
    %c0_i32 = arith.constant 0 : i32
    %c0_i32_0 = arith.constant 0 : i32
    return %arg0, %c0_i32 : i32, i32
  }
  func.func @transform_1(%arg0: i32) -> (i32, i32) {
    %c0_i32 = arith.constant 0 : i32
    %c0_i32_0 = arith.constant 0 : i32
    return %arg0, %c0_i32 : i32, i32
  }
  func.func @transform_2(%arg0: i32) -> (i32, i32) {
    %c0_i32 = arith.constant 0 : i32
    %c0_i32_0 = arith.constant 0 : i32
    return %arg0, %c0_i32 : i32, i32
  }
  func.func @transform_3(%arg0: i32) -> (i32, i32) {
    %c0_i32 = arith.constant 0 : i32
    %c0_i32_0 = arith.constant 0 : i32
    return %arg0, %c0_i32 : i32, i32
  }
  func.func @transform_4(%arg0: i32) -> (i32, i32) {
    %c0_i32 = arith.constant 0 : i32
    %c0_i32_0 = arith.constant 0 : i32
    %c0_i32_1 = arith.constant 0 : i32
    return %c0_i32, %c0_i32_0 : i32, i32
  }
  func.func @transform_5(%arg0: i32) -> (i32, i32) {
    %c0_i32 = arith.constant 0 : i32
    %c0_i32_0 = arith.constant 0 : i32
    %c0_i32_1 = arith.constant 0 : i32
    return %c0_i32, %c0_i32_0 : i32, i32
  }
  func.func @transform_6(%arg0: i32) -> (i32, i32) {
    %c0_i32 = arith.constant 0 : i32
    %c0_i32_0 = arith.constant 0 : i32
    return %arg0, %c0_i32 : i32, i32
  }
}

module attributes {stable_mosaic.version = 11 : i64} {
  func.func @_fc_stack_kernel(%arg0: i32, %arg1: memref<8x3200xf32, #tpu.memory_space<vmem>>, %arg2: memref<3200x128xf32, #tpu.memory_space<vmem>>, %arg3: memref<1x128xf32, #tpu.memory_space<vmem>>, %arg4: memref<128x128xf32, #tpu.memory_space<vmem>>, %arg5: memref<1x128xf32, #tpu.memory_space<vmem>>, %arg6: memref<128x128xf32, #tpu.memory_space<vmem>>, %arg7: memref<1x128xf32, #tpu.memory_space<vmem>>, %arg8: memref<8x128xf32, #tpu.memory_space<vmem>>) attributes {dimension_semantics = [#tpu.dimension_semantics<parallel>], iteration_bounds = array<i64: 1>, scalar_prefetch = 0 : i64, scratch_operands = 0 : i64, tpu.core_type = #tpu.core_type<tc>, window_params = [{transform_indices = @transform_0, window_bounds = array<i64: 8, 3200>}, {pipeline_mode = #tpu.pipeline_mode<synchronous>, transform_indices = @transform_1, window_bounds = array<i64: 3200, 128>}, {pipeline_mode = #tpu.pipeline_mode<synchronous>, transform_indices = @transform_2, window_bounds = array<i64: 1, 128>}, {pipeline_mode = #tpu.pipeline_mode<synchronous>, transform_indices = @transform_3, window_bounds = array<i64: 128, 128>}, {pipeline_mode = #tpu.pipeline_mode<synchronous>, transform_indices = @transform_4, window_bounds = array<i64: 1, 128>}, {pipeline_mode = #tpu.pipeline_mode<synchronous>, transform_indices = @transform_5, window_bounds = array<i64: 128, 128>}, {pipeline_mode = #tpu.pipeline_mode<synchronous>, transform_indices = @transform_6, window_bounds = array<i64: 1, 128>}, {transform_indices = @transform_7, window_bounds = array<i64: 8, 128>}]} {
    %c0 = arith.constant 0 : index
    %c0_0 = arith.constant 0 : index
    %0 = vector.load %arg1[%c0, %c0_0] : memref<8x3200xf32, #tpu.memory_space<vmem>>, vector<8x3200xf32>
    %c0_1 = arith.constant 0 : index
    %c0_2 = arith.constant 0 : index
    %1 = vector.load %arg2[%c0_1, %c0_2] : memref<3200x128xf32, #tpu.memory_space<vmem>>, vector<3200x128xf32>
    %cst = arith.constant dense<0.000000e+00> : vector<8x128xf32>
    %2 = tpu.matmul %0, %1, %cst {dimension_numbers = #tpu.dot_dimension_numbers<[1], [0], [0], [1], [0, 0, 1, 1], [], []>} : vector<8x3200xf32>, vector<3200x128xf32>, vector<8x128xf32> -> vector<8x128xf32>
    %c0_3 = arith.constant 0 : index
    %c0_4 = arith.constant 0 : index
    %3 = vector.load %arg3[%c0_3, %c0_4] : memref<1x128xf32, #tpu.memory_space<vmem>>, vector<1x128xf32>
    %4 = vector.broadcast %3 : vector<1x128xf32> to vector<8x128xf32>
    %5 = arith.addf %2, %4 : vector<8x128xf32>
    %cst_5 = arith.constant 0.000000e+00 : f32
    %6 = vector.broadcast %cst_5 : f32 to vector<8x128xf32>
    %7 = arith.maximumf %5, %6 : vector<8x128xf32>
    %c0_6 = arith.constant 0 : index
    %c0_7 = arith.constant 0 : index
    %8 = vector.load %arg4[%c0_6, %c0_7] : memref<128x128xf32, #tpu.memory_space<vmem>>, vector<128x128xf32>
    %cst_8 = arith.constant dense<0.000000e+00> : vector<8x128xf32>
    %9 = tpu.matmul %7, %8, %cst_8 {dimension_numbers = #tpu.dot_dimension_numbers<[1], [0], [0], [1], [0, 0, 1, 1], [], []>} : vector<8x128xf32>, vector<128x128xf32>, vector<8x128xf32> -> vector<8x128xf32>
    %c0_9 = arith.constant 0 : index
    %c0_10 = arith.constant 0 : index
    %10 = vector.load %arg5[%c0_9, %c0_10] : memref<1x128xf32, #tpu.memory_space<vmem>>, vector<1x128xf32>
    %11 = vector.broadcast %10 : vector<1x128xf32> to vector<8x128xf32>
    %12 = arith.addf %9, %11 : vector<8x128xf32>
    %cst_11 = arith.constant 0.000000e+00 : f32
    %13 = vector.broadcast %cst_11 : f32 to vector<8x128xf32>
    %14 = arith.maximumf %12, %13 : vector<8x128xf32>
    %c0_12 = arith.constant 0 : index
    %c0_13 = arith.constant 0 : index
    %15 = vector.load %arg6[%c0_12, %c0_13] : memref<128x128xf32, #tpu.memory_space<vmem>>, vector<128x128xf32>
    %cst_14 = arith.constant dense<0.000000e+00> : vector<8x128xf32>
    %16 = tpu.matmul %14, %15, %cst_14 {dimension_numbers = #tpu.dot_dimension_numbers<[1], [0], [0], [1], [0, 0, 1, 1], [], []>} : vector<8x128xf32>, vector<128x128xf32>, vector<8x128xf32> -> vector<8x128xf32>
    %c0_15 = arith.constant 0 : index
    %c0_16 = arith.constant 0 : index
    %17 = vector.load %arg7[%c0_15, %c0_16] : memref<1x128xf32, #tpu.memory_space<vmem>>, vector<1x128xf32>
    %18 = vector.broadcast %17 : vector<1x128xf32> to vector<8x128xf32>
    %19 = arith.addf %16, %18 : vector<8x128xf32>
    %c0_17 = arith.constant 0 : index
    %c0_18 = arith.constant 0 : index
    %20 = vector.load %arg8[%c0_17, %c0_18] : memref<8x128xf32, #tpu.memory_space<vmem>>, vector<8x128xf32>
    tpu.vector_store %arg8[%c0_17, %c0_18], %19 {strides = array<i32>} : memref<8x128xf32, #tpu.memory_space<vmem>>, vector<8x128xf32>,
    return
  }
  func.func @transform_0(%arg0: i32) -> (i32, i32) {
    %c0_i32 = arith.constant 0 : i32
    %c0_i32_0 = arith.constant 0 : i32
    return %arg0, %c0_i32 : i32, i32
  }
  func.func @transform_1(%arg0: i32) -> (i32, i32) {
    %c0_i32 = arith.constant 0 : i32
    %c0_i32_0 = arith.constant 0 : i32
    %c0_i32_1 = arith.constant 0 : i32
    return %c0_i32, %c0_i32_0 : i32, i32
  }
  func.func @transform_2(%arg0: i32) -> (i32, i32) {
    %c0_i32 = arith.constant 0 : i32
    %c0_i32_0 = arith.constant 0 : i32
    %c0_i32_1 = arith.constant 0 : i32
    return %c0_i32, %c0_i32_0 : i32, i32
  }
  func.func @transform_3(%arg0: i32) -> (i32, i32) {
    %c0_i32 = arith.constant 0 : i32
    %c0_i32_0 = arith.constant 0 : i32
    %c0_i32_1 = arith.constant 0 : i32
    return %c0_i32, %c0_i32_0 : i32, i32
  }
  func.func @transform_4(%arg0: i32) -> (i32, i32) {
    %c0_i32 = arith.constant 0 : i32
    %c0_i32_0 = arith.constant 0 : i32
    %c0_i32_1 = arith.constant 0 : i32
    return %c0_i32, %c0_i32_0 : i32, i32
  }
  func.func @transform_5(%arg0: i32) -> (i32, i32) {
    %c0_i32 = arith.constant 0 : i32
    %c0_i32_0 = arith.constant 0 : i32
    %c0_i32_1 = arith.constant 0 : i32
    return %c0_i32, %c0_i32_0 : i32, i32
  }
  func.func @transform_6(%arg0: i32) -> (i32, i32) {
    %c0_i32 = arith.constant 0 : i32
    %c0_i32_0 = arith.constant 0 : i32
    %c0_i32_1 = arith.constant 0 : i32
    return %c0_i32, %c0_i32_0 : i32, i32
  }
  func.func @transform_7(%arg0: i32) -> (i32, i32) {
    %c0_i32 = arith.constant 0 : i32
    %c0_i32_0 = arith.constant 0 : i32
    return %arg0, %c0_i32 : i32, i32
  }
}

</mosaic_0001>

<bundles_post_ra>
// kernel: lenet5_forward.3
= control target key start
LH: loop header
LB: loop body
LE: loop exit
PB: predicated region body
PF: predicated region fallthrough
CT: control target
= control target key end

     0   :  { %vm230_vm0 = vcmask 1042432   ;;  %v3475_v0 = vmov 0.0   ;;  %vm82_vm1 = vcmask 613376   ;;  %vm3476_vm2 = vmmov 0   ;;  %s5513_s4 = inlined_call_operand.vmem [shape: f32[75,16], index: 4, kind: input, shape index: {}]   ;;  %s5514_s0 = inlined_call_operand.vmem [shape: f32[392,75], index: 0, kind: input, shape index: {}]   ;;  %s5515_s1 = inlined_call_operand.vmem [shape: f32[392,75], index: 1, kind: input, shape index: {}]   ;;  %s5516_s2 = inlined_call_operand.vmem [shape: f32[392,75], index: 2, kind: input, shape index: {}]   ;;  %s5517_s3 = inlined_call_operand.vmem [shape: f32[392,75], index: 3, kind: input, shape index: {}]   ;;  %s5518_s5 = inlined_call_operand.vmem [shape: f32[1,16], index: 5, kind: input, shape index: {}]   ;;  %s5519_s6 = inlined_call_operand.vmem [shape: f32[392,16], index: 6, kind: output, shape index: {}]  }
   0x1   :  { %2805 = vmatprep.subr.mxu0 %v3475_v0  ;;  %2972 = vmatprep.subr.mxu1 %v3475_v0  ;;  %v3517_v1 = vld [vmem:[%s5513_s4 + $0x48] sm:$0x7]  ;;  %v3522_v2 = vld [vmem:[%s5513_s4 + $0x40] sm:$0xff]  ;;  %v3533_v3 = vld [vmem:[%s5513_s4 + $0x38] sm:$0xff]  ;;  %vm2314_vm3 = vcmask 130048  }
   0x2   :  { %2806 = vmatpush3.msk.msra.mxu0 %vm230_vm0, %v3517_v1  ;;  %2973 = vmatpush3.msk.msra.mxu1 %vm230_vm0, %v3517_v1  ;;  %v3542_v4 = vld [vmem:[%s5513_s4 + $0x30] sm:$0xff]  ;;  %v3551_v5 = vld [vmem:[%s5513_s4 + $0x28] sm:$0xff]  ;;  %v3560_v6 = vld [vmem:[%s5513_s4 + $0x20] sm:$0xff] }
   0x3   :  { %2807 = vmatprep.subr.mxu0 %v3475_v0  ;;  %2974 = vmatprep.subr.mxu1 %v3475_v0  ;;  %v3569_v7 = vld [vmem:[%s5513_s4 + $0x18] sm:$0xff]  ;;  %v3578_v8 = vld [vmem:[%s5513_s4 + $0x10] sm:$0xff]  ;;  %v3587_v9 = vld [vmem:[%s5513_s4 + $0x8] sm:$0xff] }
   0x4   :  { %2808 = vmatpush3.msra.mxu0 %v3522_v2  ;;  %2975 = vmatpush3.msra.mxu1 %v3522_v2  ;;  %v3596_v10 = vld [vmem:[%s5513_s4] sm:$0xff]  ;;  %v34_v13 = vld [vmem:[%s5514_s0 + $0x8] sm:$0xff]  ;;  %v35_v15 = vld [vmem:[%s5514_s0 + $0x10] sm:$0xff] }
   0x5   :  { %2809 = vmatprep.subr.mxu0 %v3475_v0  ;;  %2976 = vmatprep.subr.mxu1 %v3475_v0  ;;  %v33_v11 = vld [vmem:[%s5514_s0] sm:$0xff]  ;;  %v545_v14 = vld [vmem:[%s5515_s1 + $0x8] sm:$0xff]  ;;  %v546_v16 = vld [vmem:[%s5515_s1 + $0x10] sm:$0xff] }
   0x6   :  { %2810 = vmatpush3.msra.mxu0 %v3533_v3  ;;  %2977 = vmatpush3.msra.mxu1 %v3533_v3  ;;  %v544_v12 = vld [vmem:[%s5515_s1] sm:$0xff]  ;;  %v36_v17 = vld [vmem:[%s5514_s0 + $0x18] sm:$0xff]  ;;  %v38_v21 = vld [vmem:[%s5514_s0 + $0x28] sm:$0xff] }
   0x7   :  { %2811 = vmatprep.subr.mxu0 %v3475_v0  ;;  %2978 = vmatprep.subr.mxu1 %v3475_v0  ;;  %v547_v18 = vld [vmem:[%s5515_s1 + $0x18] sm:$0xff]  ;;  %v37_v19 = vld [vmem:[%s5514_s0 + $0x20] sm:$0xff]  ;;  %v549_v22 = vld [vmem:[%s5515_s1 + $0x28] sm:$0xff] }
   0x8   :  { %2812 = vmatpush3.msra.mxu0 %v3542_v4  ;;  %2979 = vmatpush3.msra.mxu1 %v3542_v4  ;;  %v548_v20 = vld [vmem:[%s5515_s1 + $0x20] sm:$0xff]  ;;  %v39_v23 = vld [vmem:[%s5514_s0 + $0x30] sm:$0xff]  ;;  %v40_v25 = vld [vmem:[%s5514_s0 + $0x38] sm:$0xff] }
   0x9   :  { %2813 = vmatprep.subr.mxu0 %v3475_v0  ;;  %2980 = vmatprep.subr.mxu1 %v3475_v0  ;;  %v550_v24 = vld [vmem:[%s5515_s1 + $0x30] sm:$0xff]  ;;  %v551_v26 = vld [vmem:[%s5515_s1 + $0x38] sm:$0xff]  ;;  %v41_v27 = vld [vmem:[%s5514_s0 + $0x40] sm:$0xff] }
   0xa   :  { %2814 = vmatpush3.msra.mxu0 %v3551_v5  ;;  %2981 = vmatpush3.msra.mxu1 %v3551_v5  ;;  %v552_v28 = vld [vmem:[%s5515_s1 + $0x40] sm:$0xff]  ;;  %v42_v29 = vld [vmem:[%s5514_s0 + $0x48] sm:$0xff]  ;;  %v43_v31 = vld [vmem:[%s5514_s0 + $0x50] sm:$0xff] }
   0xb   :  { %2815 = vmatprep.subr.mxu0 %v3475_v0  ;;  %2982 = vmatprep.subr.mxu1 %v3475_v0  ;;  %v553_v30 = vld [vmem:[%s5515_s1 + $0x48] sm:$0xff]  ;;  %v554_v32 = vld [vmem:[%s5515_s1 + $0x50] sm:$0xff]  ;;  %v44_v33 = vld [vmem:[%s5514_s0 + $0x58] sm:$0xff] }
   0xc   :  { %2816 = vmatpush3.msra.mxu0 %v3560_v6  ;;  %2983 = vmatpush3.msra.mxu1 %v3560_v6  ;;  %v555_v34 = vld [vmem:[%s5515_s1 + $0x58] sm:$0xff]  ;;  %v45_v35 = vld [vmem:[%s5514_s0 + $0x60] sm:$0xff]  ;;  %v46_v37 = vld [vmem:[%s5514_s0 + $0x68] sm:$0xff] }
   0xd   :  { %2817 = vmatprep.subr.mxu0 %v3475_v0  ;;  %2984 = vmatprep.subr.mxu1 %v3475_v0  ;;  %v556_v36 = vld [vmem:[%s5515_s1 + $0x60] sm:$0xff]  ;;  %v557_v38 = vld [vmem:[%s5515_s1 + $0x68] sm:$0xff]  ;;  %v47_v39 = vld [vmem:[%s5514_s0 + $0x70] sm:$0xff] }
   0xe   :  { %2818 = vmatpush3.msra.mxu0 %v3569_v7  ;;  %2985 = vmatpush3.msra.mxu1 %v3569_v7  ;;  %v558_v40 = vld [vmem:[%s5515_s1 + $0x70] sm:$0xff]  ;;  %v48_v41 = vld [vmem:[%s5514_s0 + $0x78] sm:$0xff]  ;;  %v49_v43 = vld [vmem:[%s5514_s0 + $0x80] sm:$0xff] }
   0xf   :  { %2819 = vmatprep.subr.mxu0 %v3475_v0  ;;  %2986 = vmatprep.subr.mxu1 %v3475_v0  ;;  %v559_v42 = vld [vmem:[%s5515_s1 + $0x78] sm:$0xff]  ;;  %v560_v44 = vld [vmem:[%s5515_s1 + $0x80] sm:$0xff]  ;;  %v50_v45 = vld [vmem:[%s5514_s0 + $0x88] sm:$0xff] }
  0x10   :  { %2820 = vmatpush3.msra.mxu0 %v3578_v8  ;;  %2987 = vmatpush3.msra.mxu1 %v3578_v8  ;;  %v561_v46 = vld [vmem:[%s5515_s1 + $0x88] sm:$0xff]  ;;  %v51_v47 = vld [vmem:[%s5514_s0 + $0x90] sm:$0xff]  ;;  %v52_v49 = vld [vmem:[%s5514_s0 + $0x98] sm:$0xff] }
  0x11   :  { %2821 = vmatprep.subr.mxu0 %v3475_v0  ;;  %2988 = vmatprep.subr.mxu1 %v3475_v0  ;;  %v562_v48 = vld [vmem:[%s5515_s1 + $0x90] sm:$0xff]  ;;  %v563_v50 = vld [vmem:[%s5515_s1 + $0x98] sm:$0xff]  ;;  %v53_v51 = vld [vmem:[%s5514_s0 + $0xa0] sm:$0xff] }
  0x12   :  { %2822 = vmatpush3.msra.mxu0 %v3587_v9  ;;  %2989 = vmatpush3.msra.mxu1 %v3587_v9  ;;  %v564_v52 = vld [vmem:[%s5515_s1 + $0xa0] sm:$0xff]  ;;  %v54_v53 = vld [vmem:[%s5514_s0 + $0xa8] sm:$0xff]  ;;  %v55_v55 = vld [vmem:[%s5514_s0 + $0xb0] sm:$0xff] }
  0x13   :  { %2823 = vmatprep.subr.mxu0 %v3475_v0  ;;  %2990 = vmatprep.subr.mxu1 %v3475_v0  ;;  %v565_v54 = vld [vmem:[%s5515_s1 + $0xa8] sm:$0xff]  ;;  %v566_v56 = vld [vmem:[%s5515_s1 + $0xb0] sm:$0xff]  ;;  %v56_v57 = vld [vmem:[%s5514_s0 + $0xb8] sm:$0xff] }
  0x14   :  { %2824 = vmatpush3.msra.mxu0 %v3596_v10  ;;  %2825 = vmatprep.mubr.msk.f32.mxu0 %vm3476_vm2, %v3475_v0  ;;  %v567_v58 = vld [vmem:[%s5515_s1 + $0xb8] sm:$0xff]  ;;  %v57_v59 = vld [vmem:[%s5514_s0 + $0xc0] sm:$0xff]  ;;  %v58_v61 = vld [vmem:[%s5514_s0 + $0xc8] sm:$0xff] }
  0x15   :  { %2991 = vmatpush3.msra.mxu1 %v3596_v10  ;;  %2992 = vmatprep.mubr.msk.f32.mxu1 %vm3476_vm2, %v3475_v0  ;;  %v568_v60 = vld [vmem:[%s5515_s1 + $0xc0] sm:$0xff]  ;;  %v569_v62 = vld [vmem:[%s5515_s1 + $0xc8] sm:$0xff]  ;;  %v59_v63 = vld [vmem:[%s5514_s0 + $0xd0] sm:$0xff] }
  0x16   :  { %2826 = vmatmul.mubr.msk.f32.vlgmr.msra.gmra.mxu0 %vm82_vm1, %v33_v11  ;;  %2993 = vmatmul.mubr.msk.f32.vlgmr.msra.gmra.mxu1 %vm82_vm1, %v544_v12  ;;  %v575_v11 = vld [vmem:[%s5515_s1 + $0xf8] sm:$0xff]  ;;  %v65_v12 = vld [vmem:[%s5514_s0 + $0x100] sm:$0xff] }
  0x17   :  { %3139 = vmatprep.subr.mxu0 %v3475_v0  ;;  %3306 = vmatprep.subr.mxu1 %v3475_v0 }
  0x18   :  { %3140 = vmatpush3.msk.msra.mxu0 %vm230_vm0, %v3517_v1  ;;  %3307 = vmatpush3.msk.msra.mxu1 %vm230_vm0, %v3517_v1  ;;  %v570_v1 = vld [vmem:[%s5515_s1 + $0xd0] sm:$0xff] }
  0x19   :  { %2828 = vmatprep.mubr.msk.f32.mxu0 %vm3476_vm2, %v3475_v0  ;;  %2995 = vmatprep.mubr.msk.f32.mxu1 %vm3476_vm2, %v3475_v0 }
  0x1a   :  { %2829 = vmatmul.mubr.msk.f32.gmra.mxu0 %vm82_vm1, %v34_v13  ;;  %2996 = vmatmul.mubr.msk.f32.gmra.mxu1 %vm82_vm1, %v545_v14  ;;  %v576_v13 = vld [vmem:[%s5515_s1 + $0x100] sm:$0xff]  ;;  %v66_v14 = vld [vmem:[%s5514_s0 + $0x108] sm:$0xff] }
  0x1b   :  { %2831 = vmatprep.mubr.msk.f32.mxu0 %vm3476_vm2, %v3475_v0  ;;  %2998 = vmatprep.mubr.msk.f32.mxu1 %vm3476_vm2, %v3475_v0 }
  0x1c   :  { %3141 = vmatprep.subr.mxu0 %v3475_v0  ;;  %3308 = vmatprep.subr.mxu1 %v3475_v0 }
  0x1d   :  { %3142 = vmatpush3.msra.mxu0 %v3522_v2  ;;  %3309 = vmatpush3.msra.mxu1 %v3522_v2  ;;  %v60_v2 = vld [vmem:[%s5514_s0 + $0xd8] sm:$0xff] }
  0x1e   :  { %2832 = vmatmul.mubr.msk.f32.gmra.mxu0 %vm82_vm1, %v35_v15  ;;  %2999 = vmatmul.mubr.msk.f32.gmra.mxu1 %vm82_vm1, %v546_v16  ;;  %v577_v15 = vld [vmem:[%s5515_s1 + $0x108] sm:$0xff]  ;;  %v67_v16 = vld [vmem:[%s5514_s0 + $0x110] sm:$0xff] }
  0x1f   :  { %2834 = vmatprep.mubr.msk.f32.mxu0 %vm3476_vm2, %v3475_v0  ;;  %3001 = vmatprep.mubr.msk.f32.mxu1 %vm3476_vm2, %v3475_v0 }
  0x20   :  { %3143 = vmatprep.subr.mxu0 %v3475_v0  ;;  %3310 = vmatprep.subr.mxu1 %v3475_v0 }
  0x21   :  { %3144 = vmatpush3.msra.mxu0 %v3533_v3  ;;  %3311 = vmatpush3.msra.mxu1 %v3533_v3  ;;  %v571_v3 = vld [vmem:[%s5515_s1 + $0xd8] sm:$0xff] }
  0x22   :  { %2835 = vmatmul.mubr.msk.f32.gmra.mxu0 %vm82_vm1, %v36_v17  ;;  %3002 = vmatmul.mubr.msk.f32.gmra.mxu1 %vm82_vm1, %v547_v18  ;;  %v578_v17 = vld [vmem:[%s5515_s1 + $0x110] sm:$0xff]  ;;  %v68_v18 = vld [vmem:[%s5514_s0 + $0x118] sm:$0xff] }
  0x23   :  { %2837 = vmatprep.mubr.msk.f32.mxu0 %vm3476_vm2, %v3475_v0  ;;  %3004 = vmatprep.mubr.msk.f32.mxu1 %vm3476_vm2, %v3475_v0 }
  0x24   :  { %3145 = vmatprep.subr.mxu0 %v3475_v0  ;;  %3312 = vmatprep.subr.mxu1 %v3475_v0 }
  0x25   :  { %3146 = vmatpush3.msra.mxu0 %v3542_v4  ;;  %3313 = vmatpush3.msra.mxu1 %v3542_v4  ;;  %v61_v4 = vld [vmem:[%s5514_s0 + $0xe0] sm:$0xff] }
  0x26   :  { %2838 = vmatmul.mubr.msk.f32.gmra.mxu0 %vm82_vm1, %v37_v19  ;;  %3005 = vmatmul.mubr.msk.f32.gmra.mxu1 %vm82_vm1, %v548_v20  ;;  %v579_v19 = vld [vmem:[%s5515_s1 + $0x118] sm:$0xff]  ;;  %v69_v20 = vld [vmem:[%s5514_s0 + $0x120] sm:$0xff] }
  0x27   :  { %2840 = vmatprep.mubr.msk.f32.mxu0 %vm3476_vm2, %v3475_v0  ;;  %3007 = vmatprep.mubr.msk.f32.mxu1 %vm3476_vm2, %v3475_v0 }
  0x28   :  { %3147 = vmatprep.subr.mxu0 %v3475_v0  ;;  %3314 = vmatprep.subr.mxu1 %v3475_v0 }
  0x29   :  { %3148 = vmatpush3.msra.mxu0 %v3551_v5  ;;  %3315 = vmatpush3.msra.mxu1 %v3551_v5  ;;  %v572_v5 = vld [vmem:[%s5515_s1 + $0xe0] sm:$0xff] }
  0x2a   :  { %2841 = vmatmul.mubr.msk.f32.gmra.mxu0 %vm82_vm1, %v38_v21  ;;  %3008 = vmatmul.mubr.msk.f32.gmra.mxu1 %vm82_vm1, %v549_v22  ;;  %v580_v21 = vld [vmem:[%s5515_s1 + $0x120] sm:$0xff]  ;;  %v70_v22 = vld [vmem:[%s5514_s0 + $0x128] sm:$0xff] }
  0x2b   :  { %2843 = vmatprep.mubr.msk.f32.mxu0 %vm3476_vm2, %v3475_v0  ;;  %3010 = vmatprep.mubr.msk.f32.mxu1 %vm3476_vm2, %v3475_v0 }
  0x2c   :  { %3149 = vmatprep.subr.mxu0 %v3475_v0  ;;  %3316 = vmatprep.subr.mxu1 %v3475_v0 }
  0x2d   :  { %3150 = vmatpush3.msra.mxu0 %v3560_v6  ;;  %3317 = vmatpush3.msra.mxu1 %v3560_v6  ;;  %v62_v6 = vld [vmem:[%s5514_s0 + $0xe8] sm:$0xff] }
  0x2e   :  { %2844 = vmatmul.mubr.msk.f32.gmra.mxu0 %vm82_vm1, %v39_v23  ;;  %3011 = vmatmul.mubr.msk.f32.gmra.mxu1 %vm82_vm1, %v550_v24  ;;  %v581_v23 = vld [vmem:[%s5515_s1 + $0x128] sm:$0xff]  ;;  %v71_v24 = vld [vmem:[%s5514_s0 + $0x130] sm:$0xff] }
  0x2f   :  { %2846 = vmatprep.mubr.msk.f32.mxu0 %vm3476_vm2, %v3475_v0  ;;  %3013 = vmatprep.mubr.msk.f32.mxu1 %vm3476_vm2, %v3475_v0 }
  0x30   :  { %3151 = vmatprep.subr.mxu0 %v3475_v0  ;;  %3318 = vmatprep.subr.mxu1 %v3475_v0 }
  0x31   :  { %3152 = vmatpush3.msra.mxu0 %v3569_v7  ;;  %3319 = vmatpush3.msra.mxu1 %v3569_v7  ;;  %v573_v7 = vld [vmem:[%s5515_s1 + $0xe8] sm:$0xff] }
  0x32   :  { %2847 = vmatmul.mubr.msk.f32.gmra.mxu0 %vm82_vm1, %v40_v25  ;;  %3014 = vmatmul.mubr.msk.f32.gmra.mxu1 %vm82_vm1, %v551_v26  ;;  %v582_v25 = vld [vmem:[%s5515_s1 + $0x130] sm:$0xff]  ;;  %v72_v26 = vld [vmem:[%s5514_s0 + $0x138] sm:$0xff] }
  0x33   :  { %2849 = vmatprep.mubr.msk.f32.mxu0 %vm3476_vm2, %v3475_v0  ;;  %3016 = vmatprep.mubr.msk.f32.mxu1 %vm3476_vm2, %v3475_v0 }
  0x34   :  { %3153 = vmatprep.subr.mxu0 %v3475_v0  ;;  %3320 = vmatprep.subr.mxu1 %v3475_v0 }
  0x35   :  { %3154 = vmatpush3.msra.mxu0 %v3578_v8  ;;  %3321 = vmatpush3.msra.mxu1 %v3578_v8  ;;  %v63_v8 = vld [vmem:[%s5514_s0 + $0xf0] sm:$0xff] }
  0x36   :  { %2850 = vmatmul.mubr.msk.f32.gmra.mxu0 %vm82_vm1, %v41_v27  ;;  %3017 = vmatmul.mubr.msk.f32.gmra.mxu1 %vm82_vm1, %v552_v28  ;;  %v583_v27 = vld [vmem:[%s5515_s1 + $0x138] sm:$0xff]  ;;  %v73_v28 = vld [vmem:[%s5514_s0 + $0x140] sm:$0xff] }
  0x37   :  { %2852 = vmatprep.mubr.msk.f32.mxu0 %vm3476_vm2, %v3475_v0  ;;  %3019 = vmatprep.mubr.msk.f32.mxu1 %vm3476_vm2, %v3475_v0 }
  0x38   :  { %3155 = vmatprep.subr.mxu0 %v3475_v0  ;;  %3322 = vmatprep.subr.mxu1 %v3475_v0 }
  0x39   :  { %3156 = vmatpush3.msra.mxu0 %v3587_v9  ;;  %3323 = vmatpush3.msra.mxu1 %v3587_v9  ;;  %v574_v9 = vld [vmem:[%s5515_s1 + $0xf0] sm:$0xff] }
  0x3a   :  { %2853 = vmatmul.mubr.msk.f32.gmra.mxu0 %vm82_vm1, %v42_v29  ;;  %3020 = vmatmul.mubr.msk.f32.gmra.mxu1 %vm82_vm1, %v553_v30  ;;  %v584_v29 = vld [vmem:[%s5515_s1 + $0x140] sm:$0xff]  ;;  %v74_v30 = vld [vmem:[%s5514_s0 + $0x148] sm:$0xff] }
  0x3b   :  { %2855 = vmatprep.mubr.msk.f32.mxu0 %vm3476_vm2, %v3475_v0  ;;  %3022 = vmatprep.mubr.msk.f32.mxu1 %vm3476_vm2, %v3475_v0 }
  0x3c   :  { %3157 = vmatprep.subr.mxu0 %v3475_v0  ;;  %3324 = vmatprep.subr.mxu1 %v3475_v0 }
  0x3d   :  { %3158 = vmatpush3.msra.mxu0 %v3596_v10  ;;  %3325 = vmatpush3.msra.mxu1 %v3596_v10  ;;  %v64_v10 = vld [vmem:[%s5514_s0 + $0xf8] sm:$0xff] }
  0x3e   :  { %2856 = vmatmul.mubr.msk.f32.gmra.mxu0 %vm82_vm1, %v43_v31  ;;  %3023 = vmatmul.mubr.msk.f32.gmra.mxu1 %vm82_vm1, %v554_v32  ;;  %v585_v31 = vld [vmem:[%s5515_s1 + $0x148] sm:$0xff]  ;;  %v75_v32 = vld [vmem:[%s5514_s0 + $0x150] sm:$0xff] }
  0x3f   :  { %2858 = vmatprep.mubr.msk.f32.mxu0 %vm3476_vm2, %v3475_v0  ;;  %3025 = vmatprep.mubr.msk.f32.mxu1 %vm3476_vm2, %v3475_v0 }
  0x42   :  { %2859 = vmatmul.mubr.msk.f32.gmra.mxu0 %vm82_vm1, %v44_v33  ;;  %3026 = vmatmul.mubr.msk.f32.gmra.mxu1 %vm82_vm1, %v555_v34  ;;  %v586_v33 = vld [vmem:[%s5515_s1 + $0x150] sm:$0xff]  ;;  %v76_v34 = vld [vmem:[%s5514_s0 + $0x158] sm:$0xff] }
  0x43   :  { %2861 = vmatprep.mubr.msk.f32.mxu0 %vm3476_vm2, %v3475_v0  ;;  %3028 = vmatprep.mubr.msk.f32.mxu1 %vm3476_vm2, %v3475_v0 }
  0x46   :  { %2862 = vmatmul.mubr.msk.f32.gmra.mxu0 %vm82_vm1, %v45_v35  ;;  %3029 = vmatmul.mubr.msk.f32.gmra.mxu1 %vm82_vm1, %v556_v36  ;;  %v587_v35 = vld [vmem:[%s5515_s1 + $0x158] sm:$0xff]  ;;  %v77_v36 = vld [vmem:[%s5514_s0 + $0x160] sm:$0xff] }
  0x47   :  { %2864 = vmatprep.mubr.msk.f32.mxu0 %vm3476_vm2, %v3475_v0  ;;  %3031 = vmatprep.mubr.msk.f32.mxu1 %vm3476_vm2, %v3475_v0 }
  0x4a   :  { %2865 = vmatmul.mubr.msk.f32.gmra.mxu0 %vm82_vm1, %v46_v37  ;;  %3032 = vmatmul.mubr.msk.f32.gmra.mxu1 %vm82_vm1, %v557_v38  ;;  %v588_v37 = vld [vmem:[%s5515_s1 + $0x160] sm:$0xff]  ;;  %v78_v38 = vld [vmem:[%s5514_s0 + $0x168] sm:$0xff] }
  0x4b   :  { %2867 = vmatprep.mubr.msk.f32.mxu0 %vm3476_vm2, %v3475_v0  ;;  %3034 = vmatprep.mubr.msk.f32.mxu1 %vm3476_vm2, %v3475_v0 }
  0x4e   :  { %2868 = vmatmul.mubr.msk.f32.gmra.mxu0 %vm82_vm1, %v47_v39  ;;  %3035 = vmatmul.mubr.msk.f32.gmra.mxu1 %vm82_vm1, %v558_v40  ;;  %v589_v39 = vld [vmem:[%s5515_s1 + $0x168] sm:$0xff]  ;;  %v79_v40 = vld [vmem:[%s5514_s0 + $0x170] sm:$0xff] }
  0x4f   :  { %2870 = vmatprep.mubr.msk.f32.mxu0 %vm3476_vm2, %v3475_v0  ;;  %3037 = vmatprep.mubr.msk.f32.mxu1 %vm3476_vm2, %v3475_v0 }
  0x52   :  { %2871 = vmatmul.mubr.msk.f32.gmra.mxu0 %vm82_vm1, %v48_v41  ;;  %3038 = vmatmul.mubr.msk.f32.gmra.mxu1 %vm82_vm1, %v559_v42  ;;  %v590_v41 = vld [vmem:[%s5515_s1 + $0x170] sm:$0xff]  ;;  %v80_v42 = vld [vmem:[%s5514_s0 + $0x178] sm:$0xff] }
  0x53   :  { %2873 = vmatprep.mubr.msk.f32.mxu0 %vm3476_vm2, %v3475_v0  ;;  %3040 = vmatprep.mubr.msk.f32.mxu1 %vm3476_vm2, %v3475_v0 }
  0x56   :  { %2874 = vmatmul.mubr.msk.f32.gmra.mxu0 %vm82_vm1, %v49_v43  ;;  %3041 = vmatmul.mubr.msk.f32.gmra.mxu1 %vm82_vm1, %v560_v44  ;;  %v591_v43 = vld [vmem:[%s5515_s1 + $0x178] sm:$0xff]  ;;  %v81_v44 = vld [vmem:[%s5514_s0 + $0x180] sm:$0xff] }
  0x57   :  { %2876 = vmatprep.mubr.msk.f32.mxu0 %vm3476_vm2, %v3475_v0  ;;  %3043 = vmatprep.mubr.msk.f32.mxu1 %vm3476_vm2, %v3475_v0 }
  0x5a   :  { %2877 = vmatmul.mubr.msk.f32.gmra.mxu0 %vm82_vm1, %v50_v45  ;;  %3044 = vmatmul.mubr.msk.f32.gmra.mxu1 %vm82_vm1, %v561_v46  ;;  %v592_v45 = vld [vmem:[%s5515_s1 + $0x180] sm:$0xff] }
  0x5b   :  { %2879 = vmatprep.mubr.msk.f32.mxu0 %vm3476_vm2, %v3475_v0  ;;  %3046 = vmatprep.mubr.msk.f32.mxu1 %vm3476_vm2, %v3475_v0 }
  0x5e   :  { %2880 = vmatmul.mubr.msk.f32.gmra.mxu0 %vm82_vm1, %v51_v47  ;;  %3047 = vmatmul.mubr.msk.f32.gmra.mxu1 %vm82_vm1, %v562_v48 }
  0x5f   :  { %2882 = vmatprep.mubr.msk.f32.mxu0 %vm3476_vm2, %v3475_v0  ;;  %3049 = vmatprep.mubr.msk.f32.mxu1 %vm3476_vm2, %v3475_v0 }
  0x62   :  { %2883 = vmatmul.mubr.msk.f32.gmra.mxu0 %vm82_vm1, %v52_v49  ;;  %3050 = vmatmul.mubr.msk.f32.gmra.mxu1 %vm82_vm1, %v563_v50  ;;  %v1050_v49 = vld [vmem:[%s5516_s2] sm:$0xff] }
  0x63   :  { %2885 = vmatprep.mubr.msk.f32.mxu0 %vm3476_vm2, %v3475_v0  ;;  %3052 = vmatprep.mubr.msk.f32.mxu1 %vm3476_vm2, %v3475_v0  ;;  %v1556_v50 = vld [vmem:[%s5517_s3] sm:$0xff] }
  0x66   :  { %2886 = vmatmul.mubr.msk.f32.gmra.mxu0 %vm82_vm1, %v53_v51  ;;  %3053 = vmatmul.mubr.msk.f32.gmra.mxu1 %vm82_vm1, %v564_v52 }
  0x67   :  { %2888 = vmatprep.mubr.msk.f32.mxu0 %vm3476_vm2, %v3475_v0  ;;  %3055 = vmatprep.mubr.msk.f32.mxu1 %vm3476_vm2, %v3475_v0 }
  0x6a   :  { %2889 = vmatmul.mubr.msk.f32.gmra.mxu0 %vm82_vm1, %v54_v53  ;;  %3056 = vmatmul.mubr.msk.f32.gmra.mxu1 %vm82_vm1, %v565_v54 }
  0x6b   :  { %2891 = vmatprep.mubr.msk.f32.mxu0 %vm3476_vm2, %v3475_v0  ;;  %3058 = vmatprep.mubr.msk.f32.mxu1 %vm3476_vm2, %v3475_v0 }
  0x6e   :  { %2892 = vmatmul.mubr.msk.f32.gmra.mxu0 %vm82_vm1, %v55_v55  ;;  %3059 = vmatmul.mubr.msk.f32.gmra.mxu1 %vm82_vm1, %v566_v56  ;;  %v1051_v56 = vld [vmem:[%s5516_s2 + $0x8] sm:$0xff] }
  0x6f   :  { %2894 = vmatprep.mubr.msk.f32.mxu0 %vm3476_vm2, %v3475_v0  ;;  %3061 = vmatprep.mubr.msk.f32.mxu1 %vm3476_vm2, %v3475_v0 }
  0x72   :  { %2895 = vmatmul.mubr.msk.f32.gmra.mxu0 %vm82_vm1, %v56_v57  ;;  %3062 = vmatmul.mubr.msk.f32.gmra.mxu1 %vm82_vm1, %v567_v58  ;;  %v1557_v57 = vld [vmem:[%s5517_s3 + $0x8] sm:$0xff] }
  0x73   :  { %2897 = vmatprep.mubr.msk.f32.mxu0 %vm3476_vm2, %v3475_v0  ;;  %3064 = vmatprep.mubr.msk.f32.mxu1 %vm3476_vm2, %v3475_v0 }
  0x76   :  { %2898 = vmatmul.mubr.msk.f32.gmra.mxu0 %vm82_vm1, %v57_v59  ;;  %3065 = vmatmul.mubr.msk.f32.gmra.mxu1 %vm82_vm1, %v568_v60 }
  0x77   :  { %2900 = vmatprep.mubr.msk.f32.mxu0 %vm3476_vm2, %v3475_v0  ;;  %3067 = vmatprep.mubr.msk.f32.mxu1 %vm3476_vm2, %v3475_v0 }
  0x7a   :  { %2901 = vmatmul.mubr.msk.f32.gmra.mxu0 %vm82_vm1, %v58_v61  ;;  %3068 = vmatmul.mubr.msk.f32.gmra.mxu1 %vm82_vm1, %v569_v62 }
  0x7b   :  { %2903 = vmatprep.mubr.msk.f32.mxu0 %vm3476_vm2, %v3475_v0  ;;  %3070 = vmatprep.mubr.msk.f32.mxu1 %vm3476_vm2, %v3475_v0 }
  0x7e   :  { %2904 = vmatmul.mubr.msk.f32.gmra.mxu0 %vm82_vm1, %v59_v63  ;;  %3071 = vmatmul.mubr.msk.f32.gmra.mxu1 %vm82_vm1, %v570_v1  ;;  %v1052_v63 = vld [vmem:[%s5516_s2 + $0x10] sm:$0xff] }
  0x7f   :  { %2906 = vmatprep.mubr.msk.f32.mxu0 %vm3476_vm2, %v3475_v0  ;;  %3073 = vmatprep.mubr.msk.f32.mxu1 %vm3476_vm2, %v3475_v0  ;;  %v1558_v1 = vld [vmem:[%s5517_s3 + $0x10] sm:$0xff] }
  0x82   :  { %2907 = vmatmul.mubr.msk.f32.gmra.mxu0 %vm82_vm1, %v60_v2  ;;  %3074 = vmatmul.mubr.msk.f32.gmra.mxu1 %vm82_vm1, %v571_v3 }
  0x83   :  { %2909 = vmatprep.mubr.msk.f32.mxu0 %vm3476_vm2, %v3475_v0  ;;  %3076 = vmatprep.mubr.msk.f32.mxu1 %vm3476_vm2, %v3475_v0 }
  0x86   :  { %2910 = vmatmul.mubr.msk.f32.gmra.mxu0 %vm82_vm1, %v61_v4  ;;  %3077 = vmatmul.mubr.msk.f32.gmra.mxu1 %vm82_vm1, %v572_v5 }
  0x87   :  { %2912 = vmatprep.mubr.msk.f32.mxu0 %vm3476_vm2, %v3475_v0  ;;  %3079 = vmatprep.mubr.msk.f32.mxu1 %vm3476_vm2, %v3475_v0 }
  0x8a   :  { %2913 = vmatmul.mubr.msk.f32.gmra.mxu0 %vm82_vm1, %v62_v6  ;;  %3080 = vmatmul.mubr.msk.f32.gmra.mxu1 %vm82_vm1, %v573_v7  ;;  %v1053_v7 = vld [vmem:[%s5516_s2 + $0x18] sm:$0xff] }
  0x8b   :  { %2915 = vmatprep.mubr.msk.f32.mxu0 %vm3476_vm2, %v3475_v0  ;;  %3082 = vmatprep.mubr.msk.f32.mxu1 %vm3476_vm2, %v3475_v0 }
  0x8e   :  { %2916 = vmatmul.mubr.msk.f32.gmra.mxu0 %vm82_vm1, %v63_v8  ;;  %3083 = vmatmul.mubr.msk.f32.gmra.mxu1 %vm82_vm1, %v574_v9  ;;  %v1559_v8 = vld [vmem:[%s5517_s3 + $0x18] sm:$0xff] }
  0x8f   :  { %2918 = vmatprep.mubr.msk.f32.mxu0 %vm3476_vm2, %v3475_v0  ;;  %3085 = vmatprep.mubr.msk.f32.mxu1 %vm3476_vm2, %v3475_v0 }
  0x92   :  { %2919 = vmatmul.mubr.msk.f32.gmra.mxu0 %vm82_vm1, %v64_v10  ;;  %3086 = vmatmul.mubr.msk.f32.gmra.mxu1 %vm82_vm1, %v575_v11 }
  0x93   :  { %2921 = vmatprep.mubr.msk.f32.mxu0 %vm3476_vm2, %v3475_v0  ;;  %3088 = vmatprep.mubr.msk.f32.mxu1 %vm3476_vm2, %v3475_v0 }
  0x96   :  { %2922 = vmatmul.mubr.msk.f32.gmra.mxu0 %vm82_vm1, %v65_v12  ;;  %3089 = vmatmul.mubr.msk.f32.gmra.mxu1 %vm82_vm1, %v576_v13 }
  0x97   :  { %2924 = vmatprep.mubr.msk.f32.mxu0 %vm3476_vm2, %v3475_v0  ;;  %3091 = vmatprep.mubr.msk.f32.mxu1 %vm3476_vm2, %v3475_v0 }
  0x9a   :  { %2925 = vmatmul.mubr.msk.f32.gmra.mxu0 %vm82_vm1, %v66_v14  ;;  %3092 = vmatmul.mubr.msk.f32.gmra.mxu1 %vm82_vm1, %v577_v15  ;;  %v1054_v14 = vld [vmem:[%s5516_s2 + $0x20] sm:$0xff] }
  0x9b   :  { %2927 = vmatprep.mubr.msk.f32.mxu0 %vm3476_vm2, %v3475_v0  ;;  %3094 = vmatprep.mubr.msk.f32.mxu1 %vm3476_vm2, %v3475_v0  ;;  %v1560_v15 = vld [vmem:[%s5517_s3 + $0x20] sm:$0xff] }
  0x9e   :  { %2928 = vmatmul.mubr.msk.f32.gmra.mxu0 %vm82_vm1, %v67_v16  ;;  %3095 = vmatmul.mubr.msk.f32.gmra.mxu1 %vm82_vm1, %v578_v17 }
  0x9f   :  { %2930 = vmatprep.mubr.msk.f32.mxu0 %vm3476_vm2, %v3475_v0  ;;  %3097 = vmatprep.mubr.msk.f32.mxu1 %vm3476_vm2, %v3475_v0 }
  0xa2   :  { %2931 = vmatmul.mubr.msk.f32.gmra.mxu0 %vm82_vm1, %v68_v18  ;;  %3098 = vmatmul.mubr.msk.f32.gmra.mxu1 %vm82_vm1, %v579_v19 }
  0xa3   :  { %2933 = vmatprep.mubr.msk.f32.mxu0 %vm3476_vm2, %v3475_v0  ;;  %3100 = vmatprep.mubr.msk.f32.mxu1 %vm3476_vm2, %v3475_v0 }
  0xa6   :  { %2934 = vmatmul.mubr.msk.f32.gmra.mxu0 %vm82_vm1, %v69_v20  ;;  %3101 = vmatmul.mubr.msk.f32.gmra.mxu1 %vm82_vm1, %v580_v21  ;;  %v1055_v21 = vld [vmem:[%s5516_s2 + $0x28] sm:$0xff] }
  0xa7   :  { %2936 = vmatprep.mubr.msk.f32.mxu0 %vm3476_vm2, %v3475_v0  ;;  %3103 = vmatprep.mubr.msk.f32.mxu1 %vm3476_vm2, %v3475_v0 }
  0xaa   :  { %2937 = vmatmul.mubr.msk.f32.gmra.mxu0 %vm82_vm1, %v70_v22  ;;  %3104 = vmatmul.mubr.msk.f32.gmra.mxu1 %vm82_vm1, %v581_v23  ;;  %v1561_v22 = vld [vmem:[%s5517_s3 + $0x28] sm:$0xff] }
  0xab   :  { %2939 = vmatprep.mubr.msk.f32.mxu0 %vm3476_vm2, %v3475_v0  ;;  %3106 = vmatprep.mubr.msk.f32.mxu1 %vm3476_vm2, %v3475_v0 }
  0xae   :  { %2940 = vmatmul.mubr.msk.f32.gmra.mxu0 %vm82_vm1, %v71_v24  ;;  %3107 = vmatmul.mubr.msk.f32.gmra.mxu1 %vm82_vm1, %v582_v25 }
  0xaf   :  { %2942 = vmatprep.mubr.msk.f32.mxu0 %vm3476_vm2, %v3475_v0  ;;  %3109 = vmatprep.mubr.msk.f32.mxu1 %vm3476_vm2, %v3475_v0 }
  0xb2   :  { %2943 = vmatmul.mubr.msk.f32.gmra.mxu0 %vm82_vm1, %v72_v26  ;;  %3110 = vmatmul.mubr.msk.f32.gmra.mxu1 %vm82_vm1, %v583_v27 }
  0xb3   :  { %2945 = vmatprep.mubr.msk.f32.mxu0 %vm3476_vm2, %v3475_v0  ;;  %3112 = vmatprep.mubr.msk.f32.mxu1 %vm3476_vm2, %v3475_v0 }
  0xb6   :  { %2946 = vmatmul.mubr.msk.f32.gmra.mxu0 %vm82_vm1, %v73_v28  ;;  %3113 = vmatmul.mubr.msk.f32.gmra.mxu1 %vm82_vm1, %v584_v29  ;;  %v1056_v28 = vld [vmem:[%s5516_s2 + $0x30] sm:$0xff] }
  0xb7   :  { %2948 = vmatprep.mubr.msk.f32.mxu0 %vm3476_vm2, %v3475_v0  ;;  %3115 = vmatprep.mubr.msk.f32.mxu1 %vm3476_vm2, %v3475_v0  ;;  %v1562_v29 = vld [vmem:[%s5517_s3 + $0x30] sm:$0xff] }
  0xba   :  { %2949 = vmatmul.mubr.msk.f32.gmra.mxu0 %vm82_vm1, %v74_v30  ;;  %3116 = vmatmul.mubr.msk.f32.gmra.mxu1 %vm82_vm1, %v585_v31 }
  0xbb   :  { %2951 = vmatprep.mubr.msk.f32.mxu0 %vm3476_vm2, %v3475_v0  ;;  %3118 = vmatprep.mubr.msk.f32.mxu1 %vm3476_vm2, %v3475_v0 }
  0xbe   :  { %2952 = vmatmul.mubr.msk.f32.gmra.mxu0 %vm82_vm1, %v75_v32  ;;  %3119 = vmatmul.mubr.msk.f32.gmra.mxu1 %vm82_vm1, %v586_v33 }
  0xbf   :  { %2954 = vmatprep.mubr.msk.f32.mxu0 %vm3476_vm2, %v3475_v0  ;;  %3121 = vmatprep.mubr.msk.f32.mxu1 %vm3476_vm2, %v3475_v0 }
  0xc2   :  { %2955 = vmatmul.mubr.msk.f32.gmra.mxu0 %vm82_vm1, %v76_v34  ;;  %3122 = vmatmul.mubr.msk.f32.gmra.mxu1 %vm82_vm1, %v587_v35  ;;  %v1057_v35 = vld [vmem:[%s5516_s2 + $0x38] sm:$0xff] }
  0xc3   :  { %2957 = vmatprep.mubr.msk.f32.mxu0 %vm3476_vm2, %v3475_v0  ;;  %3124 = vmatprep.mubr.msk.f32.mxu1 %vm3476_vm2, %v3475_v0 }
  0xc6   :  { %2958 = vmatmul.mubr.msk.f32.gmra.mxu0 %vm82_vm1, %v77_v36  ;;  %3125 = vmatmul.mubr.msk.f32.gmra.mxu1 %vm82_vm1, %v588_v37  ;;  %v1563_v36 = vld [vmem:[%s5517_s3 + $0x38] sm:$0xff] }
  0xc7   :  { %2960 = vmatprep.mubr.msk.f32.mxu0 %vm3476_vm2, %v3475_v0  ;;  %3127 = vmatprep.mubr.msk.f32.mxu1 %vm3476_vm2, %v3475_v0 }
  0xca   :  { %2961 = vmatmul.mubr.msk.f32.gmra.mxu0 %vm82_vm1, %v78_v38  ;;  %3128 = vmatmul.mubr.msk.f32.gmra.mxu1 %vm82_vm1, %v589_v39 }
  0xcb   :  { %2963 = vmatprep.mubr.msk.f32.mxu0 %vm3476_vm2, %v3475_v0  ;;  %3130 = vmatprep.mubr.msk.f32.mxu1 %vm3476_vm2, %v3475_v0 }
  0xce   :  { %2964 = vmatmul.mubr.msk.f32.gmra.mxu0 %vm82_vm1, %v79_v40  ;;  %3131 = vmatmul.mubr.msk.f32.gmra.mxu1 %vm82_vm1, %v590_v41 }
  0xcf   :  { %2966 = vmatprep.mubr.msk.f32.mxu0 %vm3476_vm2, %v3475_v0  ;;  %3133 = vmatprep.mubr.msk.f32.mxu1 %vm3476_vm2, %v3475_v0 }
  0xd2   :  { %2967 = vmatmul.mubr.msk.f32.gmra.mxu0 %vm82_vm1, %v80_v42  ;;  %3134 = vmatmul.mubr.msk.f32.gmra.mxu1 %vm82_vm1, %v591_v43  ;;  %v1058_v42 = vld [vmem:[%s5516_s2 + $0x40] sm:$0xff] }
  0xd3   :  { %2969 = vmatprep.mubr.msk.f32.mxu0 %vm3476_vm2, %v3475_v0  ;;  %3136 = vmatprep.mubr.msk.f32.mxu1 %vm3476_vm2, %v3475_v0  ;;  %v1564_v43 = vld [vmem:[%s5517_s3 + $0x40] sm:$0xff] }
  0xd6   :  { %v4232_v46 = vpop.f32.mrf.mxu0  ;;  %2970 = vmatmul.mubr.msk.f32.gmra.mxu0 %vm82_vm1, %v81_v44  ;;  %v4235_v47 = vpop.f32.mrf.mxu1  ;;  %3137 = vmatmul.mubr.msk.f32.gmra.mxu1 %vm82_vm1, %v592_v45 }
  0xd7   :  { %3159 = vmatprep.mubr.msk.f32.mxu0 %vm3476_vm2, %v3475_v0  ;;  %3326 = vmatprep.mubr.msk.f32.mxu1 %vm3476_vm2, %v3475_v0 }
  0xd8   :  { %v2827_v51 = vpop.f32.mrf.mxu0  ;;  %v2994_v52 = vpop.f32.mrf.mxu1 }
  0xd9   :  { %v1059_v52 = vld [vmem:[%s5516_s2 + $0x48] sm:$0xff] }
  0xda   :  { %v4250_v53 = vpop.f32.mrf.mxu0  ;;  %v4252_v54 = vpop.f32.mrf.mxu1  ;;  %3160 = vmatmul.mubr.msk.f32.vlgmr.msra.gmra.mxu0 %vm82_vm1, %v1050_v49  ;;  %3327 = vmatmul.mubr.msk.f32.vlgmr.msra.gmra.mxu1 %vm82_vm1, %v1556_v50 }
  0xdb   :  { %3162 = vmatprep.mubr.msk.f32.mxu0 %vm3476_vm2, %v3475_v0  ;;  %3329 = vmatprep.mubr.msk.f32.mxu1 %vm3476_vm2, %v3475_v0 }
  0xdc   :  { %v2830_v58 = vpop.f32.mrf.mxu0  ;;  %v2997_v59 = vpop.f32.mrf.mxu1 }
  0xde   :  { %v4268_v60 = vpop.f32.mrf.mxu0  ;;  %v4270_v61 = vpop.f32.mrf.mxu1  ;;  %3163 = vmatmul.mubr.msk.f32.gmra.mxu0 %vm82_vm1, %v1051_v56  ;;  %3330 = vmatmul.mubr.msk.f32.gmra.mxu1 %vm82_vm1, %v1557_v57  ;;  %v1565_v56 = vld [vmem:[%s5517_s3 + $0x48] sm:$0xff] }
  0xdf   :  { %3165 = vmatprep.mubr.msk.f32.mxu0 %vm3476_vm2, %v3475_v0  ;;  %3332 = vmatprep.mubr.msk.f32.mxu1 %vm3476_vm2, %v3475_v0 }
  0xe0   :  { %v2833_v2 = vpop.f32.mrf.mxu0  ;;  %v3000_v3 = vpop.f32.mrf.mxu1 }
  0xe1   :  { %v1060_v2 = vld [vmem:[%s5516_s2 + $0x50] sm:$0xff] }
  0xe2   :  { %v4286_v4 = vpop.f32.mrf.mxu0  ;;  %v4288_v5 = vpop.f32.mrf.mxu1  ;;  %3166 = vmatmul.mubr.msk.f32.gmra.mxu0 %vm82_vm1, %v1052_v63  ;;  %3333 = vmatmul.mubr.msk.f32.gmra.mxu1 %vm82_vm1, %v1558_v1  ;;  %v1566_v3 = vld [vmem:[%s5517_s3 + $0x50] sm:$0xff] }
  0xe3   :  { %3168 = vmatprep.mubr.msk.f32.mxu0 %vm3476_vm2, %v3475_v0  ;;  %3335 = vmatprep.mubr.msk.f32.mxu1 %vm3476_vm2, %v3475_v0 }
  0xe4   :  { %v2836_v9 = vpop.f32.mrf.mxu0  ;;  %v3003_v10 = vpop.f32.mrf.mxu1 }
  0xe6   :  { %v4304_v11 = vpop.f32.mrf.mxu0  ;;  %v4306_v12 = vpop.f32.mrf.mxu1  ;;  %3169 = vmatmul.mubr.msk.f32.gmra.mxu0 %vm82_vm1, %v1053_v7  ;;  %3336 = vmatmul.mubr.msk.f32.gmra.mxu1 %vm82_vm1, %v1559_v8 }
  0xe7   :  { %3171 = vmatprep.mubr.msk.f32.mxu0 %vm3476_vm2, %v3475_v0  ;;  %3338 = vmatprep.mubr.msk.f32.mxu1 %vm3476_vm2, %v3475_v0 }
  0xe8   :  { %v2839_v16 = vpop.f32.mrf.mxu0  ;;  %v3006_v17 = vpop.f32.mrf.mxu1 }
  0xe9   :  { %v1567_v16 = vld [vmem:[%s5517_s3 + $0x58] sm:$0xff] }
  0xea   :  { %v4322_v18 = vpop.f32.mrf.mxu0  ;;  %v4324_v19 = vpop.f32.mrf.mxu1  ;;  %3172 = vmatmul.mubr.msk.f32.gmra.mxu0 %vm82_vm1, %v1054_v14  ;;  %3339 = vmatmul.mubr.msk.f32.gmra.mxu1 %vm82_vm1, %v1560_v15  ;;  %v1061_v15 = vld [vmem:[%s5516_s2 + $0x58] sm:$0xff] }
  0xeb   :  { %3174 = vmatprep.mubr.msk.f32.mxu0 %vm3476_vm2, %v3475_v0  ;;  %3341 = vmatprep.mubr.msk.f32.mxu1 %vm3476_vm2, %v3475_v0 }
  0xec   :  { %v2842_v23 = vpop.f32.mrf.mxu0  ;;  %v3009_v24 = vpop.f32.mrf.mxu1 }
  0xee   :  { %v4340_v25 = vpop.f32.mrf.mxu0  ;;  %v4342_v26 = vpop.f32.mrf.mxu1  ;;  %3175 = vmatmul.mubr.msk.f32.gmra.mxu0 %vm82_vm1, %v1055_v21  ;;  %3342 = vmatmul.mubr.msk.f32.gmra.mxu1 %vm82_vm1, %v1561_v22 }
  0xef   :  { %3177 = vmatprep.mubr.msk.f32.mxu0 %vm3476_vm2, %v3475_v0  ;;  %3344 = vmatprep.mubr.msk.f32.mxu1 %vm3476_vm2, %v3475_v0 }
  0xf0   :  { %v2845_v30 = vpop.f32.mrf.mxu0  ;;  %v3012_v31 = vpop.f32.mrf.mxu1 }
  0xf2   :  { %v4358_v32 = vpop.f32.mrf.mxu0  ;;  %v4360_v33 = vpop.f32.mrf.mxu1  ;;  %3178 = vmatmul.mubr.msk.f32.gmra.mxu0 %vm82_vm1, %v1056_v28  ;;  %3345 = vmatmul.mubr.msk.f32.gmra.mxu1 %vm82_vm1, %v1562_v29  ;;  %v1062_v28 = vld [vmem:[%s5516_s2 + $0x60] sm:$0xff] }
  0xf3   :  { %3180 = vmatprep.mubr.msk.f32.mxu0 %vm3476_vm2, %v3475_v0  ;;  %3347 = vmatprep.mubr.msk.f32.mxu1 %vm3476_vm2, %v3475_v0  ;;  %v1568_v29 = vld [vmem:[%s5517_s3 + $0x60] sm:$0xff] }
  0xf4   :  { %v2848_v37 = vpop.f32.mrf.mxu0  ;;  %v3015_v38 = vpop.f32.mrf.mxu1 }
  0xf5   :  { %v1063_v38 = vld [vmem:[%s5516_s2 + $0x68] sm:$0xff] }
  0xf6   :  { %v4376_v39 = vpop.f32.mrf.mxu0  ;;  %v4378_v40 = vpop.f32.mrf.mxu1  ;;  %3181 = vmatmul.mubr.msk.f32.gmra.mxu0 %vm82_vm1, %v1057_v35  ;;  %3348 = vmatmul.mubr.msk.f32.gmra.mxu1 %vm82_vm1, %v1563_v36 }
  0xf7   :  { %3183 = vmatprep.mubr.msk.f32.mxu0 %vm3476_vm2, %v3475_v0  ;;  %3350 = vmatprep.mubr.msk.f32.mxu1 %vm3476_vm2, %v3475_v0 }
  0xf8   :  { %v2851_v44 = vpop.f32.mrf.mxu0  ;;  %v3018_v45 = vpop.f32.mrf.mxu1 }
  0xfa   :  { %v4394_v49 = vpop.f32.mrf.mxu0  ;;  %v4396_v50 = vpop.f32.mrf.mxu1  ;;  %3184 = vmatmul.mubr.msk.f32.gmra.mxu0 %vm82_vm1, %v1058_v42  ;;  %3351 = vmatmul.mubr.msk.f32.gmra.mxu1 %vm82_vm1, %v1564_v43  ;;  %v1569_v42 = vld [vmem:[%s5517_s3 + $0x68] sm:$0xff] }
  0xfb   :  { %3186 = vmatprep.mubr.msk.f32.mxu0 %vm3476_vm2, %v3475_v0  ;;  %3353 = vmatprep.mubr.msk.f32.mxu1 %vm3476_vm2, %v3475_v0 }
  0xfc   :  { %v2854_v57 = vpop.f32.mrf.mxu0  ;;  %v3021_v58 = vpop.f32.mrf.mxu1 }
  0xfd   :  { %v1064_v57 = vld [vmem:[%s5516_s2 + $0x70] sm:$0xff] }
  0xfe   :  { %v4412_v59 = vpop.f32.mrf.mxu0  ;;  %v4414_v63 = vpop.f32.mrf.mxu1  ;;  %3187 = vmatmul.mubr.msk.f32.gmra.mxu0 %vm82_vm1, %v1059_v52  ;;  %3354 = vmatmul.mubr.msk.f32.gmra.mxu1 %vm82_vm1, %v1565_v56  ;;  %v1570_v58 = vld [vmem:[%s5517_s3 + $0x70] sm:$0xff] }
  0xff   :  { %3189 = vmatprep.mubr.msk.f32.mxu0 %vm3476_vm2, %v3475_v0  ;;  %3356 = vmatprep.mubr.msk.f32.mxu1 %vm3476_vm2, %v3475_v0 }
 0x100   :  { %v2857_v7 = vpop.f32.mrf.mxu0  ;;  %v3024_v8 = vpop.f32.mrf.mxu1 }
 0x102   :  { %v4430_v9 = vpop.f32.mrf.mxu0  ;;  %v4432_v10 = vpop.f32.mrf.mxu1  ;;  %3190 = vmatmul.mubr.msk.f32.gmra.mxu0 %vm82_vm1, %v1060_v2  ;;  %3357 = vmatmul.mubr.msk.f32.gmra.mxu1 %vm82_vm1, %v1566_v3 }
 0x103   :  { %3192 = vmatprep.mubr.msk.f32.mxu0 %vm3476_vm2, %v3475_v0  ;;  %3359 = vmatprep.mubr.msk.f32.mxu1 %vm3476_vm2, %v3475_v0 }
 0x104   :  { %v2860_v17 = vpop.f32.mrf.mxu0  ;;  %v3027_v21 = vpop.f32.mrf.mxu1 }
 0x105   :  { %v1571_v17 = vld [vmem:[%s5517_s3 + $0x78] sm:$0xff] }
 0x106   :  { %v4448_v22 = vpop.f32.mrf.mxu0  ;;  %v4450_v23 = vpop.f32.mrf.mxu1  ;;  %3193 = vmatmul.mubr.msk.f32.gmra.mxu0 %vm82_vm1, %v1061_v15  ;;  %3360 = vmatmul.mubr.msk.f32.gmra.mxu1 %vm82_vm1, %v1567_v16  ;;  %v1065_v16 = vld [vmem:[%s5516_s2 + $0x78] sm:$0xff] }
 0x107   :  { %3195 = vmatprep.mubr.msk.f32.mxu0 %vm3476_vm2, %v3475_v0  ;;  %3362 = vmatprep.mubr.msk.f32.mxu1 %vm3476_vm2, %v3475_v0 }
 0x108   :  { %v2863_v30 = vpop.f32.mrf.mxu0  ;;  %v3030_v31 = vpop.f32.mrf.mxu1 }
 0x10a   :  { %v4466_v35 = vpop.f32.mrf.mxu0  ;;  %v4468_v36 = vpop.f32.mrf.mxu1  ;;  %3196 = vmatmul.mubr.msk.f32.gmra.mxu0 %vm82_vm1, %v1062_v28  ;;  %3363 = vmatmul.mubr.msk.f32.gmra.mxu1 %vm82_vm1, %v1568_v29 }
 0x10b   :  { %3198 = vmatprep.mubr.msk.f32.mxu0 %vm3476_vm2, %v3475_v0  ;;  %3365 = vmatprep.mubr.msk.f32.mxu1 %vm3476_vm2, %v3475_v0 }
 0x10c   :  { %v2866_v43 = vpop.f32.mrf.mxu0  ;;  %v3033_v44 = vpop.f32.mrf.mxu1 }
 0x10e   :  { %v4484_v45 = vpop.f32.mrf.mxu0  ;;  %v4486_v52 = vpop.f32.mrf.mxu1  ;;  %3199 = vmatmul.mubr.msk.f32.gmra.mxu0 %vm82_vm1, %v1063_v38  ;;  %3366 = vmatmul.mubr.msk.f32.gmra.mxu1 %vm82_vm1, %v1569_v42  ;;  %v1066_v38 = vld [vmem:[%s5516_s2 + $0x80] sm:$0xff] }
 0x10f   :  { %3201 = vmatprep.mubr.msk.f32.mxu0 %vm3476_vm2, %v3475_v0  ;;  %3368 = vmatprep.mubr.msk.f32.mxu1 %vm3476_vm2, %v3475_v0  ;;  %v1572_v42 = vld [vmem:[%s5517_s3 + $0x80] sm:$0xff] }
 0x110   :  { %v2869_v2 = vpop.f32.mrf.mxu0  ;;  %v3036_v3 = vpop.f32.mrf.mxu1 }
 0x111   :  { %v1067_v3 = vld [vmem:[%s5516_s2 + $0x88] sm:$0xff] }
 0x112   :  { %v4502_v7 = vpop.f32.mrf.mxu0  ;;  %v4504_v8 = vpop.f32.mrf.mxu1  ;;  %3202 = vmatmul.mubr.msk.f32.gmra.mxu0 %vm82_vm1, %v1064_v57  ;;  %3369 = vmatmul.mubr.msk.f32.gmra.mxu1 %vm82_vm1, %v1570_v58 }
 0x113   :  { %3204 = vmatprep.mubr.msk.f32.mxu0 %vm3476_vm2, %v3475_v0  ;;  %3371 = vmatprep.mubr.msk.f32.mxu1 %vm3476_vm2, %v3475_v0 }
 0x114   :  { %v2872_v21 = vpop.f32.mrf.mxu0  ;;  %v3039_v28 = vpop.f32.mrf.mxu1 }
 0x116   :  { %v4520_v29 = vpop.f32.mrf.mxu0  ;;  %v4522_v30 = vpop.f32.mrf.mxu1  ;;  %3205 = vmatmul.mubr.msk.f32.gmra.mxu0 %vm82_vm1, %v1065_v16  ;;  %3372 = vmatmul.mubr.msk.f32.gmra.mxu1 %vm82_vm1, %v1571_v17  ;;  %v1573_v16 = vld [vmem:[%s5517_s3 + $0x88] sm:$0xff] }
 0x117   :  { %3207 = vmatprep.mubr.msk.f32.mxu0 %vm3476_vm2, %v3475_v0  ;;  %3374 = vmatprep.mubr.msk.f32.mxu1 %vm3476_vm2, %v3475_v0 }
 0x118   :  { %v2875_v43 = vpop.f32.mrf.mxu0  ;;  %v3042_v44 = vpop.f32.mrf.mxu1 }
 0x119   :  { %v1068_v43 = vld [vmem:[%s5516_s2 + $0x90] sm:$0xff] }
 0x11a   :  { %v4538_v57 = vpop.f32.mrf.mxu0  ;;  %v4540_v58 = vpop.f32.mrf.mxu1  ;;  %3208 = vmatmul.mubr.msk.f32.gmra.mxu0 %vm82_vm1, %v1066_v38  ;;  %3375 = vmatmul.mubr.msk.f32.gmra.mxu1 %vm82_vm1, %v1572_v42  ;;  %v1574_v44 = vld [vmem:[%s5517_s3 + $0x90] sm:$0xff] }
 0x11b   :  { %3210 = vmatprep.mubr.msk.f32.mxu0 %vm3476_vm2, %v3475_v0  ;;  %3377 = vmatprep.mubr.msk.f32.mxu1 %vm3476_vm2, %v3475_v0 }
 0x11c   :  { %v2878_v17 = vpop.f32.mrf.mxu0  ;;  %v3045_v21 = vpop.f32.mrf.mxu1 }
 0x11e   :  { %v4556_v28 = vpop.f32.mrf.mxu0  ;;  %v4558_v38 = vpop.f32.mrf.mxu1  ;;  %3211 = vmatmul.mubr.msk.f32.gmra.mxu0 %vm82_vm1, %v1067_v3  ;;  %3378 = vmatmul.mubr.msk.f32.gmra.mxu1 %vm82_vm1, %v1573_v16 }
 0x11f   :  { %3213 = vmatprep.mubr.msk.f32.mxu0 %vm3476_vm2, %v3475_v0  ;;  %3380 = vmatprep.mubr.msk.f32.mxu1 %vm3476_vm2, %v3475_v0 }
 0x120   :  { %v2881_v3 = vpop.f32.mrf.mxu0  ;;  %v3048_v17 = vpop.f32.mrf.mxu1 }
 0x121   :  { %v1069_v3 = vld [vmem:[%s5516_s2 + $0x98] sm:$0xff] }
 0x122   :  { %v4574_v16 = vpop.f32.mrf.mxu0  ;;  %v4576_v21 = vpop.f32.mrf.mxu1  ;;  %3214 = vmatmul.mubr.msk.f32.gmra.mxu0 %vm82_vm1, %v1068_v43  ;;  %3381 = vmatmul.mubr.msk.f32.gmra.mxu1 %vm82_vm1, %v1574_v44  ;;  %v1575_v17 = vld [vmem:[%s5517_s3 + $0x98] sm:$0xff] }
 0x123   :  { %3216 = vmatprep.mubr.msk.f32.mxu0 %vm3476_vm2, %v3475_v0  ;;  %3383 = vmatprep.mubr.msk.f32.mxu1 %vm3476_vm2, %v3475_v0 }
 0x124   :  { %v2884_v43 = vpop.f32.mrf.mxu0  ;;  %v3051_v2 = vpop.f32.mrf.mxu1 }
 0x125   :  { %v1070_v2 = vld [vmem:[%s5516_s2 + $0xa0] sm:$0xff] }
 0x126   :  { %v4592_v44 = vpop.f32.mrf.mxu0  ;;  %v4594_v31 = vpop.f32.mrf.mxu1  ;;  %3217 = vmatmul.mubr.msk.f32.gmra.mxu0 %vm82_vm1, %v1069_v3  ;;  %3384 = vmatmul.mubr.msk.f32.gmra.mxu1 %vm82_vm1, %v1575_v17  ;;  %v1576_v43 = vld [vmem:[%s5517_s3 + $0xa0] sm:$0xff] }
 0x127   :  { %3219 = vmatprep.mubr.msk.f32.mxu0 %vm3476_vm2, %v3475_v0  ;;  %3386 = vmatprep.mubr.msk.f32.mxu1 %vm3476_vm2, %v3475_v0 }
 0x128   :  { %v2887_v3 = vpop.f32.mrf.mxu0  ;;  %v3054_v15 = vpop.f32.mrf.mxu1 }
 0x129   :  { %v1071_v15 = vld [vmem:[%s5516_s2 + $0xa8] sm:$0xff] }
 0x12a   :  { %v4610_v17 = vpop.f32.mrf.mxu0  ;;  %v4612_v56 = vpop.f32.mrf.mxu1  ;;  %3220 = vmatmul.mubr.msk.f32.gmra.mxu0 %vm82_vm1, %v1070_v2  ;;  %3387 = vmatmul.mubr.msk.f32.gmra.mxu1 %vm82_vm1, %v1576_v43  ;;  %v1577_v3 = vld [vmem:[%s5517_s3 + $0xa8] sm:$0xff] }
 0x12b   :  { %3222 = vmatprep.mubr.msk.f32.mxu0 %vm3476_vm2, %v3475_v0  ;;  %3389 = vmatprep.mubr.msk.f32.mxu1 %vm3476_vm2, %v3475_v0 }
 0x12c   :  { %v2890_v2 = vpop.f32.mrf.mxu0  ;;  %v3057_v37 = vpop.f32.mrf.mxu1 }
 0x12d   :  { %v1072_v37 = vld [vmem:[%s5516_s2 + $0xb0] sm:$0xff] }
 0x12e   :  { %v4628_v43 = vpop.f32.mrf.mxu0  ;;  %v4630_v24 = vpop.f32.mrf.mxu1  ;;  %3223 = vmatmul.mubr.msk.f32.gmra.mxu0 %vm82_vm1, %v1071_v15  ;;  %3390 = vmatmul.mubr.msk.f32.gmra.mxu1 %vm82_vm1, %v1577_v3  ;;  %v1578_v2 = vld [vmem:[%s5517_s3 + $0xb0] sm:$0xff] }
 0x12f   :  { %3225 = vmatprep.mubr.msk.f32.mxu0 %vm3476_vm2, %v3475_v0  ;;  %3392 = vmatprep.mubr.msk.f32.mxu1 %vm3476_vm2, %v3475_v0 }
 0x130   :  { %v2893_v15 = vpop.f32.mrf.mxu0  ;;  %v3060_v14 = vpop.f32.mrf.mxu1 }
 0x131   :  { %v1073_v14 = vld [vmem:[%s5516_s2 + $0xb8] sm:$0xff] }
 0x132   :  { %v4646_v3 = vpop.f32.mrf.mxu0  ;;  %v4648_v1 = vpop.f32.mrf.mxu1  ;;  %3226 = vmatmul.mubr.msk.f32.gmra.mxu0 %vm82_vm1, %v1072_v37  ;;  %3393 = vmatmul.mubr.msk.f32.gmra.mxu1 %vm82_vm1, %v1578_v2  ;;  %v1579_v15 = vld [vmem:[%s5517_s3 + $0xb8] sm:$0xff] }
 0x133   :  { %3228 = vmatprep.mubr.msk.f32.mxu0 %vm3476_vm2, %v3475_v0  ;;  %3395 = vmatprep.mubr.msk.f32.mxu1 %vm3476_vm2, %v3475_v0 }
 0x134   :  { %v2896_v37 = vpop.f32.mrf.mxu0  ;;  %v3063_v51 = vpop.f32.mrf.mxu1 }
 0x135   :  { %v1074_v51 = vld [vmem:[%s5516_s2 + $0xc0] sm:$0xff] }
 0x136   :  { %v4664_v2 = vpop.f32.mrf.mxu0  ;;  %v4666_v41 = vpop.f32.mrf.mxu1  ;;  %3229 = vmatmul.mubr.msk.f32.gmra.mxu0 %vm82_vm1, %v1073_v14  ;;  %3396 = vmatmul.mubr.msk.f32.gmra.mxu1 %vm82_vm1, %v1579_v15  ;;  %v1580_v37 = vld [vmem:[%s5517_s3 + $0xc0] sm:$0xff] }
 0x137   :  { %5570 = vst [vmem:[#allocation2_spill] sm:$0xff] %v4664_v2  ;;  %5571 = vst [vmem:[#allocation3_spill] sm:$0xff] %v4666_v41  ;;  %3231 = vmatprep.mubr.msk.f32.mxu0 %vm3476_vm2, %v3475_v0  ;;  %3398 = vmatprep.mubr.msk.f32.mxu1 %vm3476_vm2, %v3475_v0 }
 0x138   :  { %v2899_v14 = vpop.f32.mrf.mxu0  ;;  %v3066_v34 = vpop.f32.mrf.mxu1 }
 0x139   :  { %v1075_v34 = vld [vmem:[%s5516_s2 + $0xc8] sm:$0xff] }
 0x13a   :  { %v4682_v15 = vpop.f32.mrf.mxu0  ;;  %v4684_v27 = vpop.f32.mrf.mxu1  ;;  %3232 = vmatmul.mubr.msk.f32.gmra.mxu0 %vm82_vm1, %v1074_v51  ;;  %3399 = vmatmul.mubr.msk.f32.gmra.mxu1 %vm82_vm1, %v1580_v37  ;;  %v1581_v14 = vld [vmem:[%s5517_s3 + $0xc8] sm:$0xff] }
 0x13b   :  { %5572 = vst [vmem:[#allocation4_spill] sm:$0xff] %v4682_v15  ;;  %5573 = vst [vmem:[#allocation5_spill] sm:$0xff] %v4684_v27  ;;  %3234 = vmatprep.mubr.msk.f32.mxu0 %vm3476_vm2, %v3475_v0  ;;  %3401 = vmatprep.mubr.msk.f32.mxu1 %vm3476_vm2, %v3475_v0 }
 0x13c   :  { %v2902_v51 = vpop.f32.mrf.mxu0  ;;  %v3069_v20 = vpop.f32.mrf.mxu1 }
 0x13d   :  { %v1076_v20 = vld [vmem:[%s5516_s2 + $0xd0] sm:$0xff] }
 0x13e   :  { %v4700_v37 = vpop.f32.mrf.mxu0  ;;  %v4702_v13 = vpop.f32.mrf.mxu1  ;;  %3235 = vmatmul.mubr.msk.f32.gmra.mxu0 %vm82_vm1, %v1075_v34  ;;  %3402 = vmatmul.mubr.msk.f32.gmra.mxu1 %vm82_vm1, %v1581_v14  ;;  %v1582_v51 = vld [vmem:[%s5517_s3 + $0xd0] sm:$0xff] }
 0x13f   :  { %5574 = vst [vmem:[#allocation6_spill] sm:$0xff] %v4700_v37  ;;  %5575 = vst [vmem:[#allocation7_spill] sm:$0xff] %v4702_v13  ;;  %3237 = vmatprep.mubr.msk.f32.mxu0 %vm3476_vm2, %v3475_v0  ;;  %3404 = vmatprep.mubr.msk.f32.mxu1 %vm3476_vm2, %v3475_v0  ;;  %v5620_v13 = vmax.f32 %v4232_v46, %v4235_v47 }
 0x140   :  { %v2905_v34 = vpop.f32.mrf.mxu0  ;;  %v3072_v6 = vpop.f32.mrf.mxu1 }
 0x141   :  { %v1077_v6 = vld [vmem:[%s5516_s2 + $0xd8] sm:$0xff] }
 0x142   :  { %v4718_v14 = vpop.f32.mrf.mxu0  ;;  %v4720_v62 = vpop.f32.mrf.mxu1  ;;  %3238 = vmatmul.mubr.msk.f32.gmra.mxu0 %vm82_vm1, %v1076_v20  ;;  %3405 = vmatmul.mubr.msk.f32.gmra.mxu1 %vm82_vm1, %v1582_v51  ;;  %v1583_v34 = vld [vmem:[%s5517_s3 + $0xd8] sm:$0xff] }
 0x143   :  { %5576 = vst [vmem:[#allocation8_spill] sm:$0xff] %v4718_v14  ;;  %5577 = vst [vmem:[#allocation9_spill] sm:$0xff] %v4720_v62  ;;  %3240 = vmatprep.mubr.msk.f32.mxu0 %vm3476_vm2, %v3475_v0  ;;  %3407 = vmatprep.mubr.msk.f32.mxu1 %vm3476_vm2, %v3475_v0 }
 0x144   :  { %v2908_v20 = vpop.f32.mrf.mxu0  ;;  %v3075_v55 = vpop.f32.mrf.mxu1 }
 0x145   :  { %v1078_v55 = vld [vmem:[%s5516_s2 + $0xe0] sm:$0xff] }
 0x146   :  { %v4736_v51 = vpop.f32.mrf.mxu0  ;;  %v4738_v48 = vpop.f32.mrf.mxu1  ;;  %3241 = vmatmul.mubr.msk.f32.gmra.mxu0 %vm82_vm1, %v1077_v6  ;;  %3408 = vmatmul.mubr.msk.f32.gmra.mxu1 %vm82_vm1, %v1583_v34  ;;  %v1584_v20 = vld [vmem:[%s5517_s3 + $0xe0] sm:$0xff] }
 0x147   :  { %5578 = vst [vmem:[#allocation10_spill] sm:$0xff] %v4736_v51  ;;  %5579 = vst [vmem:[#allocation11_spill] sm:$0xff] %v4738_v48  ;;  %3243 = vmatprep.mubr.msk.f32.mxu0 %vm3476_vm2, %v3475_v0  ;;  %3410 = vmatprep.mubr.msk.f32.mxu1 %vm3476_vm2, %v3475_v0 }
 0x148   :  { %v2911_v6 = vpop.f32.mrf.mxu0  ;;  %v3078_v62 = vpop.f32.mrf.mxu1 }
 0x149   :  { %v1079_v62 = vld [vmem:[%s5516_s2 + $0xe8] sm:$0xff] }
 0x14a   :  { %v4754_v34 = vpop.f32.mrf.mxu0  ;;  %v4756_v14 = vpop.f32.mrf.mxu1  ;;  %3244 = vmatmul.mubr.msk.f32.gmra.mxu0 %vm82_vm1, %v1078_v55  ;;  %3411 = vmatmul.mubr.msk.f32.gmra.mxu1 %vm82_vm1, %v1584_v20  ;;  %v1585_v6 = vld [vmem:[%s5517_s3 + $0xe8] sm:$0xff] }
 0x14b   :  { %5580 = vst [vmem:[#allocation12_spill] sm:$0xff] %v4754_v34  ;;  %5581 = vst [vmem:[#allocation13_spill] sm:$0xff] %v4756_v14  ;;  %3246 = vmatprep.mubr.msk.f32.mxu0 %vm3476_vm2, %v3475_v0  ;;  %3413 = vmatprep.mubr.msk.f32.mxu1 %vm3476_vm2, %v3475_v0 }
 0x14c   :  { %v2914_v55 = vpop.f32.mrf.mxu0  ;;  %v3081_v48 = vpop.f32.mrf.mxu1 }
 0x14d   :  { %v1080_v48 = vld [vmem:[%s5516_s2 + $0xf0] sm:$0xff] }
 0x14e   :  { %v4772_v20 = vpop.f32.mrf.mxu0  ;;  %v4774_v51 = vpop.f32.mrf.mxu1  ;;  %3247 = vmatmul.mubr.msk.f32.gmra.mxu0 %vm82_vm1, %v1079_v62  ;;  %3414 = vmatmul.mubr.msk.f32.gmra.mxu1 %vm82_vm1, %v1585_v6  ;;  %v1586_v55 = vld [vmem:[%s5517_s3 + $0xf0] sm:$0xff] }
 0x14f   :  { %5582 = vst [vmem:[#allocation14_spill] sm:$0xff] %v4772_v20  ;;  %5583 = vst [vmem:[#allocation15_spill] sm:$0xff] %v4774_v51  ;;  %3249 = vmatprep.mubr.msk.f32.mxu0 %vm3476_vm2, %v3475_v0  ;;  %3416 = vmatprep.mubr.msk.f32.mxu1 %vm3476_vm2, %v3475_v0 }
 0x150   :  { %v2917_v62 = vpop.f32.mrf.mxu0  ;;  %v3084_v14 = vpop.f32.mrf.mxu1 }
 0x151   :  { %v1081_v14 = vld [vmem:[%s5516_s2 + $0xf8] sm:$0xff] }
 0x152   :  { %v4790_v6 = vpop.f32.mrf.mxu0  ;;  %v4792_v34 = vpop.f32.mrf.mxu1  ;;  %3250 = vmatmul.mubr.msk.f32.gmra.mxu0 %vm82_vm1, %v1080_v48  ;;  %3417 = vmatmul.mubr.msk.f32.gmra.mxu1 %vm82_vm1, %v1586_v55  ;;  %v1587_v62 = vld [vmem:[%s5517_s3 + $0xf8] sm:$0xff] }
 0x153   :  { %5584 = vst [vmem:[#allocation16_spill] sm:$0xff] %v4790_v6  ;;  %5585 = vst [vmem:[#allocation17_spill] sm:$0xff] %v4792_v34  ;;  %3252 = vmatprep.mubr.msk.f32.mxu0 %vm3476_vm2, %v3475_v0  ;;  %3419 = vmatprep.mubr.msk.f32.mxu1 %vm3476_vm2, %v3475_v0 }
 0x154   :  { %v2920_v48 = vpop.f32.mrf.mxu0  ;;  %v3087_v51 = vpop.f32.mrf.mxu1 }
 0x155   :  { %v1082_v51 = vld [vmem:[%s5516_s2 + $0x100] sm:$0xff] }
 0x156   :  { %v4808_v55 = vpop.f32.mrf.mxu0  ;;  %v4810_v20 = vpop.f32.mrf.mxu1  ;;  %3253 = vmatmul.mubr.msk.f32.gmra.mxu0 %vm82_vm1, %v1081_v14  ;;  %3420 = vmatmul.mubr.msk.f32.gmra.mxu1 %vm82_vm1, %v1587_v62  ;;  %v1588_v48 = vld [vmem:[%s5517_s3 + $0x100] sm:$0xff] }
 0x157   :  { %5586 = vst [vmem:[#allocation18_spill] sm:$0xff] %v4808_v55  ;;  %5587 = vst [vmem:[#allocation19_spill] sm:$0xff] %v4810_v20  ;;  %3255 = vmatprep.mubr.msk.f32.mxu0 %vm3476_vm2, %v3475_v0  ;;  %3422 = vmatprep.mubr.msk.f32.mxu1 %vm3476_vm2, %v3475_v0 }
 0x158   :  { %v2923_v14 = vpop.f32.mrf.mxu0  ;;  %v3090_v34 = vpop.f32.mrf.mxu1 }
 0x159   :  { %v1083_v34 = vld [vmem:[%s5516_s2 + $0x108] sm:$0xff] }
 0x15a   :  { %v4826_v62 = vpop.f32.mrf.mxu0  ;;  %v4828_v6 = vpop.f32.mrf.mxu1  ;;  %3256 = vmatmul.mubr.msk.f32.gmra.mxu0 %vm82_vm1, %v1082_v51  ;;  %3423 = vmatmul.mubr.msk.f32.gmra.mxu1 %vm82_vm1, %v1588_v48  ;;  %v1589_v14 = vld [vmem:[%s5517_s3 + $0x108] sm:$0xff] }
 0x15b   :  { %5588 = vst [vmem:[#allocation20_spill] sm:$0xff] %v4826_v62  ;;  %5589 = vst [vmem:[#allocation21_spill] sm:$0xff] %v4828_v6  ;;  %3258 = vmatprep.mubr.msk.f32.mxu0 %vm3476_vm2, %v3475_v0  ;;  %3425 = vmatprep.mubr.msk.f32.mxu1 %vm3476_vm2, %v3475_v0 }
 0x15c   :  { %v2926_v51 = vpop.f32.mrf.mxu0  ;;  %v3093_v20 = vpop.f32.mrf.mxu1 }
 0x15d   :  { %v1084_v20 = vld [vmem:[%s5516_s2 + $0x110] sm:$0xff] }
 0x15e   :  { %v4844_v48 = vpop.f32.mrf.mxu0  ;;  %v4846_v55 = vpop.f32.mrf.mxu1  ;;  %3259 = vmatmul.mubr.msk.f32.gmra.mxu0 %vm82_vm1, %v1083_v34  ;;  %3426 = vmatmul.mubr.msk.f32.gmra.mxu1 %vm82_vm1, %v1589_v14  ;;  %v1590_v51 = vld [vmem:[%s5517_s3 + $0x110] sm:$0xff] }
 0x15f   :  { %5590 = vst [vmem:[#allocation22_spill] sm:$0xff] %v4844_v48  ;;  %5591 = vst [vmem:[#allocation23_spill] sm:$0xff] %v4846_v55  ;;  %3261 = vmatprep.mubr.msk.f32.mxu0 %vm3476_vm2, %v3475_v0  ;;  %3428 = vmatprep.mubr.msk.f32.mxu1 %vm3476_vm2, %v3475_v0 }
 0x160   :  { %v2929_v34 = vpop.f32.mrf.mxu0  ;;  %v3096_v6 = vpop.f32.mrf.mxu1 }
 0x161   :  { %v1085_v6 = vld [vmem:[%s5516_s2 + $0x118] sm:$0xff] }
 0x162   :  { %v4862_v14 = vpop.f32.mrf.mxu0  ;;  %v4864_v62 = vpop.f32.mrf.mxu1  ;;  %3262 = vmatmul.mubr.msk.f32.gmra.mxu0 %vm82_vm1, %v1084_v20  ;;  %3429 = vmatmul.mubr.msk.f32.gmra.mxu1 %vm82_vm1, %v1590_v51  ;;  %v1591_v34 = vld [vmem:[%s5517_s3 + $0x118] sm:$0xff] }
 0x163   :  { %5592 = vst [vmem:[#allocation24_spill] sm:$0xff] %v4862_v14  ;;  %5593 = vst [vmem:[#allocation25_spill] sm:$0xff] %v4864_v62  ;;  %3264 = vmatprep.mubr.msk.f32.mxu0 %vm3476_vm2, %v3475_v0  ;;  %3431 = vmatprep.mubr.msk.f32.mxu1 %vm3476_vm2, %v3475_v0 }
 0x164   :  { %v2932_v20 = vpop.f32.mrf.mxu0  ;;  %v3099_v55 = vpop.f32.mrf.mxu1 }
 0x165   :  { %v1086_v55 = vld [vmem:[%s5516_s2 + $0x120] sm:$0xff] }
 0x166   :  { %v4880_v51 = vpop.f32.mrf.mxu0  ;;  %v4882_v48 = vpop.f32.mrf.mxu1  ;;  %3265 = vmatmul.mubr.msk.f32.gmra.mxu0 %vm82_vm1, %v1085_v6  ;;  %3432 = vmatmul.mubr.msk.f32.gmra.mxu1 %vm82_vm1, %v1591_v34  ;;  %v1592_v20 = vld [vmem:[%s5517_s3 + $0x120] sm:$0xff] }
 0x167   :  { %5594 = vst [vmem:[#allocation26_spill] sm:$0xff] %v4880_v51  ;;  %5595 = vst [vmem:[#allocation27_spill] sm:$0xff] %v4882_v48  ;;  %3267 = vmatprep.mubr.msk.f32.mxu0 %vm3476_vm2, %v3475_v0  ;;  %3434 = vmatprep.mubr.msk.f32.mxu1 %vm3476_vm2, %v3475_v0 }
 0x168   :  { %v2935_v6 = vpop.f32.mrf.mxu0  ;;  %v3102_v62 = vpop.f32.mrf.mxu1 }
 0x169   :  { %v1087_v62 = vld [vmem:[%s5516_s2 + $0x128] sm:$0xff] }
 0x16a   :  { %v4898_v34 = vpop.f32.mrf.mxu0  ;;  %v4900_v14 = vpop.f32.mrf.mxu1  ;;  %3268 = vmatmul.mubr.msk.f32.gmra.mxu0 %vm82_vm1, %v1086_v55  ;;  %3435 = vmatmul.mubr.msk.f32.gmra.mxu1 %vm82_vm1, %v1592_v20  ;;  %v1593_v6 = vld [vmem:[%s5517_s3 + $0x128] sm:$0xff] }
 0x16b   :  { %5596 = vst [vmem:[#allocation28_spill] sm:$0xff] %v4898_v34  ;;  %5597 = vst [vmem:[#allocation29_spill] sm:$0xff] %v4900_v14  ;;  %3270 = vmatprep.mubr.msk.f32.mxu0 %vm3476_vm2, %v3475_v0  ;;  %3437 = vmatprep.mubr.msk.f32.mxu1 %vm3476_vm2, %v3475_v0 }
 0x16c   :  { %v2938_v55 = vpop.f32.mrf.mxu0  ;;  %v3105_v48 = vpop.f32.mrf.mxu1 }
 0x16d   :  { %v1088_v48 = vld [vmem:[%s5516_s2 + $0x130] sm:$0xff] }
 0x16e   :  { %v4916_v20 = vpop.f32.mrf.mxu0  ;;  %v4918_v51 = vpop.f32.mrf.mxu1  ;;  %3271 = vmatmul.mubr.msk.f32.gmra.mxu0 %vm82_vm1, %v1087_v62  ;;  %3438 = vmatmul.mubr.msk.f32.gmra.mxu1 %vm82_vm1, %v1593_v6  ;;  %v1594_v55 = vld [vmem:[%s5517_s3 + $0x130] sm:$0xff] }
 0x16f   :  { %5598 = vst [vmem:[#allocation30_spill] sm:$0xff] %v4916_v20  ;;  %5599 = vst [vmem:[#allocation31_spill] sm:$0xff] %v4918_v51  ;;  %3273 = vmatprep.mubr.msk.f32.mxu0 %vm3476_vm2, %v3475_v0  ;;  %3440 = vmatprep.mubr.msk.f32.mxu1 %vm3476_vm2, %v3475_v0 }
 0x170   :  { %v2941_v62 = vpop.f32.mrf.mxu0  ;;  %v3108_v14 = vpop.f32.mrf.mxu1 }
 0x171   :  { %v1089_v14 = vld [vmem:[%s5516_s2 + $0x138] sm:$0xff] }
 0x172   :  { %v4934_v6 = vpop.f32.mrf.mxu0  ;;  %v4936_v34 = vpop.f32.mrf.mxu1  ;;  %3274 = vmatmul.mubr.msk.f32.gmra.mxu0 %vm82_vm1, %v1088_v48  ;;  %3441 = vmatmul.mubr.msk.f32.gmra.mxu1 %vm82_vm1, %v1594_v55  ;;  %v1595_v62 = vld [vmem:[%s5517_s3 + $0x138] sm:$0xff] }
 0x173   :  { %5600 = vst [vmem:[#allocation32_spill] sm:$0xff] %v4934_v6  ;;  %5601 = vst [vmem:[#allocation33_spill] sm:$0xff] %v4936_v34  ;;  %3276 = vmatprep.mubr.msk.f32.mxu0 %vm3476_vm2, %v3475_v0  ;;  %3443 = vmatprep.mubr.msk.f32.mxu1 %vm3476_vm2, %v3475_v0 }
 0x174   :  { %v2944_v48 = vpop.f32.mrf.mxu0  ;;  %v3111_v51 = vpop.f32.mrf.mxu1 }
 0x175   :  { %v1090_v51 = vld [vmem:[%s5516_s2 + $0x140] sm:$0xff] }
 0x176   :  { %v4952_v55 = vpop.f32.mrf.mxu0  ;;  %v4954_v20 = vpop.f32.mrf.mxu1  ;;  %3277 = vmatmul.mubr.msk.f32.gmra.mxu0 %vm82_vm1, %v1089_v14  ;;  %3444 = vmatmul.mubr.msk.f32.gmra.mxu1 %vm82_vm1, %v1595_v62  ;;  %v1596_v48 = vld [vmem:[%s5517_s3 + $0x140] sm:$0xff] }
 0x177   :  { %5602 = vst [vmem:[#allocation34_spill] sm:$0xff] %v4952_v55  ;;  %5603 = vst [vmem:[#allocation35_spill] sm:$0xff] %v4954_v20  ;;  %3279 = vmatprep.mubr.msk.f32.mxu0 %vm3476_vm2, %v3475_v0  ;;  %3446 = vmatprep.mubr.msk.f32.mxu1 %vm3476_vm2, %v3475_v0 }
 0x178   :  { %v2947_v14 = vpop.f32.mrf.mxu0  ;;  %v3114_v34 = vpop.f32.mrf.mxu1 }
 0x179   :  { %v1091_v34 = vld [vmem:[%s5516_s2 + $0x148] sm:$0xff] }
 0x17a   :  { %v4970_v62 = vpop.f32.mrf.mxu0  ;;  %v4972_v6 = vpop.f32.mrf.mxu1  ;;  %3280 = vmatmul.mubr.msk.f32.gmra.mxu0 %vm82_vm1, %v1090_v51  ;;  %3447 = vmatmul.mubr.msk.f32.gmra.mxu1 %vm82_vm1, %v1596_v48  ;;  %v1597_v14 = vld [vmem:[%s5517_s3 + $0x148] sm:$0xff] }
 0x17b   :  { %5604 = vst [vmem:[#allocation36_spill] sm:$0xff] %v4970_v62  ;;  %5605 = vst [vmem:[#allocation37_spill] sm:$0xff] %v4972_v6  ;;  %3282 = vmatprep.mubr.msk.f32.mxu0 %vm3476_vm2, %v3475_v0  ;;  %3449 = vmatprep.mubr.msk.f32.mxu1 %vm3476_vm2, %v3475_v0 }
 0x17c   :  { %v2950_v51 = vpop.f32.mrf.mxu0  ;;  %v3117_v20 = vpop.f32.mrf.mxu1 }
 0x17d   :  { %v1092_v20 = vld [vmem:[%s5516_s2 + $0x150] sm:$0xff] }
 0x17e   :  { %v4988_v48 = vpop.f32.mrf.mxu0  ;;  %v4990_v55 = vpop.f32.mrf.mxu1  ;;  %3283 = vmatmul.mubr.msk.f32.gmra.mxu0 %vm82_vm1, %v1091_v34  ;;  %3450 = vmatmul.mubr.msk.f32.gmra.mxu1 %vm82_vm1, %v1597_v14  ;;  %v1598_v51 = vld [vmem:[%s5517_s3 + $0x150] sm:$0xff] }
 0x17f   :  { %5606 = vst [vmem:[#allocation38_spill] sm:$0xff] %v4988_v48  ;;  %5607 = vst [vmem:[#allocation39_spill] sm:$0xff] %v4990_v55  ;;  %3285 = vmatprep.mubr.msk.f32.mxu0 %vm3476_vm2, %v3475_v0  ;;  %3452 = vmatprep.mubr.msk.f32.mxu1 %vm3476_vm2, %v3475_v0 }
 0x180   :  { %v2953_v34 = vpop.f32.mrf.mxu0  ;;  %v3120_v6 = vpop.f32.mrf.mxu1 }
 0x181   :  { %v1093_v6 = vld [vmem:[%s5516_s2 + $0x158] sm:$0xff] }
 0x182   :  { %v5006_v14 = vpop.f32.mrf.mxu0  ;;  %v5008_v62 = vpop.f32.mrf.mxu1  ;;  %3286 = vmatmul.mubr.msk.f32.gmra.mxu0 %vm82_vm1, %v1092_v20  ;;  %3453 = vmatmul.mubr.msk.f32.gmra.mxu1 %vm82_vm1, %v1598_v51  ;;  %v1599_v34 = vld [vmem:[%s5517_s3 + $0x158] sm:$0xff] }
 0x183   :  { %5608 = vst [vmem:[#allocation40_spill] sm:$0xff] %v5006_v14  ;;  %5609 = vst [vmem:[#allocation41_spill] sm:$0xff] %v5008_v62  ;;  %3288 = vmatprep.mubr.msk.f32.mxu0 %vm3476_vm2, %v3475_v0  ;;  %3455 = vmatprep.mubr.msk.f32.mxu1 %vm3476_vm2, %v3475_v0 }
 0x184   :  { %v2956_v20 = vpop.f32.mrf.mxu0  ;;  %v3123_v55 = vpop.f32.mrf.mxu1 }
 0x185   :  { %v1094_v55 = vld [vmem:[%s5516_s2 + $0x160] sm:$0xff] }
 0x186   :  { %v5024_v51 = vpop.f32.mrf.mxu0  ;;  %v5026_v48 = vpop.f32.mrf.mxu1  ;;  %3289 = vmatmul.mubr.msk.f32.gmra.mxu0 %vm82_vm1, %v1093_v6  ;;  %3456 = vmatmul.mubr.msk.f32.gmra.mxu1 %vm82_vm1, %v1599_v34  ;;  %v1600_v20 = vld [vmem:[%s5517_s3 + $0x160] sm:$0xff] }
 0x187   :  { %5610 = vst [vmem:[#allocation42_spill] sm:$0xff] %v5024_v51  ;;  %5611 = vst [vmem:[#allocation43_spill] sm:$0xff] %v5026_v48  ;;  %3291 = vmatprep.mubr.msk.f32.mxu0 %vm3476_vm2, %v3475_v0  ;;  %3458 = vmatprep.mubr.msk.f32.mxu1 %vm3476_vm2, %v3475_v0 }
 0x188   :  { %v2959_v6 = vpop.f32.mrf.mxu0  ;;  %v3126_v62 = vpop.f32.mrf.mxu1 }
 0x189   :  { %v1095_v62 = vld [vmem:[%s5516_s2 + $0x168] sm:$0xff] }
 0x18a   :  { %v5042_v34 = vpop.f32.mrf.mxu0  ;;  %v5044_v14 = vpop.f32.mrf.mxu1  ;;  %3292 = vmatmul.mubr.msk.f32.gmra.mxu0 %vm82_vm1, %v1094_v55  ;;  %3459 = vmatmul.mubr.msk.f32.gmra.mxu1 %vm82_vm1, %v1600_v20  ;;  %v1601_v6 = vld [vmem:[%s5517_s3 + $0x168] sm:$0xff] }
 0x18b   :  { %5612 = vst [vmem:[#allocation44_spill] sm:$0xff] %v5042_v34  ;;  %5613 = vst [vmem:[#allocation45_spill] sm:$0xff] %v5044_v14  ;;  %3294 = vmatprep.mubr.msk.f32.mxu0 %vm3476_vm2, %v3475_v0  ;;  %3461 = vmatprep.mubr.msk.f32.mxu1 %vm3476_vm2, %v3475_v0 }
 0x18c   :  { %v2962_v55 = vpop.f32.mrf.mxu0  ;;  %v3129_v48 = vpop.f32.mrf.mxu1 }
 0x18d   :  { %v1096_v48 = vld [vmem:[%s5516_s2 + $0x170] sm:$0xff] }
 0x18e   :  { %v5060_v20 = vpop.f32.mrf.mxu0  ;;  %v5062_v51 = vpop.f32.mrf.mxu1  ;;  %3295 = vmatmul.mubr.msk.f32.gmra.mxu0 %vm82_vm1, %v1095_v62  ;;  %3462 = vmatmul.mubr.msk.f32.gmra.mxu1 %vm82_vm1, %v1601_v6  ;;  %v1602_v55 = vld [vmem:[%s5517_s3 + $0x170] sm:$0xff] }
 0x18f   :  { %5614 = vst [vmem:[#allocation46_spill] sm:$0xff] %v5060_v20  ;;  %5615 = vst [vmem:[#allocation47_spill] sm:$0xff] %v5062_v51  ;;  %3297 = vmatprep.mubr.msk.f32.mxu0 %vm3476_vm2, %v3475_v0  ;;  %3464 = vmatprep.mubr.msk.f32.mxu1 %vm3476_vm2, %v3475_v0 }
 0x190   :  { %v2965_v62 = vpop.f32.mrf.mxu0  ;;  %v3132_v14 = vpop.f32.mrf.mxu1 }
 0x191   :  { %v1097_v14 = vld [vmem:[%s5516_s2 + $0x178] sm:$0xff] }
 0x192   :  { %v5078_v6 = vpop.f32.mrf.mxu0  ;;  %v5080_v34 = vpop.f32.mrf.mxu1  ;;  %3298 = vmatmul.mubr.msk.f32.gmra.mxu0 %vm82_vm1, %v1096_v48  ;;  %3465 = vmatmul.mubr.msk.f32.gmra.mxu1 %vm82_vm1, %v1602_v55  ;;  %v1603_v62 = vld [vmem:[%s5517_s3 + $0x178] sm:$0xff] }
 0x193   :  { %5616 = vst [vmem:[#allocation48_spill] sm:$0xff] %v5078_v6  ;;  %5617 = vst [vmem:[#allocation49_spill] sm:$0xff] %v5080_v34  ;;  %3300 = vmatprep.mubr.msk.f32.mxu0 %vm3476_vm2, %v3475_v0  ;;  %3467 = vmatprep.mubr.msk.f32.mxu1 %vm3476_vm2, %v3475_v0 }
 0x194   :  { %v2968_v48 = vpop.f32.mrf.mxu0  ;;  %v3135_v51 = vpop.f32.mrf.mxu1 }
 0x195   :  { %v1098_v51 = vld [vmem:[%s5516_s2 + $0x180] sm:$0xff] }
 0x196   :  { %v5096_v55 = vpop.f32.mrf.mxu0  ;;  %v5098_v20 = vpop.f32.mrf.mxu1  ;;  %3301 = vmatmul.mubr.msk.f32.gmra.mxu0 %vm82_vm1, %v1097_v14  ;;  %3468 = vmatmul.mubr.msk.f32.gmra.mxu1 %vm82_vm1, %v1603_v62  ;;  %v1604_v48 = vld [vmem:[%s5517_s3 + $0x180] sm:$0xff] }
 0x197   :  { %5618 = vst [vmem:[#allocation50_spill] sm:$0xff] %v5096_v55  ;;  %5619 = vst [vmem:[#allocation51_spill] sm:$0xff] %v5098_v20  ;;  %3303 = vmatprep.mubr.msk.f32.mxu0 %vm3476_vm2, %v3475_v0  ;;  %3470 = vmatprep.mubr.msk.f32.mxu1 %vm3476_vm2, %v3475_v0  ;;  %v5119_v0 = vld [vmem:[%s5518_s5] ss:$0 sm:$0xff] }
 0x198   :  { %v2971_v14 = vpop.f32.mrf.mxu0  ;;  %v3138_v34 = vpop.f32.mrf.mxu1 }
 0x19a   :  { %v1312_v62 = vpop.f32.mrf.mxu0  ;;  %3304 = vmatmul.mubr.msk.f32.gmra.mxu0 %vm82_vm1, %v1098_v51  ;;  %v1818_v42 = vpop.f32.mrf.mxu1  ;;  %3471 = vmatmul.mubr.msk.f32.gmra.mxu1 %vm82_vm1, %v1604_v48 }
 0x19b   :  { %v2111_v20 = vmax.f32 %v1312_v62, %v1818_v42  ;;  %v5621_v62 = vmax.f32 %v4250_v53, %v4252_v54 }
 0x19c   :  { %v3161_v55 = vpop.f32.mrf.mxu0  ;;  %v3328_v6 = vpop.f32.mrf.mxu1 }
 0x19d   :  { %v2160_v37 = vmax.f32 %v5620_v13, %v2111_v20 }
 0x19e   :  { %v1317_v14 = vpop.f32.mrf.mxu0  ;;  %v1823_v34 = vpop.f32.mrf.mxu1 }
 0x19f   :  { %v2216_v27 = vadd.f32 %v5119_v0, %v2160_v37  ;;  %v2112_v51 = vmax.f32 %v1317_v14, %v1823_v34 }
 0x1a0   :  { %v3164_v15 = vpop.f32.mrf.mxu0  ;;  %v3331_v48 = vpop.f32.mrf.mxu1 }
 0x1a1   :  { %v2265_v42 = vmax.f32 %v2216_v27, 0.0  ;;  %v2161_v41 = vmax.f32 %v5621_v62, %v2112_v51  ;;  %v5622_v27 = vmax.f32 %v4268_v60, %v4270_v61  ;;  %v5623_v51 = vmax.f32 %v4286_v4, %v4288_v5 }
 0x1a2   :  { %v1322_v2 = vpop.f32.mrf.mxu0  ;;  %v1828_v55 = vpop.f32.mrf.mxu1 }
 0x1a3   :  { %2315 = vst.msk [vmem:[%s5519_s6] sm:$0xff] %vm2314_vm3, %v2265_v42  ;;  %v2217_v46 = vadd.f32 %v5119_v0, %v2161_v41  ;;  %v2113_v47 = vmax.f32 %v1322_v2, %v1828_v55 }
 0x1a4   :  { %v3167_v13 = vpop.f32.mrf.mxu0  ;;  %v3334_v37 = vpop.f32.mrf.mxu1 }
 0x1a5   :  { %v2266_v20 = vmax.f32 %v2217_v46, 0.0  ;;  %v2162_v15 = vmax.f32 %v5622_v27, %v2113_v47  ;;  %v5624_v13 = vmax.f32 %v4304_v11, %v4306_v12 }
 0x1a6   :  { %v1327_v6 = vpop.f32.mrf.mxu0  ;;  %v1833_v53 = vpop.f32.mrf.mxu1 }
 0x1a7   :  { %2316 = vst.msk [vmem:[%s5519_s6 + $0x8] sm:$0xff] %vm2314_vm3, %v2266_v20  ;;  %v2218_v54 = vadd.f32 %v5119_v0, %v2162_v15  ;;  %v2114_v14 = vmax.f32 %v1327_v6, %v1833_v53 }
 0x1a8   :  { %v3170_v34 = vpop.f32.mrf.mxu0  ;;  %v3337_v41 = vpop.f32.mrf.mxu1 }
 0x1a9   :  { %v2267_v2 = vmax.f32 %v2218_v54, 0.0  ;;  %v2163_v48 = vmax.f32 %v5623_v51, %v2114_v14  ;;  %v5625_v54 = vmax.f32 %v4322_v18, %v4324_v19 }
 0x1aa   :  { %v1332_v42 = vpop.f32.mrf.mxu0  ;;  %v1838_v60 = vpop.f32.mrf.mxu1 }
 0x1ab   :  { %2317 = vst.msk [vmem:[%s5519_s6 + $0x10] sm:$0xff] %vm2314_vm3, %v2267_v2  ;;  %v2219_v61 = vadd.f32 %v5119_v0, %v2163_v48  ;;  %v2115_v62 = vmax.f32 %v1332_v42, %v1838_v60  ;;  %v5626_v42 = vmax.f32 %v4340_v25, %v4342_v26 }
 0x1ac   :  { %v3173_v55 = vpop.f32.mrf.mxu0  ;;  %v3340_v46 = vpop.f32.mrf.mxu1 }
 0x1ad   :  { %v2268_v47 = vmax.f32 %v2219_v61, 0.0  ;;  %v2164_v37 = vmax.f32 %v5624_v13, %v2115_v62  ;;  %v5627_v13 = vmax.f32 %v4358_v32, %v4360_v33 }
 0x1ae   :  { %v1337_v20 = vpop.f32.mrf.mxu0  ;;  %v1843_v4 = vpop.f32.mrf.mxu1 }
 0x1af   :  { %2318 = vst.msk [vmem:[%s5519_s6 + $0x18] sm:$0xff] %vm2314_vm3, %v2268_v47  ;;  %v2220_v5 = vadd.f32 %v5119_v0, %v2164_v37  ;;  %v2116_v27 = vmax.f32 %v1337_v20, %v1843_v4 }
 0x1b0   :  { %v3176_v15 = vpop.f32.mrf.mxu0  ;;  %v3343_v6 = vpop.f32.mrf.mxu1 }
 0x1b1   :  { %v2269_v53 = vmax.f32 %v2220_v5, 0.0  ;;  %v2165_v14 = vmax.f32 %v5625_v54, %v2116_v27  ;;  %v5628_v6 = vmax.f32 %v4376_v39, %v4378_v40 }
 0x1b2   :  { %v1342_v34 = vpop.f32.mrf.mxu0  ;;  %v1848_v11 = vpop.f32.mrf.mxu1 }
 0x1b3   :  { %2319 = vst.msk [vmem:[%s5519_s6 + $0x20] sm:$0xff] %vm2314_vm3, %v2269_v53  ;;  %v2221_v12 = vadd.f32 %v5119_v0, %v2165_v14  ;;  %v2117_v41 = vmax.f32 %v1342_v34, %v1848_v11 }
 0x1b4   :  { %v3179_v2 = vpop.f32.mrf.mxu0  ;;  %v3346_v51 = vpop.f32.mrf.mxu1 }
 0x1b5   :  { %v2270_v48 = vmax.f32 %v2221_v12, 0.0  ;;  %v2166_v60 = vmax.f32 %v5626_v42, %v2117_v41  ;;  %v5629_v41 = vmax.f32 %v4394_v49, %v4396_v50 }
 0x1b6   :  { %v1347_v61 = vpop.f32.mrf.mxu0  ;;  %v1853_v18 = vpop.f32.mrf.mxu1 }
 0x1b7   :  { %2320 = vst.msk [vmem:[%s5519_s6 + $0x28] sm:$0xff] %vm2314_vm3, %v2270_v48  ;;  %v2222_v19 = vadd.f32 %v5119_v0, %v2166_v60  ;;  %v2118_v62 = vmax.f32 %v1347_v61, %v1853_v18  ;;  %v5630_v18 = vmax.f32 %v4412_v59, %v4414_v63 }
 0x1b8   :  { %v3182_v55 = vpop.f32.mrf.mxu0  ;;  %v3349_v46 = vpop.f32.mrf.mxu1 }
 0x1b9   :  { %v2271_v47 = vmax.f32 %v2222_v19, 0.0  ;;  %v2167_v37 = vmax.f32 %v5627_v13, %v2118_v62 }
 0x1ba   :  { %v1352_v20 = vpop.f32.mrf.mxu0  ;;  %v1858_v25 = vpop.f32.mrf.mxu1 }
 0x1bb   :  { %2321 = vst.msk [vmem:[%s5519_s6 + $0x30] sm:$0xff] %vm2314_vm3, %v2271_v47  ;;  %v2223_v26 = vadd.f32 %v5119_v0, %v2167_v37  ;;  %v2119_v4 = vmax.f32 %v1352_v20, %v1858_v25  ;;  %v5631_v37 = vmax.f32 %v4430_v9, %v4432_v10 }
 0x1bc   :  { %v3185_v5 = vpop.f32.mrf.mxu0  ;;  %v3352_v27 = vpop.f32.mrf.mxu1 }
 0x1bd   :  { %v2272_v15 = vmax.f32 %v2223_v26, 0.0  ;;  %v2168_v53 = vmax.f32 %v5628_v6, %v2119_v4 }
 0x1be   :  { %v1357_v54 = vpop.f32.mrf.mxu0  ;;  %v1863_v32 = vpop.f32.mrf.mxu1 }
 0x1bf   :  { %2322 = vst.msk [vmem:[%s5519_s6 + $0x38] sm:$0xff] %vm2314_vm3, %v2272_v15  ;;  %v2224_v33 = vadd.f32 %v5119_v0, %v2168_v53  ;;  %v2120_v14 = vmax.f32 %v1357_v54, %v1863_v32  ;;  %v5632_v15 = vmax.f32 %v4448_v22, %v4450_v23 }
 0x1c0   :  { %v3188_v34 = vpop.f32.mrf.mxu0  ;;  %v3355_v11 = vpop.f32.mrf.mxu1 }
 0x1c1   :  { %v2273_v12 = vmax.f32 %v2224_v33, 0.0  ;;  %v2169_v2 = vmax.f32 %v5629_v41, %v2120_v14  ;;  %v5633_v34 = vmax.f32 %v4466_v35, %v4468_v36 }
 0x1c2   :  { %v1362_v51 = vpop.f32.mrf.mxu0  ;;  %v1868_v39 = vpop.f32.mrf.mxu1 }
 0x1c3   :  { %2323 = vst.msk [vmem:[%s5519_s6 + $0x40] sm:$0xff] %vm2314_vm3, %v2273_v12  ;;  %v2225_v40 = vadd.f32 %v5119_v0, %v2169_v2  ;;  %v2121_v48 = vmax.f32 %v1362_v51, %v1868_v39 }
 0x1c4   :  { %v3191_v42 = vpop.f32.mrf.mxu0  ;;  %v3358_v60 = vpop.f32.mrf.mxu1 }
 0x1c5   :  { %v2274_v61 = vmax.f32 %v2225_v40, 0.0  ;;  %v2170_v19 = vmax.f32 %v5630_v18, %v2121_v48  ;;  %v5634_v40 = vmax.f32 %v4484_v45, %v4486_v52 }
 0x1c6   :  { %v1367_v62 = vpop.f32.mrf.mxu0  ;;  %v1873_v49 = vpop.f32.mrf.mxu1 }
 0x1c7   :  { %2324 = vst.msk [vmem:[%s5519_s6 + $0x48] sm:$0xff] %vm2314_vm3, %v2274_v61  ;;  %v2226_v50 = vadd.f32 %v5119_v0, %v2170_v19  ;;  %v2122_v55 = vmax.f32 %v1367_v62, %v1873_v49  ;;  %v5635_v62 = vmax.f32 %v4502_v7, %v4504_v8 }
 0x1c8   :  { %v3194_v46 = vpop.f32.mrf.mxu0  ;;  %v3361_v47 = vpop.f32.mrf.mxu1 }
 0x1c9   :  { %v2275_v13 = vmax.f32 %v2226_v50, 0.0  ;;  %v2171_v20 = vmax.f32 %v5631_v37, %v2122_v55  ;;  %v5636_v37 = vmax.f32 %v4520_v29, %v4522_v30 }
 0x1ca   :  { %v1372_v25 = vpop.f32.mrf.mxu0  ;;  %v1878_v59 = vpop.f32.mrf.mxu1 }
 0x1cb   :  { %2325 = vst.msk [vmem:[%s5519_s6 + $0x50] sm:$0xff] %vm2314_vm3, %v2275_v13  ;;  %v2227_v63 = vadd.f32 %v5119_v0, %v2171_v20  ;;  %v2123_v26 = vmax.f32 %v1372_v25, %v1878_v59 }
 0x1cc   :  { %v3197_v4 = vpop.f32.mrf.mxu0  ;;  %v3364_v5 = vpop.f32.mrf.mxu1 }
 0x1cd   :  { %v2276_v27 = vmax.f32 %v2227_v63, 0.0  ;;  %v2172_v6 = vmax.f32 %v5632_v15, %v2123_v26  ;;  %v5637_v5 = vmax.f32 %v4538_v57, %v4540_v58 }
 0x1ce   :  { %v1377_v53 = vpop.f32.mrf.mxu0  ;;  %v1883_v9 = vpop.f32.mrf.mxu1 }
 0x1cf   :  { %2326 = vst.msk [vmem:[%s5519_s6 + $0x58] sm:$0xff] %vm2314_vm3, %v2276_v27  ;;  %v2228_v10 = vadd.f32 %v5119_v0, %v2172_v6  ;;  %v2124_v54 = vmax.f32 %v1377_v53, %v1883_v9 }
 0x1d0   :  { %v3200_v32 = vpop.f32.mrf.mxu0  ;;  %v3367_v33 = vpop.f32.mrf.mxu1 }
 0x1d1   :  { %v2277_v14 = vmax.f32 %v2228_v10, 0.0  ;;  %v2173_v11 = vmax.f32 %v5633_v34, %v2124_v54  ;;  %v5638_v54 = vmax.f32 %v4556_v28, %v4558_v38 }
 0x1d2   :  { %v1382_v12 = vpop.f32.mrf.mxu0  ;;  %v1888_v22 = vpop.f32.mrf.mxu1 }
 0x1d3   :  { %2327 = vst.msk [vmem:[%s5519_s6 + $0x60] sm:$0xff] %vm2314_vm3, %v2277_v14  ;;  %v2229_v23 = vadd.f32 %v5119_v0, %v2173_v11  ;;  %v2125_v41 = vmax.f32 %v1382_v12, %v1888_v22  ;;  %v5639_v22 = vmax.f32 %v4574_v16, %v4576_v21 }
 0x1d4   :  { %v3203_v2 = vpop.f32.mrf.mxu0  ;;  %v3370_v51 = vpop.f32.mrf.mxu1 }
 0x1d5   :  { %v2278_v39 = vmax.f32 %v2229_v23, 0.0  ;;  %v2174_v48 = vmax.f32 %v5634_v40, %v2125_v41 }
 0x1d6   :  { %v1387_v42 = vpop.f32.mrf.mxu0  ;;  %v1893_v35 = vpop.f32.mrf.mxu1 }
 0x1d7   :  { %2328 = vst.msk [vmem:[%s5519_s6 + $0x68] sm:$0xff] %vm2314_vm3, %v2278_v39  ;;  %v2230_v36 = vadd.f32 %v5119_v0, %v2174_v48  ;;  %v2126_v60 = vmax.f32 %v1387_v42, %v1893_v35  ;;  %v5640_v48 = vmax.f32 %v4592_v44, %v4594_v31 }
 0x1d8   :  { %v3206_v61 = vpop.f32.mrf.mxu0  ;;  %v3373_v18 = vpop.f32.mrf.mxu1 }
 0x1d9   :  { %v2279_v19 = vmax.f32 %v2230_v36, 0.0  ;;  %v2175_v49 = vmax.f32 %v5635_v62, %v2126_v60 }
 0x1da   :  { %v1392_v50 = vpop.f32.mrf.mxu0  ;;  %v1898_v45 = vpop.f32.mrf.mxu1 }
 0x1db   :  { %2329 = vst.msk [vmem:[%s5519_s6 + $0x70] sm:$0xff] %vm2314_vm3, %v2279_v19  ;;  %v2231_v52 = vadd.f32 %v5119_v0, %v2175_v49  ;;  %v2127_v55 = vmax.f32 %v1392_v50, %v1898_v45  ;;  %v5641_v19 = vmax.f32 %v4610_v17, %v4612_v56 }
 0x1dc   :  { %v3209_v46 = vpop.f32.mrf.mxu0  ;;  %v3376_v47 = vpop.f32.mrf.mxu1 }
 0x1dd   :  { %v2280_v13 = vmax.f32 %v2231_v52, 0.0  ;;  %v2176_v20 = vmax.f32 %v5636_v37, %v2127_v55  ;;  %v5642_v46 = vmax.f32 %v4628_v43, %v4630_v24 }
 0x1de   :  { %v1397_v25 = vpop.f32.mrf.mxu0  ;;  %v1903_v7 = vpop.f32.mrf.mxu1 }
 0x1df   :  { %2330 = vst.msk [vmem:[%s5519_s6 + $0x78] sm:$0xff] %vm2314_vm3, %v2280_v13  ;;  %v2232_v8 = vadd.f32 %v5119_v0, %v2176_v20  ;;  %v2128_v59 = vmax.f32 %v1397_v25, %v1903_v7 }
 0x1e0   :  { %v3212_v63 = vpop.f32.mrf.mxu0  ;;  %v3379_v26 = vpop.f32.mrf.mxu1 }
 0x1e1   :  { %v2281_v4 = vmax.f32 %v2232_v8, 0.0  ;;  %v2177_v27 = vmax.f32 %v5637_v5, %v2128_v59  ;;  %v5643_v8 = vmax.f32 %v4646_v3, %v4648_v1 }
 0x1e2   :  { %v1402_v15 = vpop.f32.mrf.mxu0  ;;  %v1908_v29 = vpop.f32.mrf.mxu1 }
 0x1e3   :  { %2331 = vst.msk [vmem:[%s5519_s6 + $0x80] sm:$0xff] %vm2314_vm3, %v2281_v4  ;;  %v2233_v30 = vadd.f32 %v5119_v0, %v2177_v27  ;;  %v2129_v6 = vmax.f32 %v1402_v15, %v1908_v29  ;;  %v5644_v15 = vld [vmem:[#allocation2_spill] sm:$0xff]  ;;  %v5645_v29 = vld [vmem:[#allocation3_spill] sm:$0xff] }
 0x1e4   :  { %v3215_v53 = vpop.f32.mrf.mxu0  ;;  %v3382_v9 = vpop.f32.mrf.mxu1 }
 0x1e5   :  { %v2282_v10 = vmax.f32 %v2233_v30, 0.0  ;;  %v2178_v32 = vmax.f32 %v5638_v54, %v2129_v6  ;;  %v5646_v30 = vmax.f32 %v5644_v15, %v5645_v29 }
 0x1e6   :  { %v1407_v33 = vpop.f32.mrf.mxu0  ;;  %v1913_v57 = vpop.f32.mrf.mxu1 }
 0x1e7   :  { %2332 = vst.msk [vmem:[%s5519_s6 + $0x88] sm:$0xff] %vm2314_vm3, %v2282_v10  ;;  %v2234_v58 = vadd.f32 %v5119_v0, %v2178_v32  ;;  %v2130_v14 = vmax.f32 %v1407_v33, %v1913_v57  ;;  %v5647_v33 = vld [vmem:[#allocation4_spill] sm:$0xff]  ;;  %v5648_v57 = vld [vmem:[#allocation5_spill] sm:$0xff] }
 0x1e8   :  { %v3218_v34 = vpop.f32.mrf.mxu0  ;;  %v3385_v11 = vpop.f32.mrf.mxu1 }
 0x1e9   :  { %v2283_v12 = vmax.f32 %v2234_v58, 0.0  ;;  %v2179_v23 = vmax.f32 %v5639_v22, %v2130_v14  ;;  %v5649_v58 = vmax.f32 %v5647_v33, %v5648_v57 }
 0x1ea   :  { %v1412_v41 = vpop.f32.mrf.mxu0  ;;  %v1918_v28 = vpop.f32.mrf.mxu1 }
 0x1eb   :  { %2333 = vst.msk [vmem:[%s5519_s6 + $0x90] sm:$0xff] %vm2314_vm3, %v2283_v12  ;;  %v2235_v38 = vadd.f32 %v5119_v0, %v2179_v23  ;;  %v2131_v2 = vmax.f32 %v1412_v41, %v1918_v28 }
 0x1ec   :  { %v3221_v51 = vpop.f32.mrf.mxu0  ;;  %v3388_v39 = vpop.f32.mrf.mxu1 }
 0x1ed   :  { %v2284_v40 = vmax.f32 %v2235_v38, 0.0  ;;  %v2180_v42 = vmax.f32 %v5640_v48, %v2131_v2  ;;  %v5650_v38 = vld [vmem:[#allocation6_spill] sm:$0xff]  ;;  %v5651_v2 = vld [vmem:[#allocation7_spill] sm:$0xff] }
 0x1ee   :  { %v1417_v35 = vpop.f32.mrf.mxu0  ;;  %v1923_v16 = vpop.f32.mrf.mxu1  ;;  %v5652_v51 = vmax.f32 %v5650_v38, %v5651_v2 }
 0x1ef   :  { %2334 = vst.msk [vmem:[%s5519_s6 + $0x98] sm:$0xff] %vm2314_vm3, %v2284_v40  ;;  %v2236_v21 = vadd.f32 %v5119_v0, %v2180_v42  ;;  %v2132_v36 = vmax.f32 %v1417_v35, %v1923_v16 }
 0x1f0   :  { %v3224_v60 = vpop.f32.mrf.mxu0  ;;  %v3391_v61 = vpop.f32.mrf.mxu1 }
 0x1f1   :  { %v2285_v18 = vmax.f32 %v2236_v21, 0.0  ;;  %v2181_v62 = vmax.f32 %v5641_v19, %v2132_v36  ;;  %v5653_v60 = vld [vmem:[#allocation8_spill] sm:$0xff]  ;;  %v5654_v61 = vld [vmem:[#allocation9_spill] sm:$0xff] }
 0x1f2   :  { %v1422_v49 = vpop.f32.mrf.mxu0  ;;  %v1928_v31 = vpop.f32.mrf.mxu1 }
 0x1f3   :  { %2335 = vst.msk [vmem:[%s5519_s6 + $0xa0] sm:$0xff] %vm2314_vm3, %v2285_v18  ;;  %v2237_v44 = vadd.f32 %v5119_v0, %v2181_v62  ;;  %v2133_v50 = vmax.f32 %v1422_v49, %v1928_v31  ;;  %v5655_v18 = vmax.f32 %v5653_v60, %v5654_v61 }
 0x1f4   :  { %v3227_v45 = vpop.f32.mrf.mxu0  ;;  %v3394_v52 = vpop.f32.mrf.mxu1 }
 0x1f5   :  { %v2286_v55 = vmax.f32 %v2237_v44, 0.0  ;;  %v2182_v47 = vmax.f32 %v5642_v46, %v2133_v50  ;;  %v5657_v46 = vld [vmem:[#allocation11_spill] sm:$0xff] }
 0x1f6   :  { %v1427_v13 = vpop.f32.mrf.mxu0  ;;  %v1933_v56 = vpop.f32.mrf.mxu1 }
 0x1f7   :  { %2336 = vst.msk [vmem:[%s5519_s6 + $0xa8] sm:$0xff] %vm2314_vm3, %v2286_v55  ;;  %v2238_v17 = vadd.f32 %v5119_v0, %v2182_v47  ;;  %v2134_v37 = vmax.f32 %v1427_v13, %v1933_v56  ;;  %v5656_v55 = vld [vmem:[#allocation10_spill] sm:$0xff] }
 0x1f8   :  { %v3230_v20 = vpop.f32.mrf.mxu0  ;;  %v3397_v25 = vpop.f32.mrf.mxu1  ;;  %v5658_v47 = vmax.f32 %v5656_v55, %v5657_v46 }
 0x1f9   :  { %v2287_v7 = vmax.f32 %v2238_v17, 0.0  ;;  %v2183_v59 = vmax.f32 %v5643_v8, %v2134_v37 }
 0x1fa   :  { %v1432_v63 = vpop.f32.mrf.mxu0  ;;  %v1938_v24 = vpop.f32.mrf.mxu1 }
 0x1fb   :  { %2337 = vst.msk [vmem:[%s5519_s6 + $0xb0] sm:$0xff] %vm2314_vm3, %v2287_v7  ;;  %v2239_v43 = vadd.f32 %v5119_v0, %v2183_v59  ;;  %v2135_v26 = vmax.f32 %v1432_v63, %v1938_v24  ;;  %v5659_v59 = vld [vmem:[#allocation12_spill] sm:$0xff]  ;;  %v5660_v63 = vld [vmem:[#allocation13_spill] sm:$0xff] }
 0x1fc   :  { %v3233_v4 = vpop.f32.mrf.mxu0  ;;  %v3400_v5 = vpop.f32.mrf.mxu1  ;;  %v5661_v24 = vmax.f32 %v5659_v59, %v5660_v63 }
 0x1fd   :  { %v2288_v27 = vmax.f32 %v2239_v43, 0.0  ;;  %v2184_v6 = vmax.f32 %v5646_v30, %v2135_v26 }
 0x1fe   :  { %v1437_v53 = vpop.f32.mrf.mxu0  ;;  %v1943_v1 = vpop.f32.mrf.mxu1 }
 0x1ff   :  { %2338 = vst.msk [vmem:[%s5519_s6 + $0xb8] sm:$0xff] %vm2314_vm3, %v2288_v27  ;;  %v2240_v3 = vadd.f32 %v5119_v0, %v2184_v6  ;;  %v2136_v9 = vmax.f32 %v1437_v53, %v1943_v1  ;;  %v5662_v6 = vld [vmem:[#allocation14_spill] sm:$0xff]  ;;  %v5663_v53 = vld [vmem:[#allocation15_spill] sm:$0xff] }
 0x200   :  { %v3236_v10 = vpop.f32.mrf.mxu0  ;;  %v3403_v54 = vpop.f32.mrf.mxu1  ;;  %v5664_v1 = vmax.f32 %v5662_v6, %v5663_v53 }
 0x201   :  { %v2289_v32 = vmax.f32 %v2240_v3, 0.0  ;;  %v2185_v14 = vmax.f32 %v5649_v58, %v2136_v9 }
 0x202   :  { %v1442_v34 = vpop.f32.mrf.mxu0  ;;  %v1948_v11 = vpop.f32.mrf.mxu1 }
 0x203   :  { %2339 = vst.msk [vmem:[%s5519_s6 + $0xc0] sm:$0xff] %vm2314_vm3, %v2289_v32  ;;  %v2241_v12 = vadd.f32 %v5119_v0, %v2185_v14  ;;  %v2137_v22 = vmax.f32 %v1442_v34, %v1948_v11  ;;  %v5665_v14 = vld [vmem:[#allocation16_spill] sm:$0xff]  ;;  %v5666_v34 = vld [vmem:[#allocation17_spill] sm:$0xff] }
 0x204   :  { %v3239_v23 = vpop.f32.mrf.mxu0  ;;  %v3406_v41 = vpop.f32.mrf.mxu1  ;;  %v5667_v11 = vmax.f32 %v5665_v14, %v5666_v34 }
 0x205   :  { %v2290_v28 = vmax.f32 %v2241_v12, 0.0  ;;  %v2186_v39 = vmax.f32 %v5652_v51, %v2137_v22 }
 0x206   :  { %v1447_v40 = vpop.f32.mrf.mxu0  ;;  %v1953_v48 = vpop.f32.mrf.mxu1 }
 0x207   :  { %2340 = vst.msk [vmem:[%s5519_s6 + $0xc8] sm:$0xff] %vm2314_vm3, %v2290_v28  ;;  %v2242_v42 = vadd.f32 %v5119_v0, %v2186_v39  ;;  %v2138_v35 = vmax.f32 %v1447_v40, %v1953_v48  ;;  %v5668_v39 = vld [vmem:[#allocation18_spill] sm:$0xff]  ;;  %v5669_v40 = vld [vmem:[#allocation19_spill] sm:$0xff] }
 0x208   :  { %v3242_v16 = vpop.f32.mrf.mxu0  ;;  %v3409_v21 = vpop.f32.mrf.mxu1  ;;  %v5670_v48 = vmax.f32 %v5668_v39, %v5669_v40 }
 0x209   :  { %v2291_v36 = vmax.f32 %v2242_v42, 0.0  ;;  %v2187_v19 = vmax.f32 %v5655_v18, %v2138_v35 }
 0x20a   :  { %v1452_v62 = vpop.f32.mrf.mxu0  ;;  %v1958_v49 = vpop.f32.mrf.mxu1 }
 0x20b   :  { %2341 = vst.msk [vmem:[%s5519_s6 + $0xd0] sm:$0xff] %vm2314_vm3, %v2291_v36  ;;  %v2243_v31 = vadd.f32 %v5119_v0, %v2187_v19  ;;  %v2139_v44 = vmax.f32 %v1452_v62, %v1958_v49  ;;  %v5671_v19 = vld [vmem:[#allocation20_spill] sm:$0xff]  ;;  %v5672_v62 = vld [vmem:[#allocation21_spill] sm:$0xff] }
 0x20c   :  { %v3245_v50 = vpop.f32.mrf.mxu0  ;;  %v3412_v45 = vpop.f32.mrf.mxu1  ;;  %v5673_v49 = vmax.f32 %v5671_v19, %v5672_v62 }
 0x20d   :  { %v2292_v52 = vmax.f32 %v2243_v31, 0.0  ;;  %v2188_v13 = vmax.f32 %v5658_v47, %v2139_v44 }
 0x20e   :  { %v1457_v56 = vpop.f32.mrf.mxu0  ;;  %v1963_v17 = vpop.f32.mrf.mxu1 }
 0x20f   :  { %2342 = vst.msk [vmem:[%s5519_s6 + $0xd8] sm:$0xff] %vm2314_vm3, %v2292_v52  ;;  %v2244_v37 = vadd.f32 %v5119_v0, %v2188_v13  ;;  %v2140_v20 = vmax.f32 %v1457_v56, %v1963_v17  ;;  %v5674_v13 = vld [vmem:[#allocation22_spill] sm:$0xff]  ;;  %v5675_v56 = vld [vmem:[#allocation23_spill] sm:$0xff] }
 0x210   :  { %v3248_v25 = vpop.f32.mrf.mxu0  ;;  %v3415_v7 = vpop.f32.mrf.mxu1  ;;  %v5676_v17 = vmax.f32 %v5674_v13, %v5675_v56 }
 0x211   :  { %v2293_v8 = vmax.f32 %v2244_v37, 0.0  ;;  %v2189_v43 = vmax.f32 %v5661_v24, %v2140_v20 }
 0x212   :  { %v1462_v26 = vpop.f32.mrf.mxu0  ;;  %v1968_v4 = vpop.f32.mrf.mxu1 }
 0x213   :  { %2343 = vst.msk [vmem:[%s5519_s6 + $0xe0] sm:$0xff] %vm2314_vm3, %v2293_v8  ;;  %v2245_v5 = vadd.f32 %v5119_v0, %v2189_v43  ;;  %v2141_v27 = vmax.f32 %v1462_v26, %v1968_v4  ;;  %v5677_v43 = vld [vmem:[#allocation24_spill] sm:$0xff]  ;;  %v5678_v26 = vld [vmem:[#allocation25_spill] sm:$0xff] }
 0x214   :  { %v3251_v15 = vpop.f32.mrf.mxu0  ;;  %v3418_v29 = vpop.f32.mrf.mxu1  ;;  %v5679_v4 = vmax.f32 %v5677_v43, %v5678_v26 }
 0x215   :  { %v2294_v30 = vmax.f32 %v2245_v5, 0.0  ;;  %v2190_v3 = vmax.f32 %v5664_v1, %v2141_v27 }
 0x216   :  { %v1467_v9 = vpop.f32.mrf.mxu0  ;;  %v1973_v10 = vpop.f32.mrf.mxu1 }
 0x217   :  { %2344 = vst.msk [vmem:[%s5519_s6 + $0xe8] sm:$0xff] %vm2314_vm3, %v2294_v30  ;;  %v2246_v54 = vadd.f32 %v5119_v0, %v2190_v3  ;;  %v2142_v32 = vmax.f32 %v1467_v9, %v1973_v10  ;;  %v5680_v3 = vld [vmem:[#allocation26_spill] sm:$0xff]  ;;  %v5681_v9 = vld [vmem:[#allocation27_spill] sm:$0xff] }
 0x218   :  { %v3254_v33 = vpop.f32.mrf.mxu0  ;;  %v3421_v57 = vpop.f32.mrf.mxu1  ;;  %v5682_v10 = vmax.f32 %v5680_v3, %v5681_v9 }
 0x219   :  { %v2295_v58 = vmax.f32 %v2246_v54, 0.0  ;;  %v2191_v12 = vmax.f32 %v5667_v11, %v2142_v32 }
 0x21a   :  { %v1472_v22 = vpop.f32.mrf.mxu0  ;;  %v1978_v23 = vpop.f32.mrf.mxu1 }
 0x21b   :  { %2345 = vst.msk [vmem:[%s5519_s6 + $0xf0] sm:$0xff] %vm2314_vm3, %v2295_v58  ;;  %v2247_v41 = vadd.f32 %v5119_v0, %v2191_v12  ;;  %v2143_v28 = vmax.f32 %v1472_v22, %v1978_v23  ;;  %v5683_v12 = vld [vmem:[#allocation28_spill] sm:$0xff]  ;;  %v5684_v22 = vld [vmem:[#allocation29_spill] sm:$0xff] }
 0x21c   :  { %v3257_v38 = vpop.f32.mrf.mxu0  ;;  %v3424_v2 = vpop.f32.mrf.mxu1  ;;  %v5685_v23 = vmax.f32 %v5683_v12, %v5684_v22 }
 0x21d   :  { %v2296_v51 = vmax.f32 %v2247_v41, 0.0  ;;  %v2192_v42 = vmax.f32 %v5670_v48, %v2143_v28 }
 0x21e   :  { %v1477_v35 = vpop.f32.mrf.mxu0  ;;  %v1983_v16 = vpop.f32.mrf.mxu1 }
 0x21f   :  { %2346 = vst.msk [vmem:[%s5519_s6 + $0xf8] sm:$0xff] %vm2314_vm3, %v2296_v51  ;;  %v2248_v21 = vadd.f32 %v5119_v0, %v2192_v42  ;;  %v2144_v36 = vmax.f32 %v1477_v35, %v1983_v16  ;;  %v5686_v42 = vld [vmem:[#allocation30_spill] sm:$0xff]  ;;  %v5687_v35 = vld [vmem:[#allocation31_spill] sm:$0xff] }
 0x220   :  { %v3260_v60 = vpop.f32.mrf.mxu0  ;;  %v3427_v61 = vpop.f32.mrf.mxu1  ;;  %v5688_v16 = vmax.f32 %v5686_v42, %v5687_v35 }
 0x221   :  { %v2297_v18 = vmax.f32 %v2248_v21, 0.0  ;;  %v2193_v31 = vmax.f32 %v5673_v49, %v2144_v36 }
 0x222   :  { %v1482_v44 = vpop.f32.mrf.mxu0  ;;  %v1988_v50 = vpop.f32.mrf.mxu1 }
 0x223   :  { %2347 = vst.msk [vmem:[%s5519_s6 + $0x100] sm:$0xff] %vm2314_vm3, %v2297_v18  ;;  %v2249_v45 = vadd.f32 %v5119_v0, %v2193_v31  ;;  %v2145_v52 = vmax.f32 %v1482_v44, %v1988_v50  ;;  %v5689_v31 = vld [vmem:[#allocation32_spill] sm:$0xff]  ;;  %v5690_v44 = vld [vmem:[#allocation33_spill] sm:$0xff] }
 0x224   :  { %v3263_v55 = vpop.f32.mrf.mxu0  ;;  %v3430_v46 = vpop.f32.mrf.mxu1  ;;  %v5691_v50 = vmax.f32 %v5689_v31, %v5690_v44 }
 0x225   :  { %v2298_v47 = vmax.f32 %v2249_v45, 0.0  ;;  %v2194_v37 = vmax.f32 %v5676_v17, %v2145_v52 }
 0x226   :  { %v1487_v20 = vpop.f32.mrf.mxu0  ;;  %v1993_v25 = vpop.f32.mrf.mxu1 }
 0x227   :  { %2348 = vst.msk [vmem:[%s5519_s6 + $0x108] sm:$0xff] %vm2314_vm3, %v2298_v47  ;;  %v2250_v7 = vadd.f32 %v5119_v0, %v2194_v37  ;;  %v2146_v8 = vmax.f32 %v1487_v20, %v1993_v25  ;;  %v5692_v37 = vld [vmem:[#allocation34_spill] sm:$0xff]  ;;  %v5693_v20 = vld [vmem:[#allocation35_spill] sm:$0xff] }
 0x228   :  { %v3266_v59 = vpop.f32.mrf.mxu0  ;;  %v3433_v63 = vpop.f32.mrf.mxu1  ;;  %v5694_v25 = vmax.f32 %v5692_v37, %v5693_v20 }
 0x229   :  { %v2299_v24 = vmax.f32 %v2250_v7, 0.0  ;;  %v2195_v5 = vmax.f32 %v5679_v4, %v2146_v8 }
 0x22a   :  { %v1492_v27 = vpop.f32.mrf.mxu0  ;;  %v1998_v15 = vpop.f32.mrf.mxu1 }
 0x22b   :  { %2349 = vst.msk [vmem:[%s5519_s6 + $0x110] sm:$0xff] %vm2314_vm3, %v2299_v24  ;;  %v2251_v29 = vadd.f32 %v5119_v0, %v2195_v5  ;;  %v2147_v30 = vmax.f32 %v1492_v27, %v1998_v15  ;;  %v5695_v5 = vld [vmem:[#allocation36_spill] sm:$0xff]  ;;  %v5696_v27 = vld [vmem:[#allocation37_spill] sm:$0xff] }
 0x22c   :  { %v3269_v6 = vpop.f32.mrf.mxu0  ;;  %v3436_v53 = vpop.f32.mrf.mxu1  ;;  %v5697_v15 = vmax.f32 %v5695_v5, %v5696_v27 }
 0x22d   :  { %v2300_v1 = vmax.f32 %v2251_v29, 0.0  ;;  %v2196_v54 = vmax.f32 %v5682_v10, %v2147_v30 }
 0x22e   :  { %v1497_v32 = vpop.f32.mrf.mxu0  ;;  %v2003_v33 = vpop.f32.mrf.mxu1 }
 0x22f   :  { %2350 = vst.msk [vmem:[%s5519_s6 + $0x118] sm:$0xff] %vm2314_vm3, %v2300_v1  ;;  %v2252_v57 = vadd.f32 %v5119_v0, %v2196_v54  ;;  %v2148_v58 = vmax.f32 %v1497_v32, %v2003_v33  ;;  %v5698_v54 = vld [vmem:[#allocation38_spill] sm:$0xff]  ;;  %v5699_v32 = vld [vmem:[#allocation39_spill] sm:$0xff] }
 0x230   :  { %v3272_v14 = vpop.f32.mrf.mxu0  ;;  %v3439_v34 = vpop.f32.mrf.mxu1  ;;  %v5700_v33 = vmax.f32 %v5698_v54, %v5699_v32 }
 0x231   :  { %v2301_v11 = vmax.f32 %v2252_v57, 0.0  ;;  %v2197_v41 = vmax.f32 %v5685_v23, %v2148_v58 }
 0x232   :  { %v1502_v28 = vpop.f32.mrf.mxu0  ;;  %v2008_v38 = vpop.f32.mrf.mxu1 }
 0x233   :  { %2351 = vst.msk [vmem:[%s5519_s6 + $0x120] sm:$0xff] %vm2314_vm3, %v2301_v11  ;;  %v2253_v2 = vadd.f32 %v5119_v0, %v2197_v41  ;;  %v2149_v51 = vmax.f32 %v1502_v28, %v2008_v38  ;;  %v5701_v41 = vld [vmem:[#allocation40_spill] sm:$0xff]  ;;  %v5702_v28 = vld [vmem:[#allocation41_spill] sm:$0xff] }
 0x234   :  { %v3275_v39 = vpop.f32.mrf.mxu0  ;;  %v3442_v40 = vpop.f32.mrf.mxu1  ;;  %v5703_v38 = vmax.f32 %v5701_v41, %v5702_v28 }
 0x235   :  { %v2302_v48 = vmax.f32 %v2253_v2, 0.0  ;;  %v2198_v21 = vmax.f32 %v5688_v16, %v2149_v51 }
 0x236   :  { %v1507_v36 = vpop.f32.mrf.mxu0  ;;  %v2013_v60 = vpop.f32.mrf.mxu1 }
 0x237   :  { %2352 = vst.msk [vmem:[%s5519_s6 + $0x128] sm:$0xff] %vm2314_vm3, %v2302_v48  ;;  %v2254_v61 = vadd.f32 %v5119_v0, %v2198_v21  ;;  %v2150_v18 = vmax.f32 %v1507_v36, %v2013_v60  ;;  %v5704_v21 = vld [vmem:[#allocation42_spill] sm:$0xff]  ;;  %v5705_v36 = vld [vmem:[#allocation43_spill] sm:$0xff] }
 0x238   :  { %v3278_v19 = vpop.f32.mrf.mxu0  ;;  %v3445_v62 = vpop.f32.mrf.mxu1  ;;  %v5706_v60 = vmax.f32 %v5704_v21, %v5705_v36 }
 0x239   :  { %v2303_v49 = vmax.f32 %v2254_v61, 0.0  ;;  %v2199_v45 = vmax.f32 %v5691_v50, %v2150_v18 }
 0x23a   :  { %v1512_v52 = vpop.f32.mrf.mxu0  ;;  %v2018_v55 = vpop.f32.mrf.mxu1 }
 0x23b   :  { %2353 = vst.msk [vmem:[%s5519_s6 + $0x130] sm:$0xff] %vm2314_vm3, %v2303_v49  ;;  %v2255_v46 = vadd.f32 %v5119_v0, %v2199_v45  ;;  %v2151_v47 = vmax.f32 %v1512_v52, %v2018_v55  ;;  %v5707_v45 = vld [vmem:[#allocation44_spill] sm:$0xff]  ;;  %v5708_v52 = vld [vmem:[#allocation45_spill] sm:$0xff] }
 0x23c   :  { %v3281_v13 = vpop.f32.mrf.mxu0  ;;  %v3448_v56 = vpop.f32.mrf.mxu1  ;;  %v5709_v55 = vmax.f32 %v5707_v45, %v5708_v52 }
 0x23d   :  { %v2304_v17 = vmax.f32 %v2255_v46, 0.0  ;;  %v2200_v7 = vmax.f32 %v5694_v25, %v2151_v47 }
 0x23e   :  { %v1517_v8 = vpop.f32.mrf.mxu0  ;;  %v2023_v59 = vpop.f32.mrf.mxu1 }
 0x23f   :  { %2354 = vst.msk [vmem:[%s5519_s6 + $0x138] sm:$0xff] %vm2314_vm3, %v2304_v17  ;;  %v2256_v63 = vadd.f32 %v5119_v0, %v2200_v7  ;;  %v2152_v24 = vmax.f32 %v1517_v8, %v2023_v59  ;;  %v5710_v7 = vld [vmem:[#allocation46_spill] sm:$0xff]  ;;  %v5711_v8 = vld [vmem:[#allocation47_spill] sm:$0xff] }
 0x240   :  { %v3284_v43 = vpop.f32.mrf.mxu0  ;;  %v3451_v26 = vpop.f32.mrf.mxu1  ;;  %v5712_v59 = vmax.f32 %v5710_v7, %v5711_v8 }
 0x241   :  { %v2305_v4 = vmax.f32 %v2256_v63, 0.0  ;;  %v2201_v29 = vmax.f32 %v5697_v15, %v2152_v24 }
 0x242   :  { %v1522_v30 = vpop.f32.mrf.mxu0  ;;  %v2028_v6 = vpop.f32.mrf.mxu1 }
 0x243   :  { %2355 = vst.msk [vmem:[%s5519_s6 + $0x140] sm:$0xff] %vm2314_vm3, %v2305_v4  ;;  %v2257_v53 = vadd.f32 %v5119_v0, %v2201_v29  ;;  %v2153_v1 = vmax.f32 %v1522_v30, %v2028_v6  ;;  %v5713_v29 = vld [vmem:[#allocation48_spill] sm:$0xff]  ;;  %v5714_v30 = vld [vmem:[#allocation49_spill] sm:$0xff] }
 0x244   :  { %v3287_v3 = vpop.f32.mrf.mxu0  ;;  %v3454_v9 = vpop.f32.mrf.mxu1  ;;  %v5715_v6 = vmax.f32 %v5713_v29, %v5714_v30 }
 0x245   :  { %v2306_v10 = vmax.f32 %v2257_v53, 0.0  ;;  %v2202_v57 = vmax.f32 %v5700_v33, %v2153_v1 }
 0x246   :  { %v1527_v58 = vpop.f32.mrf.mxu0  ;;  %v2033_v14 = vpop.f32.mrf.mxu1 }
 0x247   :  { %2356 = vst.msk [vmem:[%s5519_s6 + $0x148] sm:$0xff] %vm2314_vm3, %v2306_v10  ;;  %v2258_v34 = vadd.f32 %v5119_v0, %v2202_v57  ;;  %v2154_v11 = vmax.f32 %v1527_v58, %v2033_v14  ;;  %v5716_v57 = vld [vmem:[#allocation50_spill] sm:$0xff]  ;;  %v5717_v58 = vld [vmem:[#allocation51_spill] sm:$0xff] }
 0x248   :  { %v3290_v12 = vpop.f32.mrf.mxu0  ;;  %v3457_v22 = vpop.f32.mrf.mxu1  ;;  %v5718_v14 = vmax.f32 %v5716_v57, %v5717_v58 }
 0x249   :  { %v2307_v23 = vmax.f32 %v2258_v34, 0.0  ;;  %v2203_v2 = vmax.f32 %v5703_v38, %v2154_v11 }
 0x24a   :  { %v1532_v51 = vpop.f32.mrf.mxu0  ;;  %v2038_v39 = vpop.f32.mrf.mxu1 }
 0x24b   :  { %2357 = vst.msk [vmem:[%s5519_s6 + $0x150] sm:$0xff] %vm2314_vm3, %v2307_v23  ;;  %v2259_v40 = vadd.f32 %v5119_v0, %v2203_v2  ;;  %v2155_v48 = vmax.f32 %v1532_v51, %v2038_v39 }
 0x24c   :  { %v3293_v42 = vpop.f32.mrf.mxu0  ;;  %v3460_v35 = vpop.f32.mrf.mxu1 }
 0x24d   :  { %v2308_v16 = vmax.f32 %v2259_v40, 0.0  ;;  %v2204_v61 = vmax.f32 %v5706_v60, %v2155_v48 }
 0x24e   :  { %v1537_v18 = vpop.f32.mrf.mxu0  ;;  %v2043_v19 = vpop.f32.mrf.mxu1 }
 0x24f   :  { %2358 = vst.msk [vmem:[%s5519_s6 + $0x158] sm:$0xff] %vm2314_vm3, %v2308_v16  ;;  %v2260_v62 = vadd.f32 %v5119_v0, %v2204_v61  ;;  %v2156_v49 = vmax.f32 %v1537_v18, %v2043_v19 }
 0x250   :  { %v3296_v31 = vpop.f32.mrf.mxu0  ;;  %v3463_v44 = vpop.f32.mrf.mxu1 }
 0x251   :  { %v2309_v50 = vmax.f32 %v2260_v62, 0.0  ;;  %v2205_v46 = vmax.f32 %v5709_v55, %v2156_v49 }
 0x252   :  { %v1542_v47 = vpop.f32.mrf.mxu0  ;;  %v2048_v13 = vpop.f32.mrf.mxu1 }
 0x253   :  { %2359 = vst.msk [vmem:[%s5519_s6 + $0x160] sm:$0xff] %vm2314_vm3, %v2309_v50  ;;  %v2261_v56 = vadd.f32 %v5119_v0, %v2205_v46  ;;  %v2157_v17 = vmax.f32 %v1542_v47, %v2048_v13 }
 0x254   :  { %v3299_v37 = vpop.f32.mrf.mxu0  ;;  %v3466_v20 = vpop.f32.mrf.mxu1 }
 0x255   :  { %v2310_v25 = vmax.f32 %v2261_v56, 0.0  ;;  %v2206_v63 = vmax.f32 %v5712_v59, %v2157_v17 }
 0x256   :  { %v1547_v24 = vpop.f32.mrf.mxu0  ;;  %v2053_v43 = vpop.f32.mrf.mxu1 }
 0x257   :  { %2360 = vst.msk [vmem:[%s5519_s6 + $0x168] sm:$0xff] %vm2314_vm3, %v2310_v25  ;;  %v2262_v26 = vadd.f32 %v5119_v0, %v2206_v63  ;;  %v2158_v4 = vmax.f32 %v1547_v24, %v2053_v43 }
 0x258   :  { %v3302_v5 = vpop.f32.mrf.mxu0  ;;  %v3469_v27 = vpop.f32.mrf.mxu1 }
 0x259   :  { %v2311_v15 = vmax.f32 %v2262_v26, 0.0  ;;  %v2207_v53 = vmax.f32 %v5715_v6, %v2158_v4 }
 0x25a   :  { %v1552_v1 = vpop.f32.mrf.mxu0  ;;  %v2058_v3 = vpop.f32.mrf.mxu1 }
 0x25b   :  { %2361 = vst.msk [vmem:[%s5519_s6 + $0x170] sm:$0xff] %vm2314_vm3, %v2311_v15  ;;  %v2263_v9 = vadd.f32 %v5119_v0, %v2207_v53  ;;  %v2159_v10 = vmax.f32 %v1552_v1, %v2058_v3 }
 0x25c   :  { %v3305_v54 = vpop.f32.mrf.mxu0  ;;  %v3472_v32 = vpop.f32.mrf.mxu1 }
 0x25d   :  { %v2312_v33 = vmax.f32 %v2263_v9, 0.0  ;;  %v2208_v34 = vmax.f32 %v5718_v14, %v2159_v10 }
 0x25f   :  { %2362 = vst.msk [vmem:[%s5519_s6 + $0x178] sm:$0xff] %vm2314_vm3, %v2312_v33  ;;  %v2264_v11 = vadd.f32 %v5119_v0, %v2208_v34 }
 0x261   :  { %v2313_v12 = vmax.f32 %v2264_v11, 0.0 }
 0x263   :  { %2363 = vst.msk [vmem:[%s5519_s6 + $0x180] sm:$0xff] %vm2314_vm3, %v2313_v12 }

// kernel: lenet5_forward.4
= control target key start
LH: loop header
LB: loop body
LE: loop exit
PB: predicated region body
PF: predicated region fallthrough
CT: control target
= control target key end

     0   :  { %v1401_v0 = vmov 0.0   ;;  %vm101_vm0 = vcmask 130048   ;;  %s2479_s4 = inlined_call_operand.vmem [shape: f32[400,128], index: 4, kind: input, shape index: {}]   ;;  %s2480_s0 = inlined_call_operand.vmem [shape: f32[56,400], index: 0, kind: input, shape index: {}]   ;;  %s2481_s1 = inlined_call_operand.vmem [shape: f32[56,400], index: 1, kind: input, shape index: {}]   ;;  %s2482_s2 = inlined_call_operand.vmem [shape: f32[56,400], index: 2, kind: input, shape index: {}]   ;;  %s2483_s3 = inlined_call_operand.vmem [shape: f32[56,400], index: 3, kind: input, shape index: {}]   ;;  %s2484_s5 = inlined_call_operand.vmem [shape: f32[1,128], index: 5, kind: input, shape index: {}]   ;;  %s2485_s6 = inlined_call_operand.vmem [shape: f32[56,128], index: 6, kind: output, shape index: {}]  }
   0x1   :  { %223 = vmatprep.subr.mxu1 %v1401_v0  ;;  %v1441_v1 = vld [vmem:[%s2479_s4 + $0xf8] sm:$0xff]  ;;  %v1458_v4 = vld [vmem:[%s2479_s4 + $0xf0] sm:$0xff]  ;;  %v1475_v7 = vld [vmem:[%s2479_s4 + $0xe8] sm:$0xff] }
   0x2   :  { %v1446_v2 = vld [vmem:[%s2479_s4 + $0x178] sm:$0xff]  ;;  %1152 = vmatprep.subr.mxu0 %v1441_v1  ;;  %v1463_v5 = vld [vmem:[%s2479_s4 + $0x170] sm:$0xff]  ;;  %v1480_v8 = vld [vmem:[%s2479_s4 + $0x168] sm:$0xff] }
   0x3   :  { %v1451_v3 = vld [vmem:[%s2479_s4 + $0x78] sm:$0xff]  ;;  %224 = vmatpush1.msra.mxu1 %v1446_v2  ;;  %v1468_v6 = vld [vmem:[%s2479_s4 + $0x70] sm:$0xff]  ;;  %v1487_v9 = vld [vmem:[%s2479_s4 + $0x68] sm:$0xff] }
   0x4   :  { %1153 = vmatpush3.msra.mxu0 %v1451_v3  ;;  %225 = vmatprep.subr.mxu1 %v1401_v0  ;;  %v1494_v10 = vld [vmem:[%s2479_s4 + $0xe0] sm:$0xff]  ;;  %v1513_v13 = vld [vmem:[%s2479_s4 + $0xd8] sm:$0xff]  ;;  %v1532_v16 = vld [vmem:[%s2479_s4 + $0xd0] sm:$0xff] }
   0x5   :  { %1154 = vmatprep.subr.mxu0 %v1458_v4  ;;  %226 = vmatpush1.msra.mxu1 %v1463_v5  ;;  %v1499_v11 = vld [vmem:[%s2479_s4 + $0x160] sm:$0xff]  ;;  %v1518_v14 = vld [vmem:[%s2479_s4 + $0x158] sm:$0xff]  ;;  %v1537_v17 = vld [vmem:[%s2479_s4 + $0x150] sm:$0xff] }
   0x6   :  { %1155 = vmatpush3.msra.mxu0 %v1468_v6  ;;  %227 = vmatprep.subr.mxu1 %v1401_v0  ;;  %v1506_v12 = vld [vmem:[%s2479_s4 + $0x60] sm:$0xff]  ;;  %v1525_v15 = vld [vmem:[%s2479_s4 + $0x58] sm:$0xff]  ;;  %v1544_v18 = vld [vmem:[%s2479_s4 + $0x50] sm:$0xff] }
   0x7   :  { %1156 = vmatprep.subr.mxu0 %v1475_v7  ;;  %228 = vmatpush1.msra.mxu1 %v1480_v8  ;;  %v1551_v19 = vld [vmem:[%s2479_s4 + $0xc8] sm:$0xff]  ;;  %v1570_v22 = vld [vmem:[%s2479_s4 + $0xc0] sm:$0xff]  ;;  %v1589_v25 = vld [vmem:[%s2479_s4 + $0xb8] sm:$0xff] }
   0x8   :  { %1157 = vmatpush3.msra.mxu0 %v1487_v9  ;;  %229 = vmatprep.subr.mxu1 %v1401_v0  ;;  %v1556_v20 = vld [vmem:[%s2479_s4 + $0x148] sm:$0xff]  ;;  %v1575_v23 = vld [vmem:[%s2479_s4 + $0x140] sm:$0xff]  ;;  %v1594_v26 = vld [vmem:[%s2479_s4 + $0x138] sm:$0xff] }
   0x9   :  { %1158 = vmatprep.subr.mxu0 %v1494_v10  ;;  %230 = vmatpush1.msra.mxu1 %v1499_v11  ;;  %v1563_v21 = vld [vmem:[%s2479_s4 + $0x48] sm:$0xff]  ;;  %v1582_v24 = vld [vmem:[%s2479_s4 + $0x40] sm:$0xff]  ;;  %v1601_v27 = vld [vmem:[%s2479_s4 + $0x38] sm:$0xff] }
   0xa   :  { %1159 = vmatpush3.msra.mxu0 %v1506_v12  ;;  %231 = vmatprep.subr.mxu1 %v1401_v0  ;;  %v1608_v28 = vld [vmem:[%s2479_s4 + $0xb0] sm:$0xff]  ;;  %v1627_v31 = vld [vmem:[%s2479_s4 + $0xa8] sm:$0xff]  ;;  %v1646_v34 = vld [vmem:[%s2479_s4 + $0xa0] sm:$0xff] }
   0xb   :  { %1160 = vmatprep.subr.mxu0 %v1513_v13  ;;  %232 = vmatpush1.msra.mxu1 %v1518_v14  ;;  %v1613_v29 = vld [vmem:[%s2479_s4 + $0x130] sm:$0xff]  ;;  %v1632_v32 = vld [vmem:[%s2479_s4 + $0x128] sm:$0xff]  ;;  %v1651_v35 = vld [vmem:[%s2479_s4 + $0x120] sm:$0xff] }
   0xc   :  { %1161 = vmatpush3.msra.mxu0 %v1525_v15  ;;  %233 = vmatprep.subr.mxu1 %v1401_v0  ;;  %v1620_v30 = vld [vmem:[%s2479_s4 + $0x30] sm:$0xff]  ;;  %v1639_v33 = vld [vmem:[%s2479_s4 + $0x28] sm:$0xff]  ;;  %v1658_v36 = vld [vmem:[%s2479_s4 + $0x20] sm:$0xff] }
   0xd   :  { %1162 = vmatprep.subr.mxu0 %v1532_v16  ;;  %234 = vmatpush1.msra.mxu1 %v1537_v17  ;;  %v1665_v37 = vld [vmem:[%s2479_s4 + $0x98] sm:$0xff]  ;;  %v1684_v40 = vld [vmem:[%s2479_s4 + $0x90] sm:$0xff]  ;;  %v1703_v43 = vld [vmem:[%s2479_s4 + $0x88] sm:$0xff] }
   0xe   :  { %1163 = vmatpush3.msra.mxu0 %v1544_v18  ;;  %235 = vmatprep.subr.mxu1 %v1401_v0  ;;  %v1670_v38 = vld [vmem:[%s2479_s4 + $0x118] sm:$0xff]  ;;  %v1689_v41 = vld [vmem:[%s2479_s4 + $0x110] sm:$0xff]  ;;  %v1708_v44 = vld [vmem:[%s2479_s4 + $0x108] sm:$0xff] }
   0xf   :  { %1164 = vmatprep.subr.mxu0 %v1551_v19  ;;  %236 = vmatpush1.msra.mxu1 %v1556_v20  ;;  %v1677_v39 = vld [vmem:[%s2479_s4 + $0x18] sm:$0xff]  ;;  %v1696_v42 = vld [vmem:[%s2479_s4 + $0x10] sm:$0xff]  ;;  %v1715_v45 = vld [vmem:[%s2479_s4 + $0x8] sm:$0xff] }
  0x10   :  { %1165 = vmatpush3.msra.mxu0 %v1563_v21  ;;  %237 = vmatprep.subr.mxu1 %v1401_v0  ;;  %v1722_v46 = vld [vmem:[%s2479_s4 + $0x80] sm:$0xff]  ;;  %v74_v49 = vld [vmem:[%s2480_s0 + $0x8] sm:$0xff]  ;;  %v76_v53 = vld [vmem:[%s2480_s0 + $0x18] sm:$0xff] }
  0x11   :  { %1166 = vmatprep.subr.mxu0 %v1570_v22  ;;  %238 = vmatpush1.msra.mxu1 %v1575_v23  ;;  %v1727_v47 = vld [vmem:[%s2479_s4 + $0x100] sm:$0xff]  ;;  %v1749_v51 = vld [vmem:[%s2479_s4 + $0x188] sm:$0xff]  ;;  %v75_v54 = vld [vmem:[%s2480_s0 + $0x10] sm:$0xff] }
  0x12   :  { %1167 = vmatpush3.msra.mxu0 %v1582_v24  ;;  %239 = vmatprep.subr.mxu1 %v1401_v0  ;;  %v1734_v48 = vld [vmem:[%s2479_s4] sm:$0xff]  ;;  %v78_v55 = vld [vmem:[%s2480_s0 + $0x28] sm:$0xff]  ;;  %v80_v58 = vld [vmem:[%s2480_s0 + $0x38] sm:$0xff] }
  0x13   :  { %1168 = vmatprep.subr.mxu0 %v1589_v25  ;;  %240 = vmatpush1.msra.mxu1 %v1594_v26  ;;  %v73_v50 = vld [vmem:[%s2480_s0] sm:$0xff]  ;;  %v82_v57 = vld [vmem:[%s2480_s0 + $0x48] sm:$0xff]  ;;  %v79_v60 = vld [vmem:[%s2480_s0 + $0x30] sm:$0xff] }
  0x14   :  { %1169 = vmatpush3.msra.mxu0 %v1601_v27  ;;  %241 = vmatprep.subr.mxu1 %v1401_v0  ;;  %v1756_v52 = vld [vmem:[%s2479_s4 + $0x180] sm:$0xff]  ;;  %v86_v61 = vld [vmem:[%s2480_s0 + $0x68] sm:$0xff]  ;;  %v84_v62 = vld [vmem:[%s2480_s0 + $0x58] sm:$0xff] }
  0x15   :  { %1170 = vmatprep.subr.mxu0 %v1608_v28  ;;  %242 = vmatpush1.msra.mxu1 %v1613_v29  ;;  %v77_v56 = vld [vmem:[%s2480_s0 + $0x20] sm:$0xff] }
  0x16   :  { %1171 = vmatpush3.msra.mxu0 %v1620_v30  ;;  %243 = vmatprep.subr.mxu1 %v1401_v0  ;;  %v81_v59 = vld [vmem:[%s2480_s0 + $0x40] sm:$0xff] }
  0x17   :  { %1172 = vmatprep.subr.mxu0 %v1627_v31  ;;  %244 = vmatpush1.msra.mxu1 %v1632_v32  ;;  %v85_v63 = vld [vmem:[%s2480_s0 + $0x60] sm:$0xff] }
  0x18   :  { %1173 = vmatpush3.msra.mxu0 %v1639_v33  ;;  %245 = vmatprep.subr.mxu1 %v1401_v0 }
  0x19   :  { %1174 = vmatprep.subr.mxu0 %v1646_v34  ;;  %246 = vmatpush1.msra.mxu1 %v1651_v35 }
  0x1a   :  { %1175 = vmatpush3.msra.mxu0 %v1658_v36  ;;  %247 = vmatprep.subr.mxu1 %v1401_v0 }
  0x1b   :  { %1176 = vmatprep.subr.mxu0 %v1665_v37  ;;  %248 = vmatpush1.msra.mxu1 %v1670_v38 }
  0x1c   :  { %1177 = vmatpush3.msra.mxu0 %v1677_v39  ;;  %249 = vmatprep.subr.mxu1 %v1401_v0 }
  0x1d   :  { %1178 = vmatprep.subr.mxu0 %v1684_v40  ;;  %250 = vmatpush1.msra.mxu1 %v1689_v41 }
  0x1e   :  { %1179 = vmatpush3.msra.mxu0 %v1696_v42  ;;  %251 = vmatprep.subr.mxu1 %v1401_v0 }
  0x1f   :  { %1180 = vmatprep.subr.mxu0 %v1703_v43  ;;  %252 = vmatpush1.msra.mxu1 %v1708_v44 }
  0x20   :  { %1181 = vmatpush3.msra.mxu0 %v1715_v45  ;;  %253 = vmatprep.subr.mxu1 %v1401_v0 }
  0x21   :  { %1182 = vmatprep.subr.mxu0 %v1722_v46  ;;  %254 = vmatpush1.msra.mxu1 %v1727_v47 }
  0x22   :  { %1183 = vmatpush3.msra.mxu0 %v1734_v48  ;;  %187 = vmatprep.mubr.f32.mxu0 %v74_v49  ;;  %v83_v49 = vld [vmem:[%s2480_s0 + $0x50] sm:$0xff] }
  0x23   :  { %283 = vmatprep.subr.mxu1 %v1401_v0  ;;  %188 = vmatmul.mubr.f32.vlgmr.msra.gmra.mxu0 %v73_v50  ;;  %v90_v50 = vld [vmem:[%s2480_s0 + $0x88] sm:$0xff] }
  0x24   :  { %284 = vmatpush2.msra.mxu1 %v1749_v51  ;;  %1205 = vmatprep.subr.mxu0 %v1441_v1 }
  0x25   :  { %285 = vmatprep.subr.mxu1 %v1401_v0  ;;  %1206 = vmatpush3.msra.mxu0 %v1451_v3 }
  0x26   :  { %286 = vmatpush2.msra.mxu1 %v1756_v52  ;;  %1123 = vmatprep.mubr.msk.f32.mxu1 %vm101_vm0, %v76_v53  ;;  %v88_v53 = vld [vmem:[%s2480_s0 + $0x78] sm:$0xff] }
  0x27   :  { %1207 = vmatprep.subr.mxu0 %v1458_v4  ;;  %288 = vmatmul.mubr.f32.vlgmr.msra.gmra.mxu1 %v75_v54  ;;  %v89_v54 = vld [vmem:[%s2480_s0 + $0x80] sm:$0xff] }
  0x28   :  { %1208 = vmatpush3.msra.mxu0 %v1468_v6  ;;  %472 = vmatprep.subr.mxu1 %v1401_v0 }
  0x29   :  { %1209 = vmatprep.subr.mxu0 %v1475_v7  ;;  %473 = vmatpush1.msra.mxu1 %v1446_v2 }
  0x2a   :  { %1210 = vmatpush3.msra.mxu0 %v1487_v9  ;;  %474 = vmatprep.subr.mxu1 %v1401_v0 }
  0x2b   :  { %192 = vmatprep.mubr.f32.mxu0 %v78_v55  ;;  %1211 = vmatprep.subr.mxu0 %v1494_v10  ;;  %v87_v55 = vld [vmem:[%s2480_s0 + $0x70] sm:$0xff] }
  0x2c   :  { %475 = vmatpush1.msra.mxu1 %v1463_v5  ;;  %193 = vmatmul.mubr.f32.gmra.mxu0 %v77_v56  ;;  %v94_v56 = vld [vmem:[%s2480_s0 + $0xa8] sm:$0xff] }
  0x2d   :  { %1212 = vmatpush3.msra.mxu0 %v1506_v12  ;;  %476 = vmatprep.subr.mxu1 %v1401_v0 }
  0x2e   :  { %1213 = vmatprep.subr.mxu0 %v1513_v13  ;;  %477 = vmatpush1.msra.mxu1 %v1480_v8 }
  0x2f   :  { %1214 = vmatpush3.msra.mxu0 %v1525_v15  ;;  %478 = vmatprep.subr.mxu1 %v1401_v0 }
  0x30   :  { %197 = vmatprep.mubr.f32.mxu0 %v82_v57  ;;  %1124 = vmatprep.mubr.msk.f32.mxu1 %vm101_vm0, %v80_v58  ;;  %v92_v57 = vld [vmem:[%s2480_s0 + $0x98] sm:$0xff]  ;;  %v93_v58 = vld [vmem:[%s2480_s0 + $0xa0] sm:$0xff] }
  0x31   :  { %1215 = vmatprep.subr.mxu0 %v1532_v16  ;;  %479 = vmatpush1.msra.mxu1 %v1499_v11 }
  0x32   :  { %198 = vmatmul.mubr.f32.gmra.mxu0 %v81_v59  ;;  %293 = vmatmul.mubr.f32.gmra.mxu1 %v79_v60  ;;  %v91_v59 = vld [vmem:[%s2480_s0 + $0x90] sm:$0xff]  ;;  %v98_v60 = vld [vmem:[%s2480_s0 + $0xc8] sm:$0xff] }
  0x33   :  { %1216 = vmatpush3.msra.mxu0 %v1544_v18  ;;  %480 = vmatprep.subr.mxu1 %v1401_v0 }
  0x34   :  { %1217 = vmatprep.subr.mxu0 %v1551_v19  ;;  %481 = vmatpush1.msra.mxu1 %v1518_v14 }
  0x35   :  { %1218 = vmatpush3.msra.mxu0 %v1563_v21  ;;  %482 = vmatprep.subr.mxu1 %v1401_v0 }
  0x36   :  { %202 = vmatprep.mubr.f32.mxu0 %v86_v61  ;;  %1125 = vmatprep.mubr.msk.f32.mxu1 %vm101_vm0, %v84_v62  ;;  %v96_v61 = vld [vmem:[%s2480_s0 + $0xb8] sm:$0xff]  ;;  %v97_v62 = vld [vmem:[%s2480_s0 + $0xc0] sm:$0xff] }
  0x37   :  { %1219 = vmatprep.subr.mxu0 %v1570_v22  ;;  %483 = vmatpush1.msra.mxu1 %v1537_v17 }
  0x38   :  { %203 = vmatmul.mubr.f32.gmra.mxu0 %v85_v63  ;;  %298 = vmatmul.mubr.f32.gmra.mxu1 %v83_v49  ;;  %v95_v63 = vld [vmem:[%s2480_s0 + $0xb0] sm:$0xff]  ;;  %v100_v49 = vld [vmem:[%s2480_s0 + $0xd8] sm:$0xff] }
  0x39   :  { %1220 = vmatpush3.msra.mxu0 %v1582_v24  ;;  %484 = vmatprep.subr.mxu1 %v1401_v0 }
  0x3a   :  { %1221 = vmatprep.subr.mxu0 %v1589_v25  ;;  %485 = vmatpush1.msra.mxu1 %v1556_v20 }
  0x3b   :  { %1222 = vmatpush3.msra.mxu0 %v1601_v27  ;;  %486 = vmatprep.subr.mxu1 %v1401_v0 }
  0x3c   :  { %207 = vmatprep.mubr.f32.mxu0 %v90_v50  ;;  %1126 = vmatprep.mubr.msk.f32.mxu1 %vm101_vm0, %v88_v53  ;;  %v99_v50 = vld [vmem:[%s2480_s0 + $0xd0] sm:$0xff]  ;;  %v324_v53 = vld [vmem:[%s2481_s1 + $0x8] sm:$0xff] }
  0x3d   :  { %1223 = vmatprep.subr.mxu0 %v1608_v28  ;;  %487 = vmatpush1.msra.mxu1 %v1575_v23 }
  0x3e   :  { %208 = vmatmul.mubr.f32.gmra.mxu0 %v89_v54  ;;  %303 = vmatmul.mubr.f32.gmra.mxu1 %v87_v55  ;;  %v323_v54 = vld [vmem:[%s2481_s1] sm:$0xff]  ;;  %v328_v55 = vld [vmem:[%s2481_s1 + $0x28] sm:$0xff] }
  0x3f   :  { %1224 = vmatpush3.msra.mxu0 %v1620_v30  ;;  %488 = vmatprep.subr.mxu1 %v1401_v0 }
  0x40   :  { %1225 = vmatprep.subr.mxu0 %v1627_v31  ;;  %489 = vmatpush1.msra.mxu1 %v1594_v26 }
  0x41   :  { %1226 = vmatpush3.msra.mxu0 %v1639_v33  ;;  %490 = vmatprep.subr.mxu1 %v1401_v0 }
  0x42   :  { %212 = vmatprep.mubr.f32.mxu0 %v94_v56  ;;  %1127 = vmatprep.mubr.msk.f32.mxu1 %vm101_vm0, %v92_v57  ;;  %v326_v56 = vld [vmem:[%s2481_s1 + $0x18] sm:$0xff]  ;;  %v327_v57 = vld [vmem:[%s2481_s1 + $0x20] sm:$0xff] }
  0x43   :  { %1227 = vmatprep.subr.mxu0 %v1646_v34  ;;  %491 = vmatpush1.msra.mxu1 %v1613_v29 }
  0x44   :  { %213 = vmatmul.mubr.f32.gmra.mxu0 %v93_v58  ;;  %308 = vmatmul.mubr.f32.gmra.mxu1 %v91_v59  ;;  %v325_v58 = vld [vmem:[%s2481_s1 + $0x10] sm:$0xff]  ;;  %v332_v59 = vld [vmem:[%s2481_s1 + $0x48] sm:$0xff] }
  0x45   :  { %1228 = vmatpush3.msra.mxu0 %v1658_v36  ;;  %492 = vmatprep.subr.mxu1 %v1401_v0 }
  0x46   :  { %1229 = vmatprep.subr.mxu0 %v1665_v37  ;;  %493 = vmatpush1.msra.mxu1 %v1632_v32 }
  0x47   :  { %1230 = vmatpush3.msra.mxu0 %v1677_v39  ;;  %494 = vmatprep.subr.mxu1 %v1401_v0 }
  0x48   :  { %217 = vmatprep.mubr.f32.mxu0 %v98_v60  ;;  %1128 = vmatprep.mubr.msk.f32.mxu1 %vm101_vm0, %v96_v61  ;;  %v330_v60 = vld [vmem:[%s2481_s1 + $0x38] sm:$0xff]  ;;  %v331_v61 = vld [vmem:[%s2481_s1 + $0x40] sm:$0xff] }
  0x49   :  { %1231 = vmatprep.subr.mxu0 %v1684_v40  ;;  %495 = vmatpush1.msra.mxu1 %v1651_v35 }
  0x4a   :  { %218 = vmatmul.mubr.f32.gmra.mxu0 %v97_v62  ;;  %313 = vmatmul.mubr.f32.gmra.mxu1 %v95_v63  ;;  %v329_v62 = vld [vmem:[%s2481_s1 + $0x30] sm:$0xff]  ;;  %v336_v63 = vld [vmem:[%s2481_s1 + $0x68] sm:$0xff] }
  0x4b   :  { %1232 = vmatpush3.msra.mxu0 %v1696_v42  ;;  %496 = vmatprep.subr.mxu1 %v1401_v0 }
  0x4c   :  { %1233 = vmatprep.subr.mxu0 %v1703_v43  ;;  %497 = vmatpush1.msra.mxu1 %v1670_v38 }
  0x4d   :  { %1234 = vmatpush3.msra.mxu0 %v1715_v45  ;;  %498 = vmatprep.subr.mxu1 %v1401_v0 }
  0x4e   :  { %1129 = vmatprep.mubr.msk.f32.mxu1 %vm101_vm0, %v100_v49  ;;  %1235 = vmatprep.subr.mxu0 %v1722_v46  ;;  %v334_v49 = vld [vmem:[%s2481_s1 + $0x58] sm:$0xff] }
  0x4f   :  { %499 = vmatpush1.msra.mxu1 %v1689_v41  ;;  %1236 = vmatpush3.msra.mxu0 %v1734_v48 }
  0x50   :  { %318 = vmatmul.mubr.f32.gmra.mxu1 %v99_v50  ;;  %436 = vmatprep.mubr.f32.mxu0 %v324_v53  ;;  %v335_v50 = vld [vmem:[%s2481_s1 + $0x60] sm:$0xff]  ;;  %v333_v53 = vld [vmem:[%s2481_s1 + $0x50] sm:$0xff] }
  0x51   :  { %500 = vmatprep.subr.mxu1 %v1401_v0  ;;  %437 = vmatmul.mubr.f32.vlgmr.msra.gmra.mxu0 %v323_v54  ;;  %v340_v54 = vld [vmem:[%s2481_s1 + $0x88] sm:$0xff] }
  0x52   :  { %501 = vmatpush1.msra.mxu1 %v1708_v44  ;;  %1258 = vmatprep.subr.mxu0 %v1441_v1 }
  0x53   :  { %502 = vmatprep.subr.mxu1 %v1401_v0  ;;  %1259 = vmatpush3.msra.mxu0 %v1451_v3 }
  0x54   :  { %503 = vmatpush1.msra.mxu1 %v1727_v47  ;;  %1260 = vmatprep.subr.mxu0 %v1458_v4 }
  0x55   :  { %532 = vmatprep.subr.mxu1 %v1401_v0  ;;  %1261 = vmatpush3.msra.mxu0 %v1468_v6 }
  0x56   :  { %533 = vmatpush2.msra.mxu1 %v1749_v51  ;;  %1262 = vmatprep.subr.mxu0 %v1475_v7 }
  0x57   :  { %534 = vmatprep.subr.mxu1 %v1401_v0  ;;  %1263 = vmatpush3.msra.mxu0 %v1487_v9 }
  0x58   :  { %441 = vmatprep.mubr.f32.mxu0 %v328_v55  ;;  %535 = vmatpush2.msra.mxu1 %v1756_v52  ;;  %v338_v55 = vld [vmem:[%s2481_s1 + $0x78] sm:$0xff] }
  0x59   :  { %1130 = vmatprep.mubr.msk.f32.mxu1 %vm101_vm0, %v326_v56  ;;  %1264 = vmatprep.subr.mxu0 %v1494_v10  ;;  %v339_v56 = vld [vmem:[%s2481_s1 + $0x80] sm:$0xff] }
  0x5a   :  { %442 = vmatmul.mubr.f32.gmra.mxu0 %v327_v57  ;;  %537 = vmatmul.mubr.f32.vlgmr.msra.gmra.mxu1 %v325_v58  ;;  %v337_v57 = vld [vmem:[%s2481_s1 + $0x70] sm:$0xff]  ;;  %v344_v58 = vld [vmem:[%s2481_s1 + $0xa8] sm:$0xff] }
  0x5b   :  { %1265 = vmatpush3.msra.mxu0 %v1506_v12  ;;  %721 = vmatprep.subr.mxu1 %v1401_v0 }
  0x5c   :  { %1266 = vmatprep.subr.mxu0 %v1513_v13  ;;  %722 = vmatpush1.msra.mxu1 %v1446_v2 }
  0x5d   :  { %1267 = vmatpush3.msra.mxu0 %v1525_v15  ;;  %723 = vmatprep.subr.mxu1 %v1401_v0 }
  0x5e   :  { %446 = vmatprep.mubr.f32.mxu0 %v332_v59  ;;  %1131 = vmatprep.mubr.msk.f32.mxu1 %vm101_vm0, %v330_v60  ;;  %v342_v59 = vld [vmem:[%s2481_s1 + $0x98] sm:$0xff]  ;;  %v343_v60 = vld [vmem:[%s2481_s1 + $0xa0] sm:$0xff] }
  0x5f   :  { %1268 = vmatprep.subr.mxu0 %v1532_v16  ;;  %724 = vmatpush1.msra.mxu1 %v1463_v5 }
  0x60   :  { %447 = vmatmul.mubr.f32.gmra.mxu0 %v331_v61  ;;  %542 = vmatmul.mubr.f32.gmra.mxu1 %v329_v62  ;;  %v341_v61 = vld [vmem:[%s2481_s1 + $0x90] sm:$0xff]  ;;  %v348_v62 = vld [vmem:[%s2481_s1 + $0xc8] sm:$0xff] }
  0x61   :  { %1269 = vmatpush3.msra.mxu0 %v1544_v18  ;;  %725 = vmatprep.subr.mxu1 %v1401_v0 }
  0x62   :  { %1270 = vmatprep.subr.mxu0 %v1551_v19  ;;  %726 = vmatpush1.msra.mxu1 %v1480_v8 }
  0x63   :  { %1271 = vmatpush3.msra.mxu0 %v1563_v21  ;;  %727 = vmatprep.subr.mxu1 %v1401_v0 }
  0x64   :  { %451 = vmatprep.mubr.f32.mxu0 %v336_v63  ;;  %1132 = vmatprep.mubr.msk.f32.mxu1 %vm101_vm0, %v334_v49  ;;  %v346_v63 = vld [vmem:[%s2481_s1 + $0xb8] sm:$0xff]  ;;  %v347_v49 = vld [vmem:[%s2481_s1 + $0xc0] sm:$0xff] }
  0x65   :  { %1272 = vmatprep.subr.mxu0 %v1570_v22  ;;  %728 = vmatpush1.msra.mxu1 %v1499_v11 }
  0x66   :  { %452 = vmatmul.mubr.f32.gmra.mxu0 %v335_v50  ;;  %547 = vmatmul.mubr.f32.gmra.mxu1 %v333_v53  ;;  %v345_v50 = vld [vmem:[%s2481_s1 + $0xb0] sm:$0xff]  ;;  %v350_v53 = vld [vmem:[%s2481_s1 + $0xd8] sm:$0xff] }
  0x67   :  { %1273 = vmatpush3.msra.mxu0 %v1582_v24  ;;  %729 = vmatprep.subr.mxu1 %v1401_v0 }
  0x68   :  { %1274 = vmatprep.subr.mxu0 %v1589_v25  ;;  %730 = vmatpush1.msra.mxu1 %v1518_v14 }
  0x69   :  { %1275 = vmatpush3.msra.mxu0 %v1601_v27  ;;  %731 = vmatprep.subr.mxu1 %v1401_v0 }
  0x6a   :  { %456 = vmatprep.mubr.f32.mxu0 %v340_v54  ;;  %1133 = vmatprep.mubr.msk.f32.mxu1 %vm101_vm0, %v338_v55  ;;  %v349_v54 = vld [vmem:[%s2481_s1 + $0xd0] sm:$0xff]  ;;  %v573_v55 = vld [vmem:[%s2482_s2 + $0x8] sm:$0xff] }
  0x6b   :  { %1276 = vmatprep.subr.mxu0 %v1608_v28  ;;  %732 = vmatpush1.msra.mxu1 %v1537_v17 }
  0x6c   :  { %457 = vmatmul.mubr.f32.gmra.mxu0 %v339_v56  ;;  %552 = vmatmul.mubr.f32.gmra.mxu1 %v337_v57  ;;  %v572_v56 = vld [vmem:[%s2482_s2] sm:$0xff]  ;;  %v577_v57 = vld [vmem:[%s2482_s2 + $0x28] sm:$0xff] }
  0x6d   :  { %1277 = vmatpush3.msra.mxu0 %v1620_v30  ;;  %733 = vmatprep.subr.mxu1 %v1401_v0 }
  0x6e   :  { %1278 = vmatprep.subr.mxu0 %v1627_v31  ;;  %734 = vmatpush1.msra.mxu1 %v1556_v20 }
  0x6f   :  { %1279 = vmatpush3.msra.mxu0 %v1639_v33  ;;  %735 = vmatprep.subr.mxu1 %v1401_v0 }
  0x70   :  { %461 = vmatprep.mubr.f32.mxu0 %v344_v58  ;;  %1134 = vmatprep.mubr.msk.f32.mxu1 %vm101_vm0, %v342_v59  ;;  %v841_v58 = vld [vmem:[%s2483_s3 + $0xa0] sm:$0xff]  ;;  %v839_v59 = vld [vmem:[%s2483_s3 + $0x90] sm:$0xff] }
  0x71   :  { %1280 = vmatprep.subr.mxu0 %v1646_v34  ;;  %736 = vmatpush1.msra.mxu1 %v1575_v23 }
  0x72   :  { %462 = vmatmul.mubr.f32.gmra.mxu0 %v343_v60  ;;  %557 = vmatmul.mubr.f32.gmra.mxu1 %v341_v61  ;;  %v845_v60 = vld [vmem:[%s2483_s3 + $0xc0] sm:$0xff]  ;;  %v843_v61 = vld [vmem:[%s2483_s3 + $0xb0] sm:$0xff] }
  0x73   :  { %1281 = vmatpush3.msra.mxu0 %v1658_v36  ;;  %737 = vmatprep.subr.mxu1 %v1401_v0 }
  0x74   :  { %1282 = vmatprep.subr.mxu0 %v1665_v37  ;;  %738 = vmatpush1.msra.mxu1 %v1594_v26 }
  0x75   :  { %1283 = vmatpush3.msra.mxu0 %v1677_v39  ;;  %739 = vmatprep.subr.mxu1 %v1401_v0 }
  0x76   :  { %466 = vmatprep.mubr.f32.mxu0 %v348_v62  ;;  %1135 = vmatprep.mubr.msk.f32.mxu1 %vm101_vm0, %v346_v63  ;;  %v824_v62 = vld [vmem:[%s2483_s3 + $0x18] sm:$0xff]  ;;  %v823_v63 = vld [vmem:[%s2483_s3 + $0x10] sm:$0xff] }
  0x77   :  { %1284 = vmatprep.subr.mxu0 %v1684_v40  ;;  %740 = vmatpush1.msra.mxu1 %v1613_v29 }
  0x78   :  { %467 = vmatmul.mubr.f32.gmra.mxu0 %v347_v49  ;;  %562 = vmatmul.mubr.f32.gmra.mxu1 %v345_v50 }
  0x79   :  { %1285 = vmatpush3.msra.mxu0 %v1696_v42  ;;  %741 = vmatprep.subr.mxu1 %v1401_v0 }
  0x7a   :  { %1286 = vmatprep.subr.mxu0 %v1703_v43  ;;  %742 = vmatpush1.msra.mxu1 %v1632_v32 }
  0x7b   :  { %1287 = vmatpush3.msra.mxu0 %v1715_v45  ;;  %743 = vmatprep.subr.mxu1 %v1401_v0 }
  0x7c   :  { %1136 = vmatprep.mubr.msk.f32.mxu1 %vm101_vm0, %v350_v53  ;;  %1288 = vmatprep.subr.mxu0 %v1722_v46 }
  0x7d   :  { %744 = vmatpush1.msra.mxu1 %v1651_v35  ;;  %1289 = vmatpush3.msra.mxu0 %v1734_v48 }
  0x7e   :  { %567 = vmatmul.mubr.f32.gmra.mxu1 %v349_v54  ;;  %685 = vmatprep.mubr.f32.mxu0 %v573_v55 }
  0x7f   :  { %745 = vmatprep.subr.mxu1 %v1401_v0  ;;  %686 = vmatmul.mubr.f32.vlgmr.msra.gmra.mxu0 %v572_v56 }
  0x80   :  { %746 = vmatpush1.msra.mxu1 %v1670_v38  ;;  %1311 = vmatprep.subr.mxu0 %v1441_v1  ;;  %v576_v1 = vld [vmem:[%s2482_s2 + $0x20] sm:$0xff] }
  0x81   :  { %747 = vmatprep.subr.mxu1 %v1401_v0  ;;  %1312 = vmatpush3.msra.mxu0 %v1451_v3  ;;  %v581_v3 = vld [vmem:[%s2482_s2 + $0x48] sm:$0xff] }
  0x82   :  { %748 = vmatpush1.msra.mxu1 %v1689_v41  ;;  %1313 = vmatprep.subr.mxu0 %v1458_v4  ;;  %v575_v4 = vld [vmem:[%s2482_s2 + $0x18] sm:$0xff] }
  0x83   :  { %749 = vmatprep.subr.mxu1 %v1401_v0  ;;  %1314 = vmatpush3.msra.mxu0 %v1468_v6  ;;  %v580_v6 = vld [vmem:[%s2482_s2 + $0x40] sm:$0xff] }
  0x84   :  { %750 = vmatpush1.msra.mxu1 %v1708_v44  ;;  %1315 = vmatprep.subr.mxu0 %v1475_v7  ;;  %v574_v7 = vld [vmem:[%s2482_s2 + $0x10] sm:$0xff] }
  0x85   :  { %751 = vmatprep.subr.mxu1 %v1401_v0  ;;  %1316 = vmatpush3.msra.mxu0 %v1487_v9  ;;  %v585_v9 = vld [vmem:[%s2482_s2 + $0x68] sm:$0xff] }
  0x86   :  { %690 = vmatprep.mubr.f32.mxu0 %v577_v57  ;;  %752 = vmatpush1.msra.mxu1 %v1727_v47 }
  0x87   :  { %1317 = vmatprep.subr.mxu0 %v1494_v10  ;;  %691 = vmatmul.mubr.f32.gmra.mxu0 %v576_v1  ;;  %v579_v10 = vld [vmem:[%s2482_s2 + $0x38] sm:$0xff] }
  0x88   :  { %781 = vmatprep.subr.mxu1 %v1401_v0  ;;  %1318 = vmatpush3.msra.mxu0 %v1506_v12  ;;  %v584_v12 = vld [vmem:[%s2482_s2 + $0x60] sm:$0xff] }
  0x89   :  { %782 = vmatpush2.msra.mxu1 %v1749_v51  ;;  %1319 = vmatprep.subr.mxu0 %v1513_v13  ;;  %v578_v13 = vld [vmem:[%s2482_s2 + $0x30] sm:$0xff] }
  0x8a   :  { %783 = vmatprep.subr.mxu1 %v1401_v0  ;;  %1320 = vmatpush3.msra.mxu0 %v1525_v15  ;;  %v589_v15 = vld [vmem:[%s2482_s2 + $0x88] sm:$0xff] }
  0x8b   :  { %695 = vmatprep.mubr.f32.mxu0 %v581_v3  ;;  %784 = vmatpush2.msra.mxu1 %v1756_v52 }
  0x8c   :  { %1137 = vmatprep.mubr.msk.f32.mxu1 %vm101_vm0, %v575_v4  ;;  %1321 = vmatprep.subr.mxu0 %v1532_v16  ;;  %v583_v16 = vld [vmem:[%s2482_s2 + $0x58] sm:$0xff] }
  0x8d   :  { %696 = vmatmul.mubr.f32.gmra.mxu0 %v580_v6  ;;  %786 = vmatmul.mubr.f32.vlgmr.msra.gmra.mxu1 %v574_v7 }
  0x8e   :  { %1322 = vmatpush3.msra.mxu0 %v1544_v18  ;;  %1364 = vmatprep.subr.mxu1 %v1401_v0  ;;  %v588_v18 = vld [vmem:[%s2482_s2 + $0x80] sm:$0xff] }
  0x8f   :  { %1323 = vmatprep.subr.mxu0 %v1551_v19  ;;  %1382 = vmatpush1.msra.mxu1 %v1446_v2  ;;  %v582_v19 = vld [vmem:[%s2482_s2 + $0x50] sm:$0xff] }
  0x90   :  { %1324 = vmatpush3.msra.mxu0 %v1563_v21  ;;  %1365 = vmatprep.subr.mxu1 %v1401_v0  ;;  %v593_v21 = vld [vmem:[%s2482_s2 + $0xa8] sm:$0xff] }
  0x91   :  { %700 = vmatprep.mubr.f32.mxu0 %v585_v9  ;;  %1138 = vmatprep.mubr.msk.f32.mxu1 %vm101_vm0, %v579_v10 }
  0x92   :  { %1325 = vmatprep.subr.mxu0 %v1570_v22  ;;  %1383 = vmatpush1.msra.mxu1 %v1463_v5  ;;  %v587_v22 = vld [vmem:[%s2482_s2 + $0x78] sm:$0xff] }
  0x93   :  { %701 = vmatmul.mubr.f32.gmra.mxu0 %v584_v12  ;;  %791 = vmatmul.mubr.f32.gmra.mxu1 %v578_v13 }
  0x94   :  { %1326 = vmatpush3.msra.mxu0 %v1582_v24  ;;  %1366 = vmatprep.subr.mxu1 %v1401_v0  ;;  %v592_v24 = vld [vmem:[%s2482_s2 + $0xa0] sm:$0xff] }
  0x95   :  { %1327 = vmatprep.subr.mxu0 %v1589_v25  ;;  %1384 = vmatpush1.msra.mxu1 %v1480_v8  ;;  %v586_v25 = vld [vmem:[%s2482_s2 + $0x70] sm:$0xff] }
  0x96   :  { %1328 = vmatpush3.msra.mxu0 %v1601_v27  ;;  %1367 = vmatprep.subr.mxu1 %v1401_v0  ;;  %v597_v27 = vld [vmem:[%s2482_s2 + $0xc8] sm:$0xff] }
  0x97   :  { %705 = vmatprep.mubr.f32.mxu0 %v589_v15  ;;  %1139 = vmatprep.mubr.msk.f32.mxu1 %vm101_vm0, %v583_v16 }
  0x98   :  { %1329 = vmatprep.subr.mxu0 %v1608_v28  ;;  %1385 = vmatpush1.msra.mxu1 %v1499_v11  ;;  %v591_v28 = vld [vmem:[%s2482_s2 + $0x98] sm:$0xff] }
  0x99   :  { %706 = vmatmul.mubr.f32.gmra.mxu0 %v588_v18  ;;  %796 = vmatmul.mubr.f32.gmra.mxu1 %v582_v19 }
  0x9a   :  { %1330 = vmatpush3.msra.mxu0 %v1620_v30  ;;  %1368 = vmatprep.subr.mxu1 %v1401_v0  ;;  %v596_v30 = vld [vmem:[%s2482_s2 + $0xc0] sm:$0xff] }
  0x9b   :  { %1331 = vmatprep.subr.mxu0 %v1627_v31  ;;  %1386 = vmatpush1.msra.mxu1 %v1518_v14  ;;  %v590_v31 = vld [vmem:[%s2482_s2 + $0x90] sm:$0xff] }
  0x9c   :  { %1332 = vmatpush3.msra.mxu0 %v1639_v33  ;;  %1369 = vmatprep.subr.mxu1 %v1401_v0  ;;  %v595_v33 = vld [vmem:[%s2482_s2 + $0xb8] sm:$0xff] }
  0x9d   :  { %710 = vmatprep.mubr.f32.mxu0 %v593_v21  ;;  %1140 = vmatprep.mubr.msk.f32.mxu1 %vm101_vm0, %v587_v22 }
  0x9e   :  { %1333 = vmatprep.subr.mxu0 %v1646_v34  ;;  %1387 = vmatpush1.msra.mxu1 %v1537_v17  ;;  %v594_v34 = vld [vmem:[%s2482_s2 + $0xb0] sm:$0xff] }
  0x9f   :  { %711 = vmatmul.mubr.f32.gmra.mxu0 %v592_v24  ;;  %801 = vmatmul.mubr.f32.gmra.mxu1 %v586_v25 }
  0xa0   :  { %1334 = vmatpush3.msra.mxu0 %v1658_v36  ;;  %1370 = vmatprep.subr.mxu1 %v1401_v0  ;;  %v822_v36 = vld [vmem:[%s2483_s3 + $0x8] sm:$0xff] }
  0xa1   :  { %1335 = vmatprep.subr.mxu0 %v1665_v37  ;;  %1388 = vmatpush1.msra.mxu1 %v1556_v20  ;;  %v821_v37 = vld [vmem:[%s2483_s3] sm:$0xff] }
  0xa2   :  { %1336 = vmatpush3.msra.mxu0 %v1677_v39  ;;  %1371 = vmatprep.subr.mxu1 %v1401_v0  ;;  %v599_v39 = vld [vmem:[%s2482_s2 + $0xd8] sm:$0xff] }
  0xa3   :  { %715 = vmatprep.mubr.f32.mxu0 %v597_v27  ;;  %1141 = vmatprep.mubr.msk.f32.mxu1 %vm101_vm0, %v591_v28 }
  0xa4   :  { %1337 = vmatprep.subr.mxu0 %v1684_v40  ;;  %1389 = vmatpush1.msra.mxu1 %v1575_v23  ;;  %v598_v40 = vld [vmem:[%s2482_s2 + $0xd0] sm:$0xff] }
  0xa5   :  { %716 = vmatmul.mubr.f32.gmra.mxu0 %v596_v30  ;;  %806 = vmatmul.mubr.f32.gmra.mxu1 %v590_v31 }
  0xa6   :  { %1338 = vmatpush3.msra.mxu0 %v1696_v42  ;;  %1372 = vmatprep.subr.mxu1 %v1401_v0  ;;  %v834_v42 = vld [vmem:[%s2483_s3 + $0x68] sm:$0xff] }
  0xa7   :  { %1339 = vmatprep.subr.mxu0 %v1703_v43  ;;  %1390 = vmatpush1.msra.mxu1 %v1594_v26  ;;  %v832_v43 = vld [vmem:[%s2483_s3 + $0x58] sm:$0xff] }
  0xa8   :  { %1340 = vmatpush3.msra.mxu0 %v1715_v45  ;;  %1373 = vmatprep.subr.mxu1 %v1401_v0  ;;  %v831_v45 = vld [vmem:[%s2483_s3 + $0x50] sm:$0xff] }
  0xa9   :  { %1142 = vmatprep.mubr.msk.f32.mxu1 %vm101_vm0, %v595_v33  ;;  %1341 = vmatprep.subr.mxu0 %v1722_v46  ;;  %v837_v46 = vld [vmem:[%s2483_s3 + $0x80] sm:$0xff] }
  0xaa   :  { %1391 = vmatpush1.msra.mxu1 %v1613_v29  ;;  %1342 = vmatpush3.msra.mxu0 %v1734_v48  ;;  %v835_v48 = vld [vmem:[%s2483_s3 + $0x70] sm:$0xff] }
  0xab   :  { %811 = vmatmul.mubr.f32.gmra.mxu1 %v594_v34  ;;  %934 = vmatprep.mubr.f32.mxu0 %v822_v36 }
  0xac   :  { %1374 = vmatprep.subr.mxu1 %v1401_v0  ;;  %935 = vmatmul.mubr.f32.vlgmr.msra.gmra.mxu0 %v821_v37 }
  0xad   :  { %970 = vmatprep.subr.mxu0 %v1401_v0  ;;  %1392 = vmatpush1.msra.mxu1 %v1632_v32 }
  0xae   :  { %971 = vmatpush1.msra.mxu0 %v1446_v2  ;;  %1375 = vmatprep.subr.mxu1 %v1401_v0  ;;  %v826_v2 = vld [vmem:[%s2483_s3 + $0x28] sm:$0xff] }
  0xaf   :  { %1143 = vmatprep.mubr.msk.f32.mxu1 %vm101_vm0, %v599_v39  ;;  %972 = vmatprep.subr.mxu0 %v1401_v0 }
  0xb0   :  { %1393 = vmatpush1.msra.mxu1 %v1651_v35  ;;  %973 = vmatpush1.msra.mxu0 %v1463_v5  ;;  %v825_v5 = vld [vmem:[%s2483_s3 + $0x20] sm:$0xff] }
  0xb1   :  { %816 = vmatmul.mubr.f32.gmra.mxu1 %v598_v40  ;;  %1376 = vmatprep.subr.mxu1 %v1401_v0 }
  0xb2   :  { %974 = vmatprep.subr.mxu0 %v1401_v0  ;;  %1394 = vmatpush1.msra.mxu1 %v1670_v38 }
  0xb3   :  { %975 = vmatpush1.msra.mxu0 %v1480_v8  ;;  %1377 = vmatprep.subr.mxu1 %v1401_v0  ;;  %v830_v8 = vld [vmem:[%s2483_s3 + $0x48] sm:$0xff] }
  0xb4   :  { %976 = vmatprep.subr.mxu0 %v1401_v0  ;;  %1395 = vmatpush1.msra.mxu1 %v1689_v41 }
  0xb5   :  { %977 = vmatpush1.msra.mxu0 %v1499_v11  ;;  %1378 = vmatprep.subr.mxu1 %v1401_v0  ;;  %v829_v11 = vld [vmem:[%s2483_s3 + $0x40] sm:$0xff] }
  0xb6   :  { %978 = vmatprep.subr.mxu0 %v1401_v0  ;;  %1396 = vmatpush1.msra.mxu1 %v1708_v44 }
  0xb7   :  { %939 = vmatprep.mubr.f32.mxu0 %v826_v2  ;;  %979 = vmatpush1.msra.mxu0 %v1518_v14  ;;  %v828_v14 = vld [vmem:[%s2483_s3 + $0x38] sm:$0xff] }
  0xb8   :  { %1379 = vmatprep.subr.mxu1 %v1401_v0  ;;  %940 = vmatmul.mubr.f32.gmra.mxu0 %v825_v5 }
  0xb9   :  { %980 = vmatprep.subr.mxu0 %v1401_v0  ;;  %1397 = vmatpush1.msra.mxu1 %v1727_v47 }
  0xba   :  { %981 = vmatpush1.msra.mxu0 %v1537_v17  ;;  %1380 = vmatprep.subr.mxu1 %v1401_v0  ;;  %v827_v17 = vld [vmem:[%s2483_s3 + $0x30] sm:$0xff] }
  0xbb   :  { %982 = vmatprep.subr.mxu0 %v1401_v0  ;;  %1398 = vmatpush2.msra.mxu1 %v1749_v51 }
  0xbc   :  { %944 = vmatprep.mubr.f32.mxu0 %v830_v8  ;;  %983 = vmatpush1.msra.mxu0 %v1556_v20  ;;  %v833_v20 = vld [vmem:[%s2483_s3 + $0x60] sm:$0xff] }
  0xbd   :  { %1381 = vmatprep.subr.mxu1 %v1401_v0  ;;  %945 = vmatmul.mubr.f32.gmra.mxu0 %v829_v11 }
  0xbe   :  { %984 = vmatprep.subr.mxu0 %v1401_v0  ;;  %1399 = vmatpush2.msra.mxu1 %v1756_v52 }
  0xbf   :  { %1145 = vmatprep.mubr.msk.f32.mxu1 %vm101_vm0, %v828_v14  ;;  %985 = vmatpush1.msra.mxu0 %v1575_v23  ;;  %v838_v23 = vld [vmem:[%s2483_s3 + $0x88] sm:$0xff] }
  0xc0   :  { %1040 = vmatmul.mubr.f32.vlgmr.msra.gmra.mxu1 %v827_v17  ;;  %986 = vmatprep.subr.mxu0 %v1401_v0 }
  0xc1   :  { %949 = vmatprep.mubr.f32.mxu0 %v834_v42  ;;  %987 = vmatpush1.msra.mxu0 %v1594_v26  ;;  %v836_v26 = vld [vmem:[%s2483_s3 + $0x78] sm:$0xff] }
  0xc2   :  { %950 = vmatmul.mubr.f32.gmra.mxu0 %v833_v20  ;;  %988 = vmatprep.subr.mxu0 %v1401_v0 }
  0xc3   :  { %1146 = vmatprep.mubr.msk.f32.mxu1 %vm101_vm0, %v832_v43  ;;  %989 = vmatpush1.msra.mxu0 %v1613_v29  ;;  %v842_v29 = vld [vmem:[%s2483_s3 + $0xa8] sm:$0xff] }
  0xc4   :  { %1045 = vmatmul.mubr.f32.gmra.mxu1 %v831_v45  ;;  %990 = vmatprep.subr.mxu0 %v1401_v0 }
  0xc5   :  { %954 = vmatprep.mubr.f32.mxu0 %v838_v23  ;;  %991 = vmatpush1.msra.mxu0 %v1632_v32  ;;  %v840_v32 = vld [vmem:[%s2483_s3 + $0x98] sm:$0xff] }
  0xc6   :  { %955 = vmatmul.mubr.f32.gmra.mxu0 %v837_v46  ;;  %992 = vmatprep.subr.mxu0 %v1401_v0 }
  0xc7   :  { %1147 = vmatprep.mubr.msk.f32.mxu1 %vm101_vm0, %v836_v26  ;;  %993 = vmatpush1.msra.mxu0 %v1651_v35  ;;  %v846_v35 = vld [vmem:[%s2483_s3 + $0xc8] sm:$0xff] }
  0xc8   :  { %1050 = vmatmul.mubr.f32.gmra.mxu1 %v835_v48  ;;  %994 = vmatprep.subr.mxu0 %v1401_v0 }
  0xc9   :  { %959 = vmatprep.mubr.f32.mxu0 %v842_v29  ;;  %995 = vmatpush1.msra.mxu0 %v1670_v38  ;;  %v844_v38 = vld [vmem:[%s2483_s3 + $0xb8] sm:$0xff] }
  0xca   :  { %960 = vmatmul.mubr.f32.gmra.mxu0 %v841_v58  ;;  %996 = vmatprep.subr.mxu0 %v1401_v0 }
  0xcb   :  { %1148 = vmatprep.mubr.msk.f32.mxu1 %vm101_vm0, %v840_v32  ;;  %997 = vmatpush1.msra.mxu0 %v1689_v41  ;;  %v848_v41 = vld [vmem:[%s2483_s3 + $0xd8] sm:$0xff] }
  0xcc   :  { %1055 = vmatmul.mubr.f32.gmra.mxu1 %v839_v59  ;;  %998 = vmatprep.subr.mxu0 %v1401_v0 }
  0xcd   :  { %964 = vmatprep.mubr.f32.mxu0 %v846_v35  ;;  %999 = vmatpush1.msra.mxu0 %v1708_v44  ;;  %v847_v44 = vld [vmem:[%s2483_s3 + $0xd0] sm:$0xff] }
  0xce   :  { %965 = vmatmul.mubr.f32.gmra.mxu0 %v845_v60  ;;  %1000 = vmatprep.subr.mxu0 %v1401_v0 }
  0xcf   :  { %1149 = vmatprep.mubr.msk.f32.mxu1 %vm101_vm0, %v844_v38  ;;  %1001 = vmatpush1.msra.mxu0 %v1727_v47 }
  0xd0   :  { %1060 = vmatmul.mubr.f32.gmra.mxu1 %v843_v61  ;;  %1030 = vmatprep.subr.mxu0 %v1401_v0 }
  0xd1   :  { %1031 = vmatpush2.msra.mxu0 %v1749_v51  ;;  %1150 = vmatprep.mubr.msk.f32.mxu1 %vm101_vm0, %v848_v41 }
  0xd2   :  { %1032 = vmatprep.subr.mxu0 %v1401_v0  ;;  %1144 = vmatprep.mubr.msk.f32.mxu0 %vm101_vm0, %v824_v62 }
  0xd3   :  { %1033 = vmatpush2.msra.mxu0 %v1756_v52 }
  0xd4   :  { %1065 = vmatmul.mubr.f32.gmra.mxu1 %v847_v44  ;;  %1035 = vmatmul.mubr.f32.vlgmr.msra.gmra.mxu0 %v823_v63 }
  0xe3   :  { %v1184_v47 = vpop.f32.mrf.mxu0 }
  0xe5   :  { %v1185_v51 = vpop.f32.mrf.mxu0 }
  0xe6   :  { %v1186_v49 = vadd.f32 %v1185_v51, %v1184_v47 }
  0xe7   :  { %v289_v50 = vpop.f32.mrf.mxu1 }
  0xe8   :  { %v2359_v53 = vadd.f32 %v1186_v49, %v289_v50 }
  0xe9   :  { %v291_v54 = vpop.f32.mrf.mxu1 }
  0xec   :  { %v1187_v55 = vpop.f32.mrf.mxu0 }
  0xee   :  { %v1188_v56 = vpop.f32.mrf.mxu0 }
  0xef   :  { %v1189_v57 = vadd.f32 %v1188_v56, %v1187_v55 }
  0xf2   :  { %v1190_v1 = vpop.f32.mrf.mxu0  ;;  %v294_v3 = vpop.f32.mrf.mxu1 }
  0xf3   :  { %v2361_v4 = vadd.f32 %v1189_v57, %v294_v3 }
  0xf4   :  { %v1191_v0 = vpop.f32.mrf.mxu0  ;;  %v296_v6 = vpop.f32.mrf.mxu1 }
  0xf5   :  { %v1192_v7 = vadd.f32 %v1191_v0, %v1190_v1 }
  0xf8   :  { %v1193_v52 = vpop.f32.mrf.mxu0  ;;  %v299_v9 = vpop.f32.mrf.mxu1 }
  0xf9   :  { %v2363_v10 = vadd.f32 %v1192_v7, %v299_v9 }
  0xfa   :  { %v1194_v12 = vpop.f32.mrf.mxu0  ;;  %v301_v13 = vpop.f32.mrf.mxu1 }
  0xfb   :  { %v1195_v15 = vadd.f32 %v1194_v12, %v1193_v52 }
  0xfe   :  { %v1196_v16 = vpop.f32.mrf.mxu0  ;;  %v304_v18 = vpop.f32.mrf.mxu1 }
  0xff   :  { %v2365_v19 = vadd.f32 %v1195_v15, %v304_v18 }
 0x100   :  { %v1197_v21 = vpop.f32.mrf.mxu0  ;;  %v306_v22 = vpop.f32.mrf.mxu1 }
 0x101   :  { %v1198_v24 = vadd.f32 %v1197_v21, %v1196_v16 }
 0x104   :  { %v1199_v25 = vpop.f32.mrf.mxu0  ;;  %v309_v27 = vpop.f32.mrf.mxu1 }
 0x105   :  { %v2367_v28 = vadd.f32 %v1198_v24, %v309_v27 }
 0x106   :  { %v1200_v30 = vpop.f32.mrf.mxu0  ;;  %v311_v31 = vpop.f32.mrf.mxu1 }
 0x107   :  { %v1201_v33 = vadd.f32 %v1200_v30, %v1199_v25 }
 0x10a   :  { %v1202_v34 = vpop.f32.mrf.mxu0  ;;  %v314_v36 = vpop.f32.mrf.mxu1 }
 0x10b   :  { %v2369_v37 = vadd.f32 %v1201_v33, %v314_v36 }
 0x10c   :  { %v1203_v39 = vpop.f32.mrf.mxu0  ;;  %v316_v40 = vpop.f32.mrf.mxu1 }
 0x10d   :  { %v1204_v2 = vadd.f32 %v1203_v39, %v1202_v34 }
 0x110   :  { %v319_v5 = vpop.f32.mrf.mxu1 }
 0x111   :  { %v2371_v8 = vadd.f32 %v1204_v2, %v319_v5  ;;  %v1237_v11 = vpop.f32.mrf.mxu0 }
 0x112   :  { %v321_v14 = vpop.f32.mrf.mxu1 }
 0x113   :  { %v1238_v17 = vpop.f32.mrf.mxu0 }
 0x114   :  { %v1239_v42 = vadd.f32 %v1238_v17, %v1237_v11 }
 0x11a   :  { %v1240_v20 = vpop.f32.mrf.mxu0  ;;  %v538_v43 = vpop.f32.mrf.mxu1 }
 0x11b   :  { %v2373_v45 = vadd.f32 %v1239_v42, %v538_v43 }
 0x11c   :  { %v1241_v23 = vpop.f32.mrf.mxu0  ;;  %v540_v46 = vpop.f32.mrf.mxu1 }
 0x11d   :  { %v1070_v26 = vmax.f32 %v2359_v53, %v2373_v45  ;;  %v1242_v48 = vadd.f32 %v1241_v23, %v1240_v20 }
 0x120   :  { %v1243_v29 = vpop.f32.mrf.mxu0  ;;  %v543_v58 = vpop.f32.mrf.mxu1 }
 0x121   :  { %v2377_v32 = vadd.f32 %v1242_v48, %v543_v58 }
 0x122   :  { %v1244_v59 = vpop.f32.mrf.mxu0  ;;  %v545_v35 = vpop.f32.mrf.mxu1 }
 0x123   :  { %v1071_v60 = vmax.f32 %v2361_v4, %v2377_v32  ;;  %v1245_v38 = vadd.f32 %v1244_v59, %v1243_v29 }
 0x126   :  { %v1246_v61 = vpop.f32.mrf.mxu0  ;;  %v548_v41 = vpop.f32.mrf.mxu1 }
 0x127   :  { %v2381_v62 = vadd.f32 %v1245_v38, %v548_v41 }
 0x128   :  { %v1247_v44 = vpop.f32.mrf.mxu0  ;;  %v550_v63 = vpop.f32.mrf.mxu1 }
 0x129   :  { %v1072_v47 = vmax.f32 %v2363_v10, %v2381_v62  ;;  %v1248_v51 = vadd.f32 %v1247_v44, %v1246_v61 }
 0x12c   :  { %v1249_v49 = vpop.f32.mrf.mxu0  ;;  %v553_v50 = vpop.f32.mrf.mxu1 }
 0x12d   :  { %v2385_v54 = vadd.f32 %v1248_v51, %v553_v50 }
 0x12e   :  { %v1250_v55 = vpop.f32.mrf.mxu0  ;;  %v555_v56 = vpop.f32.mrf.mxu1 }
 0x12f   :  { %v1073_v57 = vmax.f32 %v2365_v19, %v2385_v54  ;;  %v1251_v1 = vadd.f32 %v1250_v55, %v1249_v49 }
 0x132   :  { %v1252_v3 = vpop.f32.mrf.mxu0  ;;  %v558_v0 = vpop.f32.mrf.mxu1 }
 0x133   :  { %v2389_v6 = vadd.f32 %v1251_v1, %v558_v0 }
 0x134   :  { %v1253_v7 = vpop.f32.mrf.mxu0  ;;  %v560_v52 = vpop.f32.mrf.mxu1 }
 0x135   :  { %v1074_v9 = vmax.f32 %v2367_v28, %v2389_v6  ;;  %v1254_v12 = vadd.f32 %v1253_v7, %v1252_v3 }
 0x138   :  { %v1255_v13 = vpop.f32.mrf.mxu0  ;;  %v563_v15 = vpop.f32.mrf.mxu1 }
 0x139   :  { %v2393_v16 = vadd.f32 %v1254_v12, %v563_v15 }
 0x13a   :  { %v1256_v18 = vpop.f32.mrf.mxu0  ;;  %v565_v21 = vpop.f32.mrf.mxu1 }
 0x13b   :  { %v1075_v22 = vmax.f32 %v2369_v37, %v2393_v16  ;;  %v1257_v24 = vadd.f32 %v1256_v18, %v1255_v13 }
 0x13e   :  { %v568_v25 = vpop.f32.mrf.mxu1 }
 0x13f   :  { %v2397_v27 = vadd.f32 %v1257_v24, %v568_v25  ;;  %v2401_v33 = vpop.f32.mrf.mxu0 }
 0x140   :  { %v570_v30 = vpop.f32.mrf.mxu1 }
 0x141   :  { %v1076_v31 = vmax.f32 %v2371_v8, %v2397_v27  ;;  %v2403_v34 = vpop.f32.mrf.mxu0 }
 0x147   :  { %v1293_v36 = vpop.f32.mrf.mxu0 }
 0x149   :  { %v1294_v39 = vpop.f32.mrf.mxu0 }
 0x14a   :  { %v1295_v52 = vadd.f32 %v1294_v39, %v1293_v36 }
 0x14d   :  { %v1296_v40 = vpop.f32.mrf.mxu0  ;;  %v2405_v2 = vpop.f32.mrf.mxu1 }
 0x14f   :  { %v1297_v5 = vpop.f32.mrf.mxu0  ;;  %v789_v11 = vpop.f32.mrf.mxu1 }
 0x150   :  { %v1298_v30 = vadd.f32 %v1297_v5, %v1296_v40 }
 0x153   :  { %v1299_v14 = vpop.f32.mrf.mxu0  ;;  %v792_v17 = vpop.f32.mrf.mxu1 }
 0x154   :  { %v793_v15 = vadd.f32 %v1295_v52, %v792_v17 }
 0x155   :  { %v794_v42 = vpop.f32.mrf.mxu1  ;;  %v1300_v20 = vpop.f32.mrf.mxu0 }
 0x156   :  { %v2420_v42 = vld [vmem:[%s2484_s5] ss:$0 sm:$0xff] }
 0x159   :  { %v797_v43 = vpop.f32.mrf.mxu1  ;;  %v1302_v23 = vpop.f32.mrf.mxu0 }
 0x15b   :  { %v799_v46 = vpop.f32.mrf.mxu1  ;;  %v1303_v48 = vpop.f32.mrf.mxu0 }
 0x15c   :  { %v1304_v4 = vadd.f32 %v1303_v48, %v1302_v23 }
 0x15f   :  { %v802_v29 = vpop.f32.mrf.mxu1  ;;  %v1305_v59 = vpop.f32.mrf.mxu0 }
 0x161   :  { %v804_v58 = vpop.f32.mrf.mxu1  ;;  %v1306_v38 = vpop.f32.mrf.mxu0 }
 0x162   :  { %v1307_v23 = vadd.f32 %v1306_v38, %v1305_v59  ;;  %v1292_v59 = vadd.f32 %v2403_v34, %v2401_v33 }
 0x164   :  { %v788_v6 = vadd.f32 %v1292_v59, %v2405_v2 }
 0x165   :  { %v807_v35 = vpop.f32.mrf.mxu1  ;;  %v2407_v41 = vpop.f32.mrf.mxu0 }
 0x167   :  { %v809_v61 = vpop.f32.mrf.mxu1  ;;  %v2409_v51 = vpop.f32.mrf.mxu0 }
 0x168   :  { %v798_v61 = vadd.f32 %v1298_v30, %v797_v43  ;;  %v1310_v38 = vadd.f32 %v2409_v51, %v2407_v41 }
 0x16b   :  { %v812_v44 = vpop.f32.mrf.mxu1 }
 0x16c   :  { %v2413_v50 = vpop.f32.mrf.mxu0 }
 0x16d   :  { %v814_v63 = vpop.f32.mrf.mxu1 }
 0x16e   :  { %v2415_v56 = vpop.f32.mrf.mxu0  ;;  %v1301_v63 = vadd.f32 %v1300_v20, %v1299_v14 }
 0x171   :  { %v2411_v49 = vpop.f32.mrf.mxu1 }
 0x173   :  { %v819_v55 = vpop.f32.mrf.mxu1 }
 0x178   :  { %v1346_v1 = vpop.f32.mrf.mxu0 }
 0x17a   :  { %v1347_v3 = vpop.f32.mrf.mxu0 }
 0x17b   :  { %v1348_v0 = vadd.f32 %v1347_v3, %v1346_v1  ;;  %v803_v3 = vadd.f32 %v1301_v63, %v802_v29  ;;  %v808_v29 = vadd.f32 %v1304_v4, %v807_v35  ;;  %v813_v35 = vadd.f32 %v1307_v23, %v812_v44 }
 0x17d   :  { %v1349_v7 = vpop.f32.mrf.mxu0 }
 0x17f   :  { %v1350_v12 = vpop.f32.mrf.mxu0 }
 0x180   :  { %v1041_v13 = vpop.f32.mrf.mxu1  ;;  %v1351_v21 = vadd.f32 %v1350_v12, %v1349_v7 }
 0x181   :  { %v1042_v18 = vadd.f32 %v1348_v0, %v1041_v13 }
 0x182   :  { %v1043_v24 = vpop.f32.mrf.mxu1  ;;  %v1352_v25 = vpop.f32.mrf.mxu0 }
 0x183   :  { %v1078_v11 = vmax.f32 %v793_v15, %v1042_v18 }
 0x184   :  { %v1046_v46 = vpop.f32.mrf.mxu1  ;;  %v1353_v58 = vpop.f32.mrf.mxu0 }
 0x185   :  { %v1085_v36 = vmax.f32 %v1071_v60, %v1078_v11  ;;  %v1047_v39 = vadd.f32 %v1351_v21, %v1046_v46  ;;  %v1354_v17 = vadd.f32 %v1353_v58, %v1352_v25 }
 0x186   :  { %v1048_v55 = vpop.f32.mrf.mxu1  ;;  %v1355_v1 = vpop.f32.mrf.mxu0 }
 0x187   :  { %v1099_v40 = vadd.f32 %v2420_v42, %v1085_v36  ;;  %v1079_v5 = vmax.f32 %v798_v61, %v1047_v39  ;;  %v1345_v36 = vadd.f32 %v2415_v56, %v2413_v50 }
 0x188   :  { %v1051_v0 = vpop.f32.mrf.mxu1  ;;  %v1356_v7 = vpop.f32.mrf.mxu0 }
 0x189   :  { %v1106_v52 = vmax.f32 %v1099_v40, 0.0  ;;  %v1086_v43 = vmax.f32 %v1072_v47, %v1079_v5  ;;  %v1052_v12 = vadd.f32 %v1354_v17, %v1051_v0  ;;  %v1357_v13 = vadd.f32 %v1356_v7, %v1355_v1 }
 0x18a   :  { %v1053_v32 = vpop.f32.mrf.mxu1  ;;  %v1358_v60 = vpop.f32.mrf.mxu0 }
 0x18b   :  { %1113 = vst [vmem:[%s2485_s6 + $0x8] sm:$0xff] %v1106_v52  ;;  %v1100_v14 = vadd.f32 %v2420_v42, %v1086_v43  ;;  %v1080_v20 = vmax.f32 %v803_v3, %v1052_v12 }
 0x18c   :  { %v1056_v15 = vpop.f32.mrf.mxu1  ;;  %v1359_v18 = vpop.f32.mrf.mxu0 }
 0x18d   :  { %v1107_v21 = vmax.f32 %v1100_v14, 0.0  ;;  %v1087_v10 = vmax.f32 %v1073_v57, %v1080_v20  ;;  %v1057_v62 = vadd.f32 %v1357_v13, %v1056_v15  ;;  %v1360_v47 = vadd.f32 %v1359_v18, %v1358_v60 }
 0x18e   :  { %v1058_v48 = vpop.f32.mrf.mxu1  ;;  %v1361_v24 = vpop.f32.mrf.mxu0 }
 0x18f   :  { %1114 = vst [vmem:[%s2485_s6 + $0x10] sm:$0xff] %v1107_v21  ;;  %v1101_v25 = vadd.f32 %v2420_v42, %v1087_v10  ;;  %v1081_v30 = vmax.f32 %v808_v29, %v1057_v62 }
 0x190   :  { %v1061_v11 = vpop.f32.mrf.mxu1  ;;  %v1362_v46 = vpop.f32.mrf.mxu0 }
 0x191   :  { %v1108_v58 = vmax.f32 %v1101_v25, 0.0  ;;  %v1088_v19 = vmax.f32 %v1074_v9, %v1081_v30  ;;  %v1062_v54 = vadd.f32 %v1360_v47, %v1061_v11  ;;  %v1363_v57 = vadd.f32 %v1362_v46, %v1361_v24 }
 0x192   :  { %v1063_v61 = vpop.f32.mrf.mxu1  ;;  %v818_v9 = vadd.f32 %v1310_v38, %v2411_v49 }
 0x193   :  { %1115 = vst [vmem:[%s2485_s6 + $0x18] sm:$0xff] %v1108_v58  ;;  %v1102_v44 = vadd.f32 %v2420_v42, %v1088_v19  ;;  %v1082_v28 = vmax.f32 %v813_v35, %v1062_v54 }
 0x194   :  { %v1066_v39 = vpop.f32.mrf.mxu1  ;;  %v1036_v33 = vpop.f32.mrf.mxu0 }
 0x195   :  { %v1109_v34 = vmax.f32 %v1102_v44, 0.0  ;;  %v1089_v41 = vmax.f32 %v1075_v22, %v1082_v28  ;;  %v1067_v51 = vadd.f32 %v1363_v57, %v1066_v39  ;;  %v1037_v50 = vadd.f32 %v1345_v36, %v1036_v33 }
 0x196   :  { %v1068_v56 = vpop.f32.mrf.mxu1  ;;  %v1038_v17 = vpop.f32.mrf.mxu0 }
 0x197   :  { %1116 = vst [vmem:[%s2485_s6 + $0x20] sm:$0xff] %v1109_v34  ;;  %v1103_v63 = vadd.f32 %v2420_v42, %v1089_v41  ;;  %v1083_v2 = vmax.f32 %v818_v9, %v1067_v51  ;;  %v1077_v55 = vmax.f32 %v788_v6, %v1037_v50 }
 0x199   :  { %v1110_v49 = vmax.f32 %v1103_v63, 0.0  ;;  %v1090_v1 = vmax.f32 %v1076_v31, %v1083_v2  ;;  %v1084_v37 = vmax.f32 %v1070_v26, %v1077_v55 }
 0x19b   :  { %1117 = vst [vmem:[%s2485_s6 + $0x28] sm:$0xff] %v1110_v49  ;;  %v1104_v16 = vadd.f32 %v2420_v42, %v1090_v1  ;;  %v1098_v22 = vadd.f32 %v2420_v42, %v1084_v37 }
 0x19d   :  { %v1111_v40 = vmax.f32 %v1104_v16, 0.0  ;;  %v1105_v5 = vmax.f32 %v1098_v22, 0.0 }
 0x19f   :  { %1118 = vst [vmem:[%s2485_s6 + $0x30] sm:$0xff] %v1111_v40  ;;  %1112 = vst [vmem:[%s2485_s6] sm:$0xff] %v1105_v5 }

// kernel: lenet5_forward.5
= control target key start
LH: loop header
LB: loop body
LE: loop exit
PB: predicated region body
PF: predicated region fallthrough
CT: control target
= control target key end

     0   :  { %vm2143_vm0 = vmmov 0   ;;  %s3621_s1 = inlined_call_operand.vmem [shape: f32[3200,128], index: 1, kind: input, shape index: {}]   ;;  %s3622_s0 = inlined_call_operand.vmem [shape: f32[8,3200], index: 0, kind: input, shape index: {}]   ;;  %s3623_s3 = inlined_call_operand.vmem [shape: f32[128,128], index: 3, kind: input, shape index: {}]   ;;  %s3624_s5 = inlined_call_operand.vmem [shape: f32[128,128], index: 5, kind: input, shape index: {}]   ;;  %s3625_s2 = inlined_call_operand.vmem [shape: f32[1,128], index: 2, kind: input, shape index: {}]   ;;  %s3626_s4 = inlined_call_operand.vmem [shape: f32[1,128], index: 4, kind: input, shape index: {}]   ;;  %s3627_s6 = inlined_call_operand.vmem [shape: f32[1,128], index: 6, kind: input, shape index: {}]   ;;  %s3628_s7 = inlined_call_operand.vmem [shape: f32[8,128], index: 7, kind: output, shape index: {}]  }
   0x1   :  { %v82_v0 = vld [vmem:[%s3621_s1 + $0xf8] sm:$0xff]  ;;  %v81_v2 = vld [vmem:[%s3621_s1 + $0xf0] sm:$0xff]  ;;  %v80_v6 = vld [vmem:[%s3621_s1 + $0xe8] sm:$0xff] }
   0x2   :  { %v66_v1 = vld [vmem:[%s3621_s1 + $0x78] sm:$0xff]  ;;  %1564 = vmatprep.subr.mxu0 %v82_v0  ;;  %v65_v4 = vld [vmem:[%s3621_s1 + $0x70] sm:$0xff]  ;;  %v64_v8 = vld [vmem:[%s3621_s1 + $0x68] sm:$0xff] }
   0x3   :  { %v114_v3 = vld [vmem:[%s3621_s1 + $0x1f8] sm:$0xff]  ;;  %1565 = vmatpush3.msra.mxu0 %v66_v1  ;;  %v113_v7 = vld [vmem:[%s3621_s1 + $0x1f0] sm:$0xff]  ;;  %v112_v10 = vld [vmem:[%s3621_s1 + $0x1e8] sm:$0xff] }
   0x4   :  { %v98_v5 = vld [vmem:[%s3621_s1 + $0x178] sm:$0xff]  ;;  %1599 = vmatprep.subr.mxu1 %v114_v3  ;;  %1566 = vmatprep.subr.mxu0 %v81_v2  ;;  %v97_v9 = vld [vmem:[%s3621_s1 + $0x170] sm:$0xff]  ;;  %v79_v11 = vld [vmem:[%s3621_s1 + $0xe0] sm:$0xff] }
   0x5   :  { %1600 = vmatpush3.msra.mxu1 %v98_v5  ;;  %1567 = vmatpush3.msra.mxu0 %v65_v4  ;;  %v96_v12 = vld [vmem:[%s3621_s1 + $0x168] sm:$0xff]  ;;  %v63_v13 = vld [vmem:[%s3621_s1 + $0x60] sm:$0xff]  ;;  %v78_v15 = vld [vmem:[%s3621_s1 + $0xd8] sm:$0xff] }
   0x6   :  { %1601 = vmatprep.subr.mxu1 %v113_v7  ;;  %1568 = vmatprep.subr.mxu0 %v80_v6  ;;  %v111_v14 = vld [vmem:[%s3621_s1 + $0x1e0] sm:$0xff]  ;;  %v62_v17 = vld [vmem:[%s3621_s1 + $0x58] sm:$0xff]  ;;  %v77_v19 = vld [vmem:[%s3621_s1 + $0xd0] sm:$0xff] }
   0x7   :  { %1602 = vmatpush3.msra.mxu1 %v97_v9  ;;  %1569 = vmatpush3.msra.mxu0 %v64_v8  ;;  %v95_v16 = vld [vmem:[%s3621_s1 + $0x160] sm:$0xff]  ;;  %v110_v18 = vld [vmem:[%s3621_s1 + $0x1d8] sm:$0xff]  ;;  %v61_v21 = vld [vmem:[%s3621_s1 + $0x50] sm:$0xff] }
   0x8   :  { %1603 = vmatprep.subr.mxu1 %v112_v10  ;;  %1570 = vmatprep.subr.mxu0 %v79_v11  ;;  %v94_v20 = vld [vmem:[%s3621_s1 + $0x158] sm:$0xff]  ;;  %v109_v22 = vld [vmem:[%s3621_s1 + $0x1d0] sm:$0xff]  ;;  %v76_v23 = vld [vmem:[%s3621_s1 + $0xc8] sm:$0xff] }
   0x9   :  { %1604 = vmatpush3.msra.mxu1 %v96_v12  ;;  %1571 = vmatpush3.msra.mxu0 %v63_v13  ;;  %v93_v24 = vld [vmem:[%s3621_s1 + $0x150] sm:$0xff]  ;;  %v60_v25 = vld [vmem:[%s3621_s1 + $0x48] sm:$0xff]  ;;  %v75_v27 = vld [vmem:[%s3621_s1 + $0xc0] sm:$0xff] }
   0xa   :  { %1605 = vmatprep.subr.mxu1 %v111_v14  ;;  %1572 = vmatprep.subr.mxu0 %v78_v15  ;;  %v108_v26 = vld [vmem:[%s3621_s1 + $0x1c8] sm:$0xff]  ;;  %v59_v29 = vld [vmem:[%s3621_s1 + $0x40] sm:$0xff]  ;;  %v74_v31 = vld [vmem:[%s3621_s1 + $0xb8] sm:$0xff] }
   0xb   :  { %1606 = vmatpush3.msra.mxu1 %v95_v16  ;;  %1573 = vmatpush3.msra.mxu0 %v62_v17  ;;  %v92_v28 = vld [vmem:[%s3621_s1 + $0x148] sm:$0xff]  ;;  %v107_v30 = vld [vmem:[%s3621_s1 + $0x1c0] sm:$0xff]  ;;  %v58_v33 = vld [vmem:[%s3621_s1 + $0x38] sm:$0xff] }
   0xc   :  { %1607 = vmatprep.subr.mxu1 %v110_v18  ;;  %1574 = vmatprep.subr.mxu0 %v77_v19  ;;  %v91_v32 = vld [vmem:[%s3621_s1 + $0x140] sm:$0xff]  ;;  %v106_v34 = vld [vmem:[%s3621_s1 + $0x1b8] sm:$0xff]  ;;  %v73_v35 = vld [vmem:[%s3621_s1 + $0xb0] sm:$0xff] }
   0xd   :  { %1608 = vmatpush3.msra.mxu1 %v94_v20  ;;  %1575 = vmatpush3.msra.mxu0 %v61_v21  ;;  %v90_v36 = vld [vmem:[%s3621_s1 + $0x138] sm:$0xff]  ;;  %v57_v37 = vld [vmem:[%s3621_s1 + $0x30] sm:$0xff]  ;;  %v72_v39 = vld [vmem:[%s3621_s1 + $0xa8] sm:$0xff] }
   0xe   :  { %1609 = vmatprep.subr.mxu1 %v109_v22  ;;  %1576 = vmatprep.subr.mxu0 %v76_v23  ;;  %v105_v38 = vld [vmem:[%s3621_s1 + $0x1b0] sm:$0xff]  ;;  %v56_v41 = vld [vmem:[%s3621_s1 + $0x28] sm:$0xff]  ;;  %v71_v43 = vld [vmem:[%s3621_s1 + $0xa0] sm:$0xff] }
   0xf   :  { %1610 = vmatpush3.msra.mxu1 %v93_v24  ;;  %1577 = vmatpush3.msra.mxu0 %v60_v25  ;;  %v89_v40 = vld [vmem:[%s3621_s1 + $0x130] sm:$0xff]  ;;  %v104_v42 = vld [vmem:[%s3621_s1 + $0x1a8] sm:$0xff]  ;;  %v55_v45 = vld [vmem:[%s3621_s1 + $0x20] sm:$0xff] }
  0x10   :  { %1611 = vmatprep.subr.mxu1 %v108_v26  ;;  %1578 = vmatprep.subr.mxu0 %v75_v27  ;;  %v88_v44 = vld [vmem:[%s3621_s1 + $0x128] sm:$0xff]  ;;  %v103_v46 = vld [vmem:[%s3621_s1 + $0x1a0] sm:$0xff]  ;;  %v70_v47 = vld [vmem:[%s3621_s1 + $0x98] sm:$0xff] }
  0x11   :  { %1612 = vmatpush3.msra.mxu1 %v92_v28  ;;  %1579 = vmatpush3.msra.mxu0 %v59_v29  ;;  %v87_v48 = vld [vmem:[%s3621_s1 + $0x120] sm:$0xff]  ;;  %v54_v49 = vld [vmem:[%s3621_s1 + $0x18] sm:$0xff]  ;;  %v69_v51 = vld [vmem:[%s3621_s1 + $0x90] sm:$0xff] }
  0x12   :  { %1613 = vmatprep.subr.mxu1 %v107_v30  ;;  %1580 = vmatprep.subr.mxu0 %v74_v31  ;;  %v102_v50 = vld [vmem:[%s3621_s1 + $0x198] sm:$0xff]  ;;  %v53_v53 = vld [vmem:[%s3621_s1 + $0x10] sm:$0xff]  ;;  %v68_v55 = vld [vmem:[%s3621_s1 + $0x88] sm:$0xff] }
  0x13   :  { %1614 = vmatpush3.msra.mxu1 %v91_v32  ;;  %1581 = vmatpush3.msra.mxu0 %v58_v33  ;;  %v86_v52 = vld [vmem:[%s3621_s1 + $0x118] sm:$0xff]  ;;  %v101_v54 = vld [vmem:[%s3621_s1 + $0x190] sm:$0xff]  ;;  %v52_v57 = vld [vmem:[%s3621_s1 + $0x8] sm:$0xff] }
  0x14   :  { %1615 = vmatprep.subr.mxu1 %v106_v34  ;;  %1582 = vmatprep.subr.mxu0 %v73_v35  ;;  %v85_v56 = vld [vmem:[%s3621_s1 + $0x110] sm:$0xff]  ;;  %v100_v58 = vld [vmem:[%s3621_s1 + $0x188] sm:$0xff]  ;;  %v67_v59 = vld [vmem:[%s3621_s1 + $0x80] sm:$0xff] }
  0x15   :  { %1616 = vmatpush3.msra.mxu1 %v90_v36  ;;  %1583 = vmatpush3.msra.mxu0 %v57_v37  ;;  %v27_v60 = vld [vmem:[%s3622_s0 + $0x8] sm:$0xff]  ;;  %v51_v61 = vld [vmem:[%s3621_s1] sm:$0xff]  ;;  %v146_v1 = vld [vmem:[%s3621_s1 + $0x2f8] sm:$0xff] }
  0x16   :  { %1617 = vmatprep.subr.mxu1 %v105_v38  ;;  %1584 = vmatprep.subr.mxu0 %v72_v39  ;;  %v84_v62 = vld [vmem:[%s3621_s1 + $0x108] sm:$0xff]  ;;  %v26_v63 = vld [vmem:[%s3622_s0] sm:$0xff]  ;;  %v29_v3 = vld [vmem:[%s3622_s0 + $0x18] sm:$0xff] }
  0x17   :  { %1618 = vmatpush3.msra.mxu1 %v89_v40  ;;  %1585 = vmatpush3.msra.mxu0 %v56_v41  ;;  %v99_v0 = vld [vmem:[%s3621_s1 + $0x180] sm:$0xff]  ;;  %v130_v4 = vld [vmem:[%s3621_s1 + $0x278] sm:$0xff]  ;;  %v28_v5 = vld [vmem:[%s3622_s0 + $0x10] sm:$0xff] }
  0x18   :  { %1619 = vmatprep.subr.mxu1 %v104_v42  ;;  %1586 = vmatprep.subr.mxu0 %v71_v43  ;;  %v83_v2 = vld [vmem:[%s3621_s1 + $0x100] sm:$0xff]  ;;  %v145_v6 = vld [vmem:[%s3621_s1 + $0x2f0] sm:$0xff]  ;;  %v178_v7 = vld [vmem:[%s3621_s1 + $0x3f8] sm:$0xff] }
  0x19   :  { %1620 = vmatpush3.msra.mxu1 %v88_v44  ;;  %1587 = vmatpush3.msra.mxu0 %v55_v45  ;;  %v129_v8 = vld [vmem:[%s3621_s1 + $0x270] sm:$0xff]  ;;  %v162_v9 = vld [vmem:[%s3621_s1 + $0x378] sm:$0xff]  ;;  %v144_v10 = vld [vmem:[%s3621_s1 + $0x2e8] sm:$0xff] }
  0x1a   :  { %1621 = vmatprep.subr.mxu1 %v103_v46  ;;  %1588 = vmatprep.subr.mxu0 %v70_v47  ;;  %v177_v11 = vld [vmem:[%s3621_s1 + $0x3f0] sm:$0xff]  ;;  %v128_v12 = vld [vmem:[%s3621_s1 + $0x268] sm:$0xff]  ;;  %v143_v14 = vld [vmem:[%s3621_s1 + $0x2e0] sm:$0xff] }
  0x1b   :  { %1622 = vmatpush3.msra.mxu1 %v87_v48  ;;  %1589 = vmatpush3.msra.mxu0 %v54_v49  ;;  %v161_v13 = vld [vmem:[%s3621_s1 + $0x370] sm:$0xff]  ;;  %v176_v15 = vld [vmem:[%s3621_s1 + $0x3e8] sm:$0xff]  ;;  %v127_v16 = vld [vmem:[%s3621_s1 + $0x260] sm:$0xff] }
  0x1c   :  { %1623 = vmatprep.subr.mxu1 %v102_v50  ;;  %1590 = vmatprep.subr.mxu0 %v69_v51  ;;  %v160_v17 = vld [vmem:[%s3621_s1 + $0x368] sm:$0xff]  ;;  %v142_v18 = vld [vmem:[%s3621_s1 + $0x2d8] sm:$0xff]  ;;  %v175_v19 = vld [vmem:[%s3621_s1 + $0x3e0] sm:$0xff] }
  0x1d   :  { %1624 = vmatpush3.msra.mxu1 %v86_v52  ;;  %1591 = vmatpush3.msra.mxu0 %v53_v53  ;;  %v126_v20 = vld [vmem:[%s3621_s1 + $0x258] sm:$0xff]  ;;  %v159_v21 = vld [vmem:[%s3621_s1 + $0x360] sm:$0xff]  ;;  %v141_v22 = vld [vmem:[%s3621_s1 + $0x2d0] sm:$0xff] }
  0x1e   :  { %1625 = vmatprep.subr.mxu1 %v101_v54  ;;  %1592 = vmatprep.subr.mxu0 %v68_v55  ;;  %v174_v23 = vld [vmem:[%s3621_s1 + $0x3d8] sm:$0xff]  ;;  %v125_v24 = vld [vmem:[%s3621_s1 + $0x250] sm:$0xff]  ;;  %v140_v26 = vld [vmem:[%s3621_s1 + $0x2c8] sm:$0xff] }
  0x1f   :  { %1626 = vmatpush3.msra.mxu1 %v85_v56  ;;  %1593 = vmatpush3.msra.mxu0 %v52_v57  ;;  %v158_v25 = vld [vmem:[%s3621_s1 + $0x358] sm:$0xff]  ;;  %v173_v27 = vld [vmem:[%s3621_s1 + $0x3d0] sm:$0xff]  ;;  %v124_v28 = vld [vmem:[%s3621_s1 + $0x248] sm:$0xff] }
  0x20   :  { %1627 = vmatprep.subr.mxu1 %v100_v58  ;;  %1594 = vmatprep.subr.mxu0 %v67_v59  ;;  %v157_v29 = vld [vmem:[%s3621_s1 + $0x350] sm:$0xff]  ;;  %v139_v30 = vld [vmem:[%s3621_s1 + $0x2c0] sm:$0xff]  ;;  %v172_v31 = vld [vmem:[%s3621_s1 + $0x3c8] sm:$0xff] }
  0x21   :  { %522 = vmatprep.mubr.f32.mxu0 %v27_v60  ;;  %1595 = vmatpush3.msra.mxu0 %v51_v61  ;;  %v123_v32 = vld [vmem:[%s3621_s1 + $0x240] sm:$0xff]  ;;  %v156_v33 = vld [vmem:[%s3621_s1 + $0x348] sm:$0xff]  ;;  %v138_v34 = vld [vmem:[%s3621_s1 + $0x2b8] sm:$0xff] }
  0x22   :  { %1628 = vmatpush3.msra.mxu1 %v84_v62  ;;  %523 = vmatmul.mubr.f32.vlgmr.msra.gmra.mxu0 %v26_v63  ;;  %v171_v35 = vld [vmem:[%s3621_s1 + $0x3c0] sm:$0xff]  ;;  %v122_v36 = vld [vmem:[%s3621_s1 + $0x238] sm:$0xff]  ;;  %v137_v38 = vld [vmem:[%s3621_s1 + $0x2b0] sm:$0xff] }
  0x23   :  { %1629 = vmatprep.subr.mxu1 %v99_v0  ;;  %1634 = vmatprep.subr.mxu0 %v146_v1  ;;  %v155_v37 = vld [vmem:[%s3621_s1 + $0x340] sm:$0xff]  ;;  %v170_v39 = vld [vmem:[%s3621_s1 + $0x3b8] sm:$0xff]  ;;  %v121_v40 = vld [vmem:[%s3621_s1 + $0x230] sm:$0xff] }
  0x24   :  { %1630 = vmatpush3.msra.mxu1 %v83_v2  ;;  %592 = vmatprep.mubr.f32.mxu1 %v29_v3  ;;  %v154_v41 = vld [vmem:[%s3621_s1 + $0x338] sm:$0xff]  ;;  %v136_v42 = vld [vmem:[%s3621_s1 + $0x2a8] sm:$0xff]  ;;  %v169_v43 = vld [vmem:[%s3621_s1 + $0x3b0] sm:$0xff] }
  0x25   :  { %1635 = vmatpush3.msra.mxu0 %v130_v4  ;;  %593 = vmatmul.mubr.f32.vlgmr.msra.gmra.mxu1 %v28_v5  ;;  %v120_v44 = vld [vmem:[%s3621_s1 + $0x228] sm:$0xff]  ;;  %v153_v45 = vld [vmem:[%s3621_s1 + $0x330] sm:$0xff]  ;;  %v135_v46 = vld [vmem:[%s3621_s1 + $0x2a0] sm:$0xff] }
  0x26   :  { %1636 = vmatprep.subr.mxu0 %v145_v6  ;;  %1669 = vmatprep.subr.mxu1 %v178_v7  ;;  %v168_v47 = vld [vmem:[%s3621_s1 + $0x3a8] sm:$0xff]  ;;  %v119_v48 = vld [vmem:[%s3621_s1 + $0x220] sm:$0xff]  ;;  %v134_v50 = vld [vmem:[%s3621_s1 + $0x298] sm:$0xff] }
  0x27   :  { %1637 = vmatpush3.msra.mxu0 %v129_v8  ;;  %1670 = vmatpush3.msra.mxu1 %v162_v9  ;;  %v152_v49 = vld [vmem:[%s3621_s1 + $0x328] sm:$0xff]  ;;  %v167_v51 = vld [vmem:[%s3621_s1 + $0x3a0] sm:$0xff]  ;;  %v118_v52 = vld [vmem:[%s3621_s1 + $0x218] sm:$0xff] }
  0x28   :  { %1638 = vmatprep.subr.mxu0 %v144_v10  ;;  %1671 = vmatprep.subr.mxu1 %v177_v11  ;;  %v151_v53 = vld [vmem:[%s3621_s1 + $0x320] sm:$0xff]  ;;  %v133_v54 = vld [vmem:[%s3621_s1 + $0x290] sm:$0xff]  ;;  %v166_v55 = vld [vmem:[%s3621_s1 + $0x398] sm:$0xff] }
  0x29   :  { %1639 = vmatpush3.msra.mxu0 %v128_v12  ;;  %1672 = vmatpush3.msra.mxu1 %v161_v13  ;;  %v117_v56 = vld [vmem:[%s3621_s1 + $0x210] sm:$0xff]  ;;  %v150_v57 = vld [vmem:[%s3621_s1 + $0x318] sm:$0xff]  ;;  %v132_v58 = vld [vmem:[%s3621_s1 + $0x288] sm:$0xff] }
  0x2a   :  { %1640 = vmatprep.subr.mxu0 %v143_v14  ;;  %1673 = vmatprep.subr.mxu1 %v176_v15  ;;  %v165_v59 = vld [vmem:[%s3621_s1 + $0x390] sm:$0xff]  ;;  %v116_v60 = vld [vmem:[%s3621_s1 + $0x208] sm:$0xff]  ;;  %v131_v62 = vld [vmem:[%s3621_s1 + $0x280] sm:$0xff] }
  0x2b   :  { %1641 = vmatpush3.msra.mxu0 %v127_v16  ;;  %1674 = vmatpush3.msra.mxu1 %v160_v17  ;;  %v149_v61 = vld [vmem:[%s3621_s1 + $0x310] sm:$0xff]  ;;  %v164_v63 = vld [vmem:[%s3621_s1 + $0x388] sm:$0xff]  ;;  %v115_v0 = vld [vmem:[%s3621_s1 + $0x200] sm:$0xff] }
  0x2c   :  { %1642 = vmatprep.subr.mxu0 %v142_v18  ;;  %1675 = vmatprep.subr.mxu1 %v175_v19  ;;  %v31_v1 = vld [vmem:[%s3622_s0 + $0x28] sm:$0xff]  ;;  %v30_v3 = vld [vmem:[%s3622_s0 + $0x20] sm:$0xff]  ;;  %v210_v5 = vld [vmem:[%s3621_s1 + $0x4f8] sm:$0xff] }
  0x2d   :  { %1643 = vmatpush3.msra.mxu0 %v126_v20  ;;  %1676 = vmatpush3.msra.mxu1 %v159_v21  ;;  %v148_v2 = vld [vmem:[%s3621_s1 + $0x308] sm:$0xff]  ;;  %v163_v4 = vld [vmem:[%s3621_s1 + $0x380] sm:$0xff]  ;;  %v33_v7 = vld [vmem:[%s3622_s0 + $0x38] sm:$0xff] }
  0x2e   :  { %1644 = vmatprep.subr.mxu0 %v141_v22  ;;  %1677 = vmatprep.subr.mxu1 %v174_v23  ;;  %v147_v6 = vld [vmem:[%s3621_s1 + $0x300] sm:$0xff]  ;;  %v194_v8 = vld [vmem:[%s3621_s1 + $0x478] sm:$0xff]  ;;  %v32_v9 = vld [vmem:[%s3622_s0 + $0x30] sm:$0xff] }
  0x2f   :  { %1645 = vmatpush3.msra.mxu0 %v125_v24  ;;  %1678 = vmatpush3.msra.mxu1 %v158_v25  ;;  %v209_v10 = vld [vmem:[%s3621_s1 + $0x4f0] sm:$0xff]  ;;  %v242_v11 = vld [vmem:[%s3621_s1 + $0x5f8] sm:$0xff]  ;;  %v208_v14 = vld [vmem:[%s3621_s1 + $0x4e8] sm:$0xff] }
  0x30   :  { %1646 = vmatprep.subr.mxu0 %v140_v26  ;;  %1679 = vmatprep.subr.mxu1 %v173_v27  ;;  %v193_v12 = vld [vmem:[%s3621_s1 + $0x470] sm:$0xff]  ;;  %v226_v13 = vld [vmem:[%s3621_s1 + $0x578] sm:$0xff]  ;;  %v192_v16 = vld [vmem:[%s3621_s1 + $0x468] sm:$0xff] }
  0x31   :  { %1647 = vmatpush3.msra.mxu0 %v124_v28  ;;  %1680 = vmatpush3.msra.mxu1 %v157_v29  ;;  %v241_v15 = vld [vmem:[%s3621_s1 + $0x5f0] sm:$0xff]  ;;  %v207_v18 = vld [vmem:[%s3621_s1 + $0x4e0] sm:$0xff]  ;;  %v240_v19 = vld [vmem:[%s3621_s1 + $0x5e8] sm:$0xff] }
  0x32   :  { %1648 = vmatprep.subr.mxu0 %v139_v30  ;;  %1681 = vmatprep.subr.mxu1 %v172_v31  ;;  %v225_v17 = vld [vmem:[%s3621_s1 + $0x570] sm:$0xff]  ;;  %v191_v20 = vld [vmem:[%s3621_s1 + $0x460] sm:$0xff]  ;;  %v224_v21 = vld [vmem:[%s3621_s1 + $0x568] sm:$0xff] }
  0x33   :  { %1649 = vmatpush3.msra.mxu0 %v123_v32  ;;  %1682 = vmatpush3.msra.mxu1 %v156_v33  ;;  %v206_v22 = vld [vmem:[%s3621_s1 + $0x4d8] sm:$0xff]  ;;  %v239_v23 = vld [vmem:[%s3621_s1 + $0x5e0] sm:$0xff]  ;;  %v205_v26 = vld [vmem:[%s3621_s1 + $0x4d0] sm:$0xff] }
  0x34   :  { %1650 = vmatprep.subr.mxu0 %v138_v34  ;;  %1683 = vmatprep.subr.mxu1 %v171_v35  ;;  %v190_v24 = vld [vmem:[%s3621_s1 + $0x458] sm:$0xff]  ;;  %v223_v25 = vld [vmem:[%s3621_s1 + $0x560] sm:$0xff]  ;;  %v189_v28 = vld [vmem:[%s3621_s1 + $0x450] sm:$0xff] }
  0x35   :  { %1651 = vmatpush3.msra.mxu0 %v122_v36  ;;  %1684 = vmatpush3.msra.mxu1 %v155_v37  ;;  %v238_v27 = vld [vmem:[%s3621_s1 + $0x5d8] sm:$0xff]  ;;  %v204_v30 = vld [vmem:[%s3621_s1 + $0x4c8] sm:$0xff]  ;;  %v237_v31 = vld [vmem:[%s3621_s1 + $0x5d0] sm:$0xff] }
  0x36   :  { %1652 = vmatprep.subr.mxu0 %v137_v38  ;;  %1685 = vmatprep.subr.mxu1 %v170_v39  ;;  %v222_v29 = vld [vmem:[%s3621_s1 + $0x558] sm:$0xff]  ;;  %v188_v32 = vld [vmem:[%s3621_s1 + $0x448] sm:$0xff]  ;;  %v221_v33 = vld [vmem:[%s3621_s1 + $0x550] sm:$0xff] }
  0x37   :  { %1653 = vmatpush3.msra.mxu0 %v121_v40  ;;  %1686 = vmatpush3.msra.mxu1 %v154_v41  ;;  %v203_v34 = vld [vmem:[%s3621_s1 + $0x4c0] sm:$0xff]  ;;  %v236_v35 = vld [vmem:[%s3621_s1 + $0x5c8] sm:$0xff]  ;;  %v202_v38 = vld [vmem:[%s3621_s1 + $0x4b8] sm:$0xff] }
  0x38   :  { %1654 = vmatprep.subr.mxu0 %v136_v42  ;;  %1687 = vmatprep.subr.mxu1 %v169_v43  ;;  %v187_v36 = vld [vmem:[%s3621_s1 + $0x440] sm:$0xff]  ;;  %v220_v37 = vld [vmem:[%s3621_s1 + $0x548] sm:$0xff]  ;;  %v186_v40 = vld [vmem:[%s3621_s1 + $0x438] sm:$0xff] }
  0x39   :  { %1655 = vmatpush3.msra.mxu0 %v120_v44  ;;  %1688 = vmatpush3.msra.mxu1 %v153_v45  ;;  %v235_v39 = vld [vmem:[%s3621_s1 + $0x5c0] sm:$0xff]  ;;  %v201_v42 = vld [vmem:[%s3621_s1 + $0x4b0] sm:$0xff]  ;;  %v234_v43 = vld [vmem:[%s3621_s1 + $0x5b8] sm:$0xff] }
  0x3a   :  { %1656 = vmatprep.subr.mxu0 %v135_v46  ;;  %1689 = vmatprep.subr.mxu1 %v168_v47  ;;  %v219_v41 = vld [vmem:[%s3621_s1 + $0x540] sm:$0xff]  ;;  %v185_v44 = vld [vmem:[%s3621_s1 + $0x430] sm:$0xff]  ;;  %v218_v45 = vld [vmem:[%s3621_s1 + $0x538] sm:$0xff] }
  0x3b   :  { %1657 = vmatpush3.msra.mxu0 %v119_v48  ;;  %1690 = vmatpush3.msra.mxu1 %v152_v49  ;;  %v200_v46 = vld [vmem:[%s3621_s1 + $0x4a8] sm:$0xff]  ;;  %v233_v47 = vld [vmem:[%s3621_s1 + $0x5b0] sm:$0xff] }
  0x3c   :  { %1658 = vmatprep.subr.mxu0 %v134_v50  ;;  %1691 = vmatprep.subr.mxu1 %v167_v51  ;;  %v184_v48 = vld [vmem:[%s3621_s1 + $0x428] sm:$0xff]  ;;  %v217_v49 = vld [vmem:[%s3621_s1 + $0x530] sm:$0xff]  ;;  %v199_v50 = vld [vmem:[%s3621_s1 + $0x4a0] sm:$0xff] }
  0x3d   :  { %1659 = vmatpush3.msra.mxu0 %v118_v52  ;;  %1692 = vmatpush3.msra.mxu1 %v151_v53  ;;  %v232_v51 = vld [vmem:[%s3621_s1 + $0x5a8] sm:$0xff]  ;;  %v183_v52 = vld [vmem:[%s3621_s1 + $0x420] sm:$0xff] }
  0x3e   :  { %1660 = vmatprep.subr.mxu0 %v133_v54  ;;  %1693 = vmatprep.subr.mxu1 %v166_v55  ;;  %v216_v53 = vld [vmem:[%s3621_s1 + $0x528] sm:$0xff]  ;;  %v198_v54 = vld [vmem:[%s3621_s1 + $0x498] sm:$0xff]  ;;  %v231_v55 = vld [vmem:[%s3621_s1 + $0x5a0] sm:$0xff] }
  0x3f   :  { %1661 = vmatpush3.msra.mxu0 %v117_v56  ;;  %1694 = vmatpush3.msra.mxu1 %v150_v57  ;;  %v182_v56 = vld [vmem:[%s3621_s1 + $0x418] sm:$0xff]  ;;  %v215_v57 = vld [vmem:[%s3621_s1 + $0x520] sm:$0xff] }
  0x40   :  { %1662 = vmatprep.subr.mxu0 %v132_v58  ;;  %1695 = vmatprep.subr.mxu1 %v165_v59  ;;  %v197_v58 = vld [vmem:[%s3621_s1 + $0x490] sm:$0xff]  ;;  %v230_v59 = vld [vmem:[%s3621_s1 + $0x598] sm:$0xff] }
  0x41   :  { %1663 = vmatpush3.msra.mxu0 %v116_v60  ;;  %1696 = vmatpush3.msra.mxu1 %v149_v61  ;;  %v181_v60 = vld [vmem:[%s3621_s1 + $0x410] sm:$0xff]  ;;  %v214_v61 = vld [vmem:[%s3621_s1 + $0x518] sm:$0xff] }
  0x42   :  { %1664 = vmatprep.subr.mxu0 %v131_v62  ;;  %1697 = vmatprep.subr.mxu1 %v164_v63  ;;  %v196_v62 = vld [vmem:[%s3621_s1 + $0x488] sm:$0xff]  ;;  %v229_v63 = vld [vmem:[%s3621_s1 + $0x590] sm:$0xff] }
  0x43   :  { %1665 = vmatpush3.msra.mxu0 %v115_v0  ;;  %662 = vmatprep.mubr.f32.mxu0 %v31_v1  ;;  %v180_v0 = vld [vmem:[%s3621_s1 + $0x408] sm:$0xff]  ;;  %v213_v1 = vld [vmem:[%s3621_s1 + $0x510] sm:$0xff] }
  0x44   :  { %1698 = vmatpush3.msra.mxu1 %v148_v2  ;;  %663 = vmatmul.mubr.f32.vlgmr.msra.gmra.mxu0 %v30_v3  ;;  %v195_v2 = vld [vmem:[%s3621_s1 + $0x480] sm:$0xff]  ;;  %v228_v3 = vld [vmem:[%s3621_s1 + $0x588] sm:$0xff] }
  0x45   :  { %1699 = vmatprep.subr.mxu1 %v163_v4  ;;  %1704 = vmatprep.subr.mxu0 %v210_v5  ;;  %v179_v4 = vld [vmem:[%s3621_s1 + $0x400] sm:$0xff]  ;;  %v35_v5 = vld [vmem:[%s3622_s0 + $0x48] sm:$0xff] }
  0x46   :  { %1700 = vmatpush3.msra.mxu1 %v147_v6  ;;  %732 = vmatprep.mubr.f32.mxu1 %v33_v7  ;;  %v212_v6 = vld [vmem:[%s3621_s1 + $0x508] sm:$0xff]  ;;  %v34_v7 = vld [vmem:[%s3622_s0 + $0x40] sm:$0xff] }
  0x47   :  { %1705 = vmatpush3.msra.mxu0 %v194_v8  ;;  %733 = vmatmul.mubr.f32.vlgmr.msra.gmra.mxu1 %v32_v9  ;;  %v227_v8 = vld [vmem:[%s3621_s1 + $0x580] sm:$0xff]  ;;  %v274_v9 = vld [vmem:[%s3621_s1 + $0x6f8] sm:$0xff] }
  0x48   :  { %1706 = vmatprep.subr.mxu0 %v209_v10  ;;  %1739 = vmatprep.subr.mxu1 %v242_v11  ;;  %v211_v10 = vld [vmem:[%s3621_s1 + $0x500] sm:$0xff]  ;;  %v37_v11 = vld [vmem:[%s3622_s0 + $0x58] sm:$0xff] }
  0x49   :  { %1707 = vmatpush3.msra.mxu0 %v193_v12  ;;  %1740 = vmatpush3.msra.mxu1 %v226_v13  ;;  %v258_v12 = vld [vmem:[%s3621_s1 + $0x678] sm:$0xff]  ;;  %v36_v13 = vld [vmem:[%s3622_s0 + $0x50] sm:$0xff] }
  0x4a   :  { %1708 = vmatprep.subr.mxu0 %v208_v14  ;;  %1741 = vmatprep.subr.mxu1 %v241_v15  ;;  %v273_v14 = vld [vmem:[%s3621_s1 + $0x6f0] sm:$0xff]  ;;  %v306_v15 = vld [vmem:[%s3621_s1 + $0x7f8] sm:$0xff] }
  0x4b   :  { %1709 = vmatpush3.msra.mxu0 %v192_v16  ;;  %1742 = vmatpush3.msra.mxu1 %v225_v17  ;;  %v257_v16 = vld [vmem:[%s3621_s1 + $0x670] sm:$0xff]  ;;  %v290_v17 = vld [vmem:[%s3621_s1 + $0x778] sm:$0xff] }
  0x4c   :  { %1710 = vmatprep.subr.mxu0 %v207_v18  ;;  %1743 = vmatprep.subr.mxu1 %v240_v19  ;;  %v272_v18 = vld [vmem:[%s3621_s1 + $0x6e8] sm:$0xff]  ;;  %v305_v19 = vld [vmem:[%s3621_s1 + $0x7f0] sm:$0xff] }
  0x4d   :  { %1711 = vmatpush3.msra.mxu0 %v191_v20  ;;  %1744 = vmatpush3.msra.mxu1 %v224_v21  ;;  %v256_v20 = vld [vmem:[%s3621_s1 + $0x668] sm:$0xff]  ;;  %v289_v21 = vld [vmem:[%s3621_s1 + $0x770] sm:$0xff] }
  0x4e   :  { %1712 = vmatprep.subr.mxu0 %v206_v22  ;;  %1745 = vmatprep.subr.mxu1 %v239_v23  ;;  %v271_v22 = vld [vmem:[%s3621_s1 + $0x6e0] sm:$0xff]  ;;  %v304_v23 = vld [vmem:[%s3621_s1 + $0x7e8] sm:$0xff] }
  0x4f   :  { %1713 = vmatpush3.msra.mxu0 %v190_v24  ;;  %1746 = vmatpush3.msra.mxu1 %v223_v25  ;;  %v255_v24 = vld [vmem:[%s3621_s1 + $0x660] sm:$0xff]  ;;  %v288_v25 = vld [vmem:[%s3621_s1 + $0x768] sm:$0xff] }
  0x50   :  { %1714 = vmatprep.subr.mxu0 %v205_v26  ;;  %1747 = vmatprep.subr.mxu1 %v238_v27  ;;  %v270_v26 = vld [vmem:[%s3621_s1 + $0x6d8] sm:$0xff]  ;;  %v303_v27 = vld [vmem:[%s3621_s1 + $0x7e0] sm:$0xff] }
  0x51   :  { %1715 = vmatpush3.msra.mxu0 %v189_v28  ;;  %1748 = vmatpush3.msra.mxu1 %v222_v29  ;;  %v254_v28 = vld [vmem:[%s3621_s1 + $0x658] sm:$0xff]  ;;  %v287_v29 = vld [vmem:[%s3621_s1 + $0x760] sm:$0xff] }
  0x52   :  { %1716 = vmatprep.subr.mxu0 %v204_v30  ;;  %1749 = vmatprep.subr.mxu1 %v237_v31  ;;  %v269_v30 = vld [vmem:[%s3621_s1 + $0x6d0] sm:$0xff]  ;;  %v302_v31 = vld [vmem:[%s3621_s1 + $0x7d8] sm:$0xff] }
  0x53   :  { %1717 = vmatpush3.msra.mxu0 %v188_v32  ;;  %1750 = vmatpush3.msra.mxu1 %v221_v33  ;;  %v253_v32 = vld [vmem:[%s3621_s1 + $0x650] sm:$0xff]  ;;  %v286_v33 = vld [vmem:[%s3621_s1 + $0x758] sm:$0xff] }
  0x54   :  { %1718 = vmatprep.subr.mxu0 %v203_v34  ;;  %1751 = vmatprep.subr.mxu1 %v236_v35  ;;  %v268_v34 = vld [vmem:[%s3621_s1 + $0x6c8] sm:$0xff]  ;;  %v301_v35 = vld [vmem:[%s3621_s1 + $0x7d0] sm:$0xff] }
  0x55   :  { %1719 = vmatpush3.msra.mxu0 %v187_v36  ;;  %1752 = vmatpush3.msra.mxu1 %v220_v37  ;;  %v252_v36 = vld [vmem:[%s3621_s1 + $0x648] sm:$0xff]  ;;  %v285_v37 = vld [vmem:[%s3621_s1 + $0x750] sm:$0xff] }
  0x56   :  { %1720 = vmatprep.subr.mxu0 %v202_v38  ;;  %1753 = vmatprep.subr.mxu1 %v235_v39  ;;  %v267_v38 = vld [vmem:[%s3621_s1 + $0x6c0] sm:$0xff]  ;;  %v300_v39 = vld [vmem:[%s3621_s1 + $0x7c8] sm:$0xff] }
  0x57   :  { %1721 = vmatpush3.msra.mxu0 %v186_v40  ;;  %1754 = vmatpush3.msra.mxu1 %v219_v41  ;;  %v251_v40 = vld [vmem:[%s3621_s1 + $0x640] sm:$0xff]  ;;  %v284_v41 = vld [vmem:[%s3621_s1 + $0x748] sm:$0xff] }
  0x58   :  { %1722 = vmatprep.subr.mxu0 %v201_v42  ;;  %1755 = vmatprep.subr.mxu1 %v234_v43  ;;  %v266_v42 = vld [vmem:[%s3621_s1 + $0x6b8] sm:$0xff]  ;;  %v299_v43 = vld [vmem:[%s3621_s1 + $0x7c0] sm:$0xff] }
  0x59   :  { %1723 = vmatpush3.msra.mxu0 %v185_v44  ;;  %1756 = vmatpush3.msra.mxu1 %v218_v45  ;;  %v250_v44 = vld [vmem:[%s3621_s1 + $0x638] sm:$0xff]  ;;  %v283_v45 = vld [vmem:[%s3621_s1 + $0x740] sm:$0xff] }
  0x5a   :  { %1724 = vmatprep.subr.mxu0 %v200_v46  ;;  %1757 = vmatprep.subr.mxu1 %v233_v47  ;;  %v265_v46 = vld [vmem:[%s3621_s1 + $0x6b0] sm:$0xff]  ;;  %v298_v47 = vld [vmem:[%s3621_s1 + $0x7b8] sm:$0xff] }
  0x5b   :  { %1725 = vmatpush3.msra.mxu0 %v184_v48  ;;  %1758 = vmatpush3.msra.mxu1 %v217_v49  ;;  %v249_v48 = vld [vmem:[%s3621_s1 + $0x630] sm:$0xff]  ;;  %v282_v49 = vld [vmem:[%s3621_s1 + $0x738] sm:$0xff] }
  0x5c   :  { %1726 = vmatprep.subr.mxu0 %v199_v50  ;;  %1759 = vmatprep.subr.mxu1 %v232_v51  ;;  %v264_v50 = vld [vmem:[%s3621_s1 + $0x6a8] sm:$0xff]  ;;  %v297_v51 = vld [vmem:[%s3621_s1 + $0x7b0] sm:$0xff] }
  0x5d   :  { %1727 = vmatpush3.msra.mxu0 %v183_v52  ;;  %1760 = vmatpush3.msra.mxu1 %v216_v53  ;;  %v248_v52 = vld [vmem:[%s3621_s1 + $0x628] sm:$0xff]  ;;  %v281_v53 = vld [vmem:[%s3621_s1 + $0x730] sm:$0xff] }
  0x5e   :  { %1728 = vmatprep.subr.mxu0 %v198_v54  ;;  %1761 = vmatprep.subr.mxu1 %v231_v55  ;;  %v263_v54 = vld [vmem:[%s3621_s1 + $0x6a0] sm:$0xff]  ;;  %v296_v55 = vld [vmem:[%s3621_s1 + $0x7a8] sm:$0xff] }
  0x5f   :  { %1729 = vmatpush3.msra.mxu0 %v182_v56  ;;  %1762 = vmatpush3.msra.mxu1 %v215_v57  ;;  %v247_v56 = vld [vmem:[%s3621_s1 + $0x620] sm:$0xff]  ;;  %v280_v57 = vld [vmem:[%s3621_s1 + $0x728] sm:$0xff] }
  0x60   :  { %1730 = vmatprep.subr.mxu0 %v197_v58  ;;  %1763 = vmatprep.subr.mxu1 %v230_v59  ;;  %v262_v58 = vld [vmem:[%s3621_s1 + $0x698] sm:$0xff]  ;;  %v295_v59 = vld [vmem:[%s3621_s1 + $0x7a0] sm:$0xff] }
  0x61   :  { %1731 = vmatpush3.msra.mxu0 %v181_v60  ;;  %1764 = vmatpush3.msra.mxu1 %v214_v61  ;;  %v246_v60 = vld [vmem:[%s3621_s1 + $0x618] sm:$0xff]  ;;  %v279_v61 = vld [vmem:[%s3621_s1 + $0x720] sm:$0xff] }
  0x62   :  { %1732 = vmatprep.subr.mxu0 %v196_v62  ;;  %1765 = vmatprep.subr.mxu1 %v229_v63  ;;  %v261_v62 = vld [vmem:[%s3621_s1 + $0x690] sm:$0xff]  ;;  %v294_v63 = vld [vmem:[%s3621_s1 + $0x798] sm:$0xff] }
  0x63   :  { %1733 = vmatpush3.msra.mxu0 %v180_v0  ;;  %1766 = vmatpush3.msra.mxu1 %v213_v1  ;;  %v245_v0 = vld [vmem:[%s3621_s1 + $0x610] sm:$0xff]  ;;  %v278_v1 = vld [vmem:[%s3621_s1 + $0x718] sm:$0xff] }
  0x64   :  { %1734 = vmatprep.subr.mxu0 %v195_v2  ;;  %1767 = vmatprep.subr.mxu1 %v228_v3  ;;  %v260_v2 = vld [vmem:[%s3621_s1 + $0x688] sm:$0xff]  ;;  %v293_v3 = vld [vmem:[%s3621_s1 + $0x790] sm:$0xff] }
  0x65   :  { %1735 = vmatpush3.msra.mxu0 %v179_v4  ;;  %802 = vmatprep.mubr.f32.mxu0 %v35_v5  ;;  %v244_v4 = vld [vmem:[%s3621_s1 + $0x608] sm:$0xff]  ;;  %v277_v5 = vld [vmem:[%s3621_s1 + $0x710] sm:$0xff] }
  0x66   :  { %1768 = vmatpush3.msra.mxu1 %v212_v6  ;;  %803 = vmatmul.mubr.f32.vlgmr.msra.gmra.mxu0 %v34_v7  ;;  %v259_v6 = vld [vmem:[%s3621_s1 + $0x680] sm:$0xff]  ;;  %v292_v7 = vld [vmem:[%s3621_s1 + $0x788] sm:$0xff] }
  0x67   :  { %1769 = vmatprep.subr.mxu1 %v227_v8  ;;  %1774 = vmatprep.subr.mxu0 %v274_v9  ;;  %v243_v8 = vld [vmem:[%s3621_s1 + $0x600] sm:$0xff]  ;;  %v39_v9 = vld [vmem:[%s3622_s0 + $0x68] sm:$0xff] }
  0x68   :  { %1770 = vmatpush3.msra.mxu1 %v211_v10  ;;  %872 = vmatprep.mubr.f32.mxu1 %v37_v11  ;;  %v276_v10 = vld [vmem:[%s3621_s1 + $0x708] sm:$0xff]  ;;  %v38_v11 = vld [vmem:[%s3622_s0 + $0x60] sm:$0xff] }
  0x69   :  { %1775 = vmatpush3.msra.mxu0 %v258_v12  ;;  %873 = vmatmul.mubr.f32.vlgmr.msra.gmra.mxu1 %v36_v13  ;;  %v291_v12 = vld [vmem:[%s3621_s1 + $0x780] sm:$0xff]  ;;  %v338_v13 = vld [vmem:[%s3621_s1 + $0x8f8] sm:$0xff] }
  0x6a   :  { %1776 = vmatprep.subr.mxu0 %v273_v14  ;;  %1809 = vmatprep.subr.mxu1 %v306_v15  ;;  %v275_v14 = vld [vmem:[%s3621_s1 + $0x700] sm:$0xff]  ;;  %v41_v15 = vld [vmem:[%s3622_s0 + $0x78] sm:$0xff] }
  0x6b   :  { %1777 = vmatpush3.msra.mxu0 %v257_v16  ;;  %1810 = vmatpush3.msra.mxu1 %v290_v17  ;;  %v322_v16 = vld [vmem:[%s3621_s1 + $0x878] sm:$0xff]  ;;  %v40_v17 = vld [vmem:[%s3622_s0 + $0x70] sm:$0xff] }
  0x6c   :  { %1778 = vmatprep.subr.mxu0 %v272_v18  ;;  %1811 = vmatprep.subr.mxu1 %v305_v19  ;;  %v337_v18 = vld [vmem:[%s3621_s1 + $0x8f0] sm:$0xff]  ;;  %v370_v19 = vld [vmem:[%s3621_s1 + $0x9f8] sm:$0xff] }
  0x6d   :  { %1779 = vmatpush3.msra.mxu0 %v256_v20  ;;  %1812 = vmatpush3.msra.mxu1 %v289_v21  ;;  %v321_v20 = vld [vmem:[%s3621_s1 + $0x870] sm:$0xff]  ;;  %v354_v21 = vld [vmem:[%s3621_s1 + $0x978] sm:$0xff] }
  0x6e   :  { %1780 = vmatprep.subr.mxu0 %v271_v22  ;;  %1813 = vmatprep.subr.mxu1 %v304_v23  ;;  %v336_v22 = vld [vmem:[%s3621_s1 + $0x8e8] sm:$0xff]  ;;  %v369_v23 = vld [vmem:[%s3621_s1 + $0x9f0] sm:$0xff] }
  0x6f   :  { %1781 = vmatpush3.msra.mxu0 %v255_v24  ;;  %1814 = vmatpush3.msra.mxu1 %v288_v25  ;;  %v320_v24 = vld [vmem:[%s3621_s1 + $0x868] sm:$0xff]  ;;  %v353_v25 = vld [vmem:[%s3621_s1 + $0x970] sm:$0xff] }
  0x70   :  { %1782 = vmatprep.subr.mxu0 %v270_v26  ;;  %1815 = vmatprep.subr.mxu1 %v303_v27  ;;  %v335_v26 = vld [vmem:[%s3621_s1 + $0x8e0] sm:$0xff]  ;;  %v368_v27 = vld [vmem:[%s3621_s1 + $0x9e8] sm:$0xff] }
  0x71   :  { %1783 = vmatpush3.msra.mxu0 %v254_v28  ;;  %1816 = vmatpush3.msra.mxu1 %v287_v29  ;;  %v319_v28 = vld [vmem:[%s3621_s1 + $0x860] sm:$0xff]  ;;  %v352_v29 = vld [vmem:[%s3621_s1 + $0x968] sm:$0xff] }
  0x72   :  { %1784 = vmatprep.subr.mxu0 %v269_v30  ;;  %1817 = vmatprep.subr.mxu1 %v302_v31  ;;  %v334_v30 = vld [vmem:[%s3621_s1 + $0x8d8] sm:$0xff]  ;;  %v367_v31 = vld [vmem:[%s3621_s1 + $0x9e0] sm:$0xff] }
  0x73   :  { %1785 = vmatpush3.msra.mxu0 %v253_v32  ;;  %1818 = vmatpush3.msra.mxu1 %v286_v33  ;;  %v318_v32 = vld [vmem:[%s3621_s1 + $0x858] sm:$0xff]  ;;  %v351_v33 = vld [vmem:[%s3621_s1 + $0x960] sm:$0xff] }
  0x74   :  { %1786 = vmatprep.subr.mxu0 %v268_v34  ;;  %1819 = vmatprep.subr.mxu1 %v301_v35  ;;  %v333_v34 = vld [vmem:[%s3621_s1 + $0x8d0] sm:$0xff]  ;;  %v366_v35 = vld [vmem:[%s3621_s1 + $0x9d8] sm:$0xff] }
  0x75   :  { %1787 = vmatpush3.msra.mxu0 %v252_v36  ;;  %1820 = vmatpush3.msra.mxu1 %v285_v37  ;;  %v317_v36 = vld [vmem:[%s3621_s1 + $0x850] sm:$0xff]  ;;  %v350_v37 = vld [vmem:[%s3621_s1 + $0x958] sm:$0xff] }
  0x76   :  { %1788 = vmatprep.subr.mxu0 %v267_v38  ;;  %1821 = vmatprep.subr.mxu1 %v300_v39  ;;  %v332_v38 = vld [vmem:[%s3621_s1 + $0x8c8] sm:$0xff]  ;;  %v365_v39 = vld [vmem:[%s3621_s1 + $0x9d0] sm:$0xff] }
  0x77   :  { %1789 = vmatpush3.msra.mxu0 %v251_v40  ;;  %1822 = vmatpush3.msra.mxu1 %v284_v41  ;;  %v316_v40 = vld [vmem:[%s3621_s1 + $0x848] sm:$0xff]  ;;  %v349_v41 = vld [vmem:[%s3621_s1 + $0x950] sm:$0xff] }
  0x78   :  { %1790 = vmatprep.subr.mxu0 %v266_v42  ;;  %1823 = vmatprep.subr.mxu1 %v299_v43  ;;  %v331_v42 = vld [vmem:[%s3621_s1 + $0x8c0] sm:$0xff]  ;;  %v364_v43 = vld [vmem:[%s3621_s1 + $0x9c8] sm:$0xff] }
  0x79   :  { %1791 = vmatpush3.msra.mxu0 %v250_v44  ;;  %1824 = vmatpush3.msra.mxu1 %v283_v45  ;;  %v315_v44 = vld [vmem:[%s3621_s1 + $0x840] sm:$0xff]  ;;  %v348_v45 = vld [vmem:[%s3621_s1 + $0x948] sm:$0xff] }
  0x7a   :  { %1792 = vmatprep.subr.mxu0 %v265_v46  ;;  %1825 = vmatprep.subr.mxu1 %v298_v47  ;;  %v330_v46 = vld [vmem:[%s3621_s1 + $0x8b8] sm:$0xff]  ;;  %v363_v47 = vld [vmem:[%s3621_s1 + $0x9c0] sm:$0xff] }
  0x7b   :  { %1793 = vmatpush3.msra.mxu0 %v249_v48  ;;  %1826 = vmatpush3.msra.mxu1 %v282_v49  ;;  %v314_v48 = vld [vmem:[%s3621_s1 + $0x838] sm:$0xff]  ;;  %v347_v49 = vld [vmem:[%s3621_s1 + $0x940] sm:$0xff] }
  0x7c   :  { %1794 = vmatprep.subr.mxu0 %v264_v50  ;;  %1827 = vmatprep.subr.mxu1 %v297_v51  ;;  %v329_v50 = vld [vmem:[%s3621_s1 + $0x8b0] sm:$0xff]  ;;  %v362_v51 = vld [vmem:[%s3621_s1 + $0x9b8] sm:$0xff] }
  0x7d   :  { %1795 = vmatpush3.msra.mxu0 %v248_v52  ;;  %1828 = vmatpush3.msra.mxu1 %v281_v53  ;;  %v313_v52 = vld [vmem:[%s3621_s1 + $0x830] sm:$0xff]  ;;  %v346_v53 = vld [vmem:[%s3621_s1 + $0x938] sm:$0xff] }
  0x7e   :  { %1796 = vmatprep.subr.mxu0 %v263_v54  ;;  %1829 = vmatprep.subr.mxu1 %v296_v55  ;;  %v328_v54 = vld [vmem:[%s3621_s1 + $0x8a8] sm:$0xff]  ;;  %v361_v55 = vld [vmem:[%s3621_s1 + $0x9b0] sm:$0xff] }
  0x7f   :  { %1797 = vmatpush3.msra.mxu0 %v247_v56  ;;  %1830 = vmatpush3.msra.mxu1 %v280_v57  ;;  %v312_v56 = vld [vmem:[%s3621_s1 + $0x828] sm:$0xff]  ;;  %v345_v57 = vld [vmem:[%s3621_s1 + $0x930] sm:$0xff] }
  0x80   :  { %1798 = vmatprep.subr.mxu0 %v262_v58  ;;  %1831 = vmatprep.subr.mxu1 %v295_v59  ;;  %v327_v58 = vld [vmem:[%s3621_s1 + $0x8a0] sm:$0xff]  ;;  %v360_v59 = vld [vmem:[%s3621_s1 + $0x9a8] sm:$0xff] }
  0x81   :  { %1799 = vmatpush3.msra.mxu0 %v246_v60  ;;  %1832 = vmatpush3.msra.mxu1 %v279_v61  ;;  %v311_v60 = vld [vmem:[%s3621_s1 + $0x820] sm:$0xff]  ;;  %v344_v61 = vld [vmem:[%s3621_s1 + $0x928] sm:$0xff] }
  0x82   :  { %1800 = vmatprep.subr.mxu0 %v261_v62  ;;  %1833 = vmatprep.subr.mxu1 %v294_v63  ;;  %v326_v62 = vld [vmem:[%s3621_s1 + $0x898] sm:$0xff]  ;;  %v359_v63 = vld [vmem:[%s3621_s1 + $0x9a0] sm:$0xff] }
  0x83   :  { %1801 = vmatpush3.msra.mxu0 %v245_v0  ;;  %1834 = vmatpush3.msra.mxu1 %v278_v1  ;;  %v310_v0 = vld [vmem:[%s3621_s1 + $0x818] sm:$0xff]  ;;  %v343_v1 = vld [vmem:[%s3621_s1 + $0x920] sm:$0xff] }
  0x84   :  { %1802 = vmatprep.subr.mxu0 %v260_v2  ;;  %1835 = vmatprep.subr.mxu1 %v293_v3  ;;  %v325_v2 = vld [vmem:[%s3621_s1 + $0x890] sm:$0xff]  ;;  %v358_v3 = vld [vmem:[%s3621_s1 + $0x998] sm:$0xff] }
  0x85   :  { %1803 = vmatpush3.msra.mxu0 %v244_v4  ;;  %1836 = vmatpush3.msra.mxu1 %v277_v5  ;;  %v309_v4 = vld [vmem:[%s3621_s1 + $0x810] sm:$0xff]  ;;  %v342_v5 = vld [vmem:[%s3621_s1 + $0x918] sm:$0xff] }
  0x86   :  { %1804 = vmatprep.subr.mxu0 %v259_v6  ;;  %1837 = vmatprep.subr.mxu1 %v292_v7  ;;  %v324_v6 = vld [vmem:[%s3621_s1 + $0x888] sm:$0xff]  ;;  %v357_v7 = vld [vmem:[%s3621_s1 + $0x990] sm:$0xff] }
  0x87   :  { %1805 = vmatpush3.msra.mxu0 %v243_v8  ;;  %942 = vmatprep.mubr.f32.mxu0 %v39_v9  ;;  %v308_v8 = vld [vmem:[%s3621_s1 + $0x808] sm:$0xff]  ;;  %v341_v9 = vld [vmem:[%s3621_s1 + $0x910] sm:$0xff] }
  0x88   :  { %1838 = vmatpush3.msra.mxu1 %v276_v10  ;;  %943 = vmatmul.mubr.f32.vlgmr.msra.gmra.mxu0 %v38_v11  ;;  %v323_v10 = vld [vmem:[%s3621_s1 + $0x880] sm:$0xff]  ;;  %v356_v11 = vld [vmem:[%s3621_s1 + $0x988] sm:$0xff] }
  0x89   :  { %1839 = vmatprep.subr.mxu1 %v291_v12  ;;  %1844 = vmatprep.subr.mxu0 %v338_v13  ;;  %v307_v12 = vld [vmem:[%s3621_s1 + $0x800] sm:$0xff]  ;;  %v43_v13 = vld [vmem:[%s3622_s0 + $0x88] sm:$0xff] }
  0x8a   :  { %1840 = vmatpush3.msra.mxu1 %v275_v14  ;;  %1012 = vmatprep.mubr.f32.mxu1 %v41_v15  ;;  %v340_v14 = vld [vmem:[%s3621_s1 + $0x908] sm:$0xff]  ;;  %v42_v15 = vld [vmem:[%s3622_s0 + $0x80] sm:$0xff] }
  0x8b   :  { %1845 = vmatpush3.msra.mxu0 %v322_v16  ;;  %1013 = vmatmul.mubr.f32.vlgmr.msra.gmra.mxu1 %v40_v17  ;;  %v355_v16 = vld [vmem:[%s3621_s1 + $0x980] sm:$0xff]  ;;  %v402_v17 = vld [vmem:[%s3621_s1 + $0xaf8] sm:$0xff] }
  0x8c   :  { %1846 = vmatprep.subr.mxu0 %v337_v18  ;;  %1879 = vmatprep.subr.mxu1 %v370_v19  ;;  %v339_v18 = vld [vmem:[%s3621_s1 + $0x900] sm:$0xff]  ;;  %v45_v19 = vld [vmem:[%s3622_s0 + $0x98] sm:$0xff] }
  0x8d   :  { %1847 = vmatpush3.msra.mxu0 %v321_v20  ;;  %1880 = vmatpush3.msra.mxu1 %v354_v21  ;;  %v386_v20 = vld [vmem:[%s3621_s1 + $0xa78] sm:$0xff]  ;;  %v44_v21 = vld [vmem:[%s3622_s0 + $0x90] sm:$0xff] }
  0x8e   :  { %1848 = vmatprep.subr.mxu0 %v336_v22  ;;  %1881 = vmatprep.subr.mxu1 %v369_v23  ;;  %v401_v22 = vld [vmem:[%s3621_s1 + $0xaf0] sm:$0xff]  ;;  %v434_v23 = vld [vmem:[%s3621_s1 + $0xbf8] sm:$0xff] }
  0x8f   :  { %1849 = vmatpush3.msra.mxu0 %v320_v24  ;;  %1882 = vmatpush3.msra.mxu1 %v353_v25  ;;  %v385_v24 = vld [vmem:[%s3621_s1 + $0xa70] sm:$0xff]  ;;  %v418_v25 = vld [vmem:[%s3621_s1 + $0xb78] sm:$0xff] }
  0x90   :  { %1850 = vmatprep.subr.mxu0 %v335_v26  ;;  %1883 = vmatprep.subr.mxu1 %v368_v27  ;;  %v400_v26 = vld [vmem:[%s3621_s1 + $0xae8] sm:$0xff]  ;;  %v433_v27 = vld [vmem:[%s3621_s1 + $0xbf0] sm:$0xff] }
  0x91   :  { %1851 = vmatpush3.msra.mxu0 %v319_v28  ;;  %1884 = vmatpush3.msra.mxu1 %v352_v29  ;;  %v384_v28 = vld [vmem:[%s3621_s1 + $0xa68] sm:$0xff]  ;;  %v417_v29 = vld [vmem:[%s3621_s1 + $0xb70] sm:$0xff] }
  0x92   :  { %1852 = vmatprep.subr.mxu0 %v334_v30  ;;  %1885 = vmatprep.subr.mxu1 %v367_v31  ;;  %v399_v30 = vld [vmem:[%s3621_s1 + $0xae0] sm:$0xff]  ;;  %v432_v31 = vld [vmem:[%s3621_s1 + $0xbe8] sm:$0xff] }
  0x93   :  { %1853 = vmatpush3.msra.mxu0 %v318_v32  ;;  %1886 = vmatpush3.msra.mxu1 %v351_v33  ;;  %v383_v32 = vld [vmem:[%s3621_s1 + $0xa60] sm:$0xff]  ;;  %v416_v33 = vld [vmem:[%s3621_s1 + $0xb68] sm:$0xff] }
  0x94   :  { %1854 = vmatprep.subr.mxu0 %v333_v34  ;;  %1887 = vmatprep.subr.mxu1 %v366_v35  ;;  %v398_v34 = vld [vmem:[%s3621_s1 + $0xad8] sm:$0xff]  ;;  %v431_v35 = vld [vmem:[%s3621_s1 + $0xbe0] sm:$0xff] }
  0x95   :  { %1855 = vmatpush3.msra.mxu0 %v317_v36  ;;  %1888 = vmatpush3.msra.mxu1 %v350_v37  ;;  %v382_v36 = vld [vmem:[%s3621_s1 + $0xa58] sm:$0xff]  ;;  %v415_v37 = vld [vmem:[%s3621_s1 + $0xb60] sm:$0xff] }
  0x96   :  { %1856 = vmatprep.subr.mxu0 %v332_v38  ;;  %1889 = vmatprep.subr.mxu1 %v365_v39  ;;  %v397_v38 = vld [vmem:[%s3621_s1 + $0xad0] sm:$0xff]  ;;  %v430_v39 = vld [vmem:[%s3621_s1 + $0xbd8] sm:$0xff] }
  0x97   :  { %1857 = vmatpush3.msra.mxu0 %v316_v40  ;;  %1890 = vmatpush3.msra.mxu1 %v349_v41  ;;  %v381_v40 = vld [vmem:[%s3621_s1 + $0xa50] sm:$0xff]  ;;  %v414_v41 = vld [vmem:[%s3621_s1 + $0xb58] sm:$0xff] }
  0x98   :  { %1858 = vmatprep.subr.mxu0 %v331_v42  ;;  %1891 = vmatprep.subr.mxu1 %v364_v43  ;;  %v396_v42 = vld [vmem:[%s3621_s1 + $0xac8] sm:$0xff]  ;;  %v429_v43 = vld [vmem:[%s3621_s1 + $0xbd0] sm:$0xff] }
  0x99   :  { %1859 = vmatpush3.msra.mxu0 %v315_v44  ;;  %1892 = vmatpush3.msra.mxu1 %v348_v45  ;;  %v380_v44 = vld [vmem:[%s3621_s1 + $0xa48] sm:$0xff]  ;;  %v413_v45 = vld [vmem:[%s3621_s1 + $0xb50] sm:$0xff] }
  0x9a   :  { %1860 = vmatprep.subr.mxu0 %v330_v46  ;;  %1893 = vmatprep.subr.mxu1 %v363_v47  ;;  %v395_v46 = vld [vmem:[%s3621_s1 + $0xac0] sm:$0xff]  ;;  %v428_v47 = vld [vmem:[%s3621_s1 + $0xbc8] sm:$0xff] }
  0x9b   :  { %1861 = vmatpush3.msra.mxu0 %v314_v48  ;;  %1894 = vmatpush3.msra.mxu1 %v347_v49  ;;  %v379_v48 = vld [vmem:[%s3621_s1 + $0xa40] sm:$0xff]  ;;  %v412_v49 = vld [vmem:[%s3621_s1 + $0xb48] sm:$0xff] }
  0x9c   :  { %1862 = vmatprep.subr.mxu0 %v329_v50  ;;  %1895 = vmatprep.subr.mxu1 %v362_v51  ;;  %v394_v50 = vld [vmem:[%s3621_s1 + $0xab8] sm:$0xff]  ;;  %v427_v51 = vld [vmem:[%s3621_s1 + $0xbc0] sm:$0xff] }
  0x9d   :  { %1863 = vmatpush3.msra.mxu0 %v313_v52  ;;  %1896 = vmatpush3.msra.mxu1 %v346_v53  ;;  %v378_v52 = vld [vmem:[%s3621_s1 + $0xa38] sm:$0xff]  ;;  %v411_v53 = vld [vmem:[%s3621_s1 + $0xb40] sm:$0xff] }
  0x9e   :  { %1864 = vmatprep.subr.mxu0 %v328_v54  ;;  %1897 = vmatprep.subr.mxu1 %v361_v55  ;;  %v393_v54 = vld [vmem:[%s3621_s1 + $0xab0] sm:$0xff]  ;;  %v426_v55 = vld [vmem:[%s3621_s1 + $0xbb8] sm:$0xff] }
  0x9f   :  { %1865 = vmatpush3.msra.mxu0 %v312_v56  ;;  %1898 = vmatpush3.msra.mxu1 %v345_v57  ;;  %v377_v56 = vld [vmem:[%s3621_s1 + $0xa30] sm:$0xff]  ;;  %v410_v57 = vld [vmem:[%s3621_s1 + $0xb38] sm:$0xff] }
  0xa0   :  { %1866 = vmatprep.subr.mxu0 %v327_v58  ;;  %1899 = vmatprep.subr.mxu1 %v360_v59  ;;  %v392_v58 = vld [vmem:[%s3621_s1 + $0xaa8] sm:$0xff]  ;;  %v425_v59 = vld [vmem:[%s3621_s1 + $0xbb0] sm:$0xff] }
  0xa1   :  { %1867 = vmatpush3.msra.mxu0 %v311_v60  ;;  %1900 = vmatpush3.msra.mxu1 %v344_v61  ;;  %v376_v60 = vld [vmem:[%s3621_s1 + $0xa28] sm:$0xff]  ;;  %v409_v61 = vld [vmem:[%s3621_s1 + $0xb30] sm:$0xff] }
  0xa2   :  { %1868 = vmatprep.subr.mxu0 %v326_v62  ;;  %1901 = vmatprep.subr.mxu1 %v359_v63  ;;  %v391_v62 = vld [vmem:[%s3621_s1 + $0xaa0] sm:$0xff]  ;;  %v424_v63 = vld [vmem:[%s3621_s1 + $0xba8] sm:$0xff] }
  0xa3   :  { %1869 = vmatpush3.msra.mxu0 %v310_v0  ;;  %1902 = vmatpush3.msra.mxu1 %v343_v1  ;;  %v375_v0 = vld [vmem:[%s3621_s1 + $0xa20] sm:$0xff]  ;;  %v408_v1 = vld [vmem:[%s3621_s1 + $0xb28] sm:$0xff] }
  0xa4   :  { %1870 = vmatprep.subr.mxu0 %v325_v2  ;;  %1903 = vmatprep.subr.mxu1 %v358_v3  ;;  %v390_v2 = vld [vmem:[%s3621_s1 + $0xa98] sm:$0xff]  ;;  %v423_v3 = vld [vmem:[%s3621_s1 + $0xba0] sm:$0xff] }
  0xa5   :  { %1871 = vmatpush3.msra.mxu0 %v309_v4  ;;  %1904 = vmatpush3.msra.mxu1 %v342_v5  ;;  %v374_v4 = vld [vmem:[%s3621_s1 + $0xa18] sm:$0xff]  ;;  %v407_v5 = vld [vmem:[%s3621_s1 + $0xb20] sm:$0xff] }
  0xa6   :  { %1872 = vmatprep.subr.mxu0 %v324_v6  ;;  %1905 = vmatprep.subr.mxu1 %v357_v7  ;;  %v389_v6 = vld [vmem:[%s3621_s1 + $0xa90] sm:$0xff]  ;;  %v422_v7 = vld [vmem:[%s3621_s1 + $0xb98] sm:$0xff] }
  0xa7   :  { %1873 = vmatpush3.msra.mxu0 %v308_v8  ;;  %1906 = vmatpush3.msra.mxu1 %v341_v9  ;;  %v373_v8 = vld [vmem:[%s3621_s1 + $0xa10] sm:$0xff]  ;;  %v406_v9 = vld [vmem:[%s3621_s1 + $0xb18] sm:$0xff] }
  0xa8   :  { %1874 = vmatprep.subr.mxu0 %v323_v10  ;;  %1907 = vmatprep.subr.mxu1 %v356_v11  ;;  %v388_v10 = vld [vmem:[%s3621_s1 + $0xa88] sm:$0xff]  ;;  %v421_v11 = vld [vmem:[%s3621_s1 + $0xb90] sm:$0xff] }
  0xa9   :  { %1875 = vmatpush3.msra.mxu0 %v307_v12  ;;  %1082 = vmatprep.mubr.f32.mxu0 %v43_v13  ;;  %v372_v12 = vld [vmem:[%s3621_s1 + $0xa08] sm:$0xff]  ;;  %v405_v13 = vld [vmem:[%s3621_s1 + $0xb10] sm:$0xff] }
  0xaa   :  { %1908 = vmatpush3.msra.mxu1 %v340_v14  ;;  %1083 = vmatmul.mubr.f32.vlgmr.msra.gmra.mxu0 %v42_v15  ;;  %v387_v14 = vld [vmem:[%s3621_s1 + $0xa80] sm:$0xff]  ;;  %v420_v15 = vld [vmem:[%s3621_s1 + $0xb88] sm:$0xff] }
  0xab   :  { %1909 = vmatprep.subr.mxu1 %v355_v16  ;;  %1914 = vmatprep.subr.mxu0 %v402_v17  ;;  %v371_v16 = vld [vmem:[%s3621_s1 + $0xa00] sm:$0xff]  ;;  %v47_v17 = vld [vmem:[%s3622_s0 + $0xa8] sm:$0xff] }
  0xac   :  { %1910 = vmatpush3.msra.mxu1 %v339_v18  ;;  %1152 = vmatprep.mubr.f32.mxu1 %v45_v19  ;;  %v404_v18 = vld [vmem:[%s3621_s1 + $0xb08] sm:$0xff]  ;;  %v46_v19 = vld [vmem:[%s3622_s0 + $0xa0] sm:$0xff] }
  0xad   :  { %1915 = vmatpush3.msra.mxu0 %v386_v20  ;;  %1153 = vmatmul.mubr.f32.vlgmr.msra.gmra.mxu1 %v44_v21  ;;  %v419_v20 = vld [vmem:[%s3621_s1 + $0xb80] sm:$0xff] }
  0xae   :  { %1916 = vmatprep.subr.mxu0 %v401_v22  ;;  %1949 = vmatprep.subr.mxu1 %v434_v23  ;;  %v403_v21 = vld [vmem:[%s3621_s1 + $0xb00] sm:$0xff]  ;;  %v49_v22 = vld [vmem:[%s3622_s0 + $0xb8] sm:$0xff] }
  0xaf   :  { %1917 = vmatpush3.msra.mxu0 %v385_v24  ;;  %1950 = vmatpush3.msra.mxu1 %v418_v25  ;;  %v450_v23 = vld [vmem:[%s3621_s1 + $0xc78] sm:$0xff]  ;;  %v48_v24 = vld [vmem:[%s3622_s0 + $0xb0] sm:$0xff]  ;;  %v2142_v25 = vmov 0.0  }
  0xb0   :  { %1918 = vmatprep.subr.mxu0 %v400_v26  ;;  %1951 = vmatprep.subr.mxu1 %v433_v27  ;;  %v449_v26 = vld [vmem:[%s3621_s1 + $0xc70] sm:$0xff]  ;;  %v448_v27 = vld [vmem:[%s3621_s1 + $0xc68] sm:$0xff] }
  0xb1   :  { %1919 = vmatpush3.msra.mxu0 %v384_v28  ;;  %1952 = vmatpush3.msra.mxu1 %v417_v29  ;;  %v447_v28 = vld [vmem:[%s3621_s1 + $0xc60] sm:$0xff]  ;;  %v446_v29 = vld [vmem:[%s3621_s1 + $0xc58] sm:$0xff] }
  0xb2   :  { %1920 = vmatprep.subr.mxu0 %v399_v30  ;;  %1953 = vmatprep.subr.mxu1 %v432_v31  ;;  %v445_v30 = vld [vmem:[%s3621_s1 + $0xc50] sm:$0xff]  ;;  %v444_v31 = vld [vmem:[%s3621_s1 + $0xc48] sm:$0xff] }
  0xb3   :  { %1921 = vmatpush3.msra.mxu0 %v383_v32  ;;  %1954 = vmatpush3.msra.mxu1 %v416_v33  ;;  %v443_v32 = vld [vmem:[%s3621_s1 + $0xc40] sm:$0xff]  ;;  %v442_v33 = vld [vmem:[%s3621_s1 + $0xc38] sm:$0xff] }
  0xb4   :  { %1922 = vmatprep.subr.mxu0 %v398_v34  ;;  %1955 = vmatprep.subr.mxu1 %v431_v35  ;;  %v441_v34 = vld [vmem:[%s3621_s1 + $0xc30] sm:$0xff]  ;;  %v440_v35 = vld [vmem:[%s3621_s1 + $0xc28] sm:$0xff] }
  0xb5   :  { %1923 = vmatpush3.msra.mxu0 %v382_v36  ;;  %1956 = vmatpush3.msra.mxu1 %v415_v37  ;;  %v439_v36 = vld [vmem:[%s3621_s1 + $0xc20] sm:$0xff]  ;;  %v438_v37 = vld [vmem:[%s3621_s1 + $0xc18] sm:$0xff] }
  0xb6   :  { %1924 = vmatprep.subr.mxu0 %v397_v38  ;;  %1957 = vmatprep.subr.mxu1 %v430_v39  ;;  %v437_v38 = vld [vmem:[%s3621_s1 + $0xc10] sm:$0xff]  ;;  %v436_v39 = vld [vmem:[%s3621_s1 + $0xc08] sm:$0xff] }
  0xb7   :  { %1925 = vmatpush3.msra.mxu0 %v381_v40  ;;  %1958 = vmatpush3.msra.mxu1 %v414_v41  ;;  %v435_v40 = vld [vmem:[%s3621_s1 + $0xc00] sm:$0xff] }
  0xb8   :  { %1926 = vmatprep.subr.mxu0 %v396_v42  ;;  %1959 = vmatprep.subr.mxu1 %v429_v43  ;;  %v50_v41 = vld [vmem:[%s3622_s0 + $0xc0] sm:$0xff]  ;;  %v1384_v42 = vld [vmem:[%s3623_s3 + $0x78] sm:$0xff]  ;;  %v1383_v43 = vld [vmem:[%s3623_s3 + $0x70] sm:$0xff] }
  0xb9   :  { %1927 = vmatpush3.msra.mxu0 %v380_v44  ;;  %1960 = vmatpush3.msra.mxu1 %v413_v45  ;;  %v1382_v44 = vld [vmem:[%s3623_s3 + $0x68] sm:$0xff]  ;;  %v1381_v45 = vld [vmem:[%s3623_s3 + $0x60] sm:$0xff] }
  0xba   :  { %1928 = vmatprep.subr.mxu0 %v395_v46  ;;  %1961 = vmatprep.subr.mxu1 %v428_v47  ;;  %v1380_v46 = vld [vmem:[%s3623_s3 + $0x58] sm:$0xff]  ;;  %v1379_v47 = vld [vmem:[%s3623_s3 + $0x50] sm:$0xff] }
  0xbb   :  { %1929 = vmatpush3.msra.mxu0 %v379_v48  ;;  %1962 = vmatpush3.msra.mxu1 %v412_v49  ;;  %v1378_v48 = vld [vmem:[%s3623_s3 + $0x48] sm:$0xff]  ;;  %v1377_v49 = vld [vmem:[%s3623_s3 + $0x40] sm:$0xff] }
  0xbc   :  { %1930 = vmatprep.subr.mxu0 %v394_v50  ;;  %1963 = vmatprep.subr.mxu1 %v427_v51  ;;  %v1376_v50 = vld [vmem:[%s3623_s3 + $0x38] sm:$0xff]  ;;  %v1375_v51 = vld [vmem:[%s3623_s3 + $0x30] sm:$0xff] }
  0xbd   :  { %1931 = vmatpush3.msra.mxu0 %v378_v52  ;;  %1964 = vmatpush3.msra.mxu1 %v411_v53  ;;  %v1374_v52 = vld [vmem:[%s3623_s3 + $0x28] sm:$0xff]  ;;  %v1373_v53 = vld [vmem:[%s3623_s3 + $0x20] sm:$0xff] }
  0xbe   :  { %1932 = vmatprep.subr.mxu0 %v393_v54  ;;  %1965 = vmatprep.subr.mxu1 %v426_v55  ;;  %v1372_v54 = vld [vmem:[%s3623_s3 + $0x18] sm:$0xff]  ;;  %v1371_v55 = vld [vmem:[%s3623_s3 + $0x10] sm:$0xff] }
  0xbf   :  { %1933 = vmatpush3.msra.mxu0 %v377_v56  ;;  %1966 = vmatpush3.msra.mxu1 %v410_v57  ;;  %v1370_v56 = vld [vmem:[%s3623_s3 + $0x8] sm:$0xff]  ;;  %v1369_v57 = vld [vmem:[%s3623_s3] sm:$0xff] }
  0xc0   :  { %1934 = vmatprep.subr.mxu0 %v392_v58  ;;  %1967 = vmatprep.subr.mxu1 %v425_v59  ;;  %v1478_v58 = vld [vmem:[%s3624_s5 + $0x78] sm:$0xff]  ;;  %v1477_v59 = vld [vmem:[%s3624_s5 + $0x70] sm:$0xff] }
  0xc1   :  { %1935 = vmatpush3.msra.mxu0 %v376_v60  ;;  %1968 = vmatpush3.msra.mxu1 %v409_v61  ;;  %v1476_v60 = vld [vmem:[%s3624_s5 + $0x68] sm:$0xff]  ;;  %v1475_v61 = vld [vmem:[%s3624_s5 + $0x60] sm:$0xff] }
  0xc2   :  { %1936 = vmatprep.subr.mxu0 %v391_v62  ;;  %1969 = vmatprep.subr.mxu1 %v424_v63  ;;  %v1474_v62 = vld [vmem:[%s3624_s5 + $0x58] sm:$0xff]  ;;  %v1473_v63 = vld [vmem:[%s3624_s5 + $0x50] sm:$0xff] }
  0xc3   :  { %1937 = vmatpush3.msra.mxu0 %v375_v0  ;;  %1970 = vmatpush3.msra.mxu1 %v408_v1  ;;  %v1472_v0 = vld [vmem:[%s3624_s5 + $0x48] sm:$0xff]  ;;  %v1471_v1 = vld [vmem:[%s3624_s5 + $0x40] sm:$0xff] }
  0xc4   :  { %1938 = vmatprep.subr.mxu0 %v390_v2  ;;  %1971 = vmatprep.subr.mxu1 %v423_v3  ;;  %v1470_v2 = vld [vmem:[%s3624_s5 + $0x38] sm:$0xff]  ;;  %v1469_v3 = vld [vmem:[%s3624_s5 + $0x30] sm:$0xff] }
  0xc5   :  { %1939 = vmatpush3.msra.mxu0 %v374_v4  ;;  %1972 = vmatpush3.msra.mxu1 %v407_v5  ;;  %v1468_v4 = vld [vmem:[%s3624_s5 + $0x28] sm:$0xff]  ;;  %v1467_v5 = vld [vmem:[%s3624_s5 + $0x20] sm:$0xff] }
  0xc6   :  { %1940 = vmatprep.subr.mxu0 %v389_v6  ;;  %1973 = vmatprep.subr.mxu1 %v422_v7  ;;  %v1466_v6 = vld [vmem:[%s3624_s5 + $0x18] sm:$0xff] }
  0xc7   :  { %1941 = vmatpush3.msra.mxu0 %v373_v8  ;;  %1974 = vmatpush3.msra.mxu1 %v406_v9 }
  0xc8   :  { %1942 = vmatprep.subr.mxu0 %v388_v10  ;;  %1975 = vmatprep.subr.mxu1 %v421_v11 }
  0xc9   :  { %1943 = vmatpush3.msra.mxu0 %v372_v12  ;;  %1976 = vmatpush3.msra.mxu1 %v405_v13  ;;  %v1561_v12 = vld [vmem:[%s3625_s2] ss:$0 sm:$0xff] }
  0xca   :  { %1944 = vmatprep.subr.mxu0 %v387_v14  ;;  %1977 = vmatprep.subr.mxu1 %v420_v15 }
  0xcb   :  { %1945 = vmatpush3.msra.mxu0 %v371_v16  ;;  %1222 = vmatprep.mubr.f32.mxu0 %v47_v17 }
  0xcc   :  { %1978 = vmatpush3.msra.mxu1 %v404_v18  ;;  %1223 = vmatmul.mubr.f32.vlgmr.msra.gmra.mxu0 %v46_v19 }
  0xcd   :  { %1979 = vmatprep.subr.mxu1 %v419_v20  ;;  %2035 = vmatprep.subr.mxu0 %v2142_v25 }
  0xce   :  { %1980 = vmatpush3.msra.mxu1 %v403_v21  ;;  %1292 = vmatprep.mubr.f32.mxu1 %v49_v22 }
  0xcf   :  { %2036 = vmatpush3.msra.mxu0 %v450_v23  ;;  %1293 = vmatmul.mubr.f32.vlgmr.msra.gmra.mxu1 %v48_v24 }
  0xd0   :  { %2037 = vmatprep.subr.mxu0 %v2142_v25  ;;  %2067 = vmatprep.mubr.msk.f32.mxu0 %vm2143_vm0, %v2142_v25 }
  0xd1   :  { %2038 = vmatpush3.msra.mxu0 %v449_v26  ;;  %2070 = vmatprep.subr.mxu1 %v2142_v25 }
  0xd2   :  { %2039 = vmatprep.subr.mxu0 %v2142_v25  ;;  %2102 = vmatprep.mubr.msk.f32.mxu1 %vm2143_vm0, %v2142_v25 }
  0xd3   :  { %2040 = vmatpush3.msra.mxu0 %v448_v27  ;;  %2071 = vmatpush3.msra.mxu1 %v1384_v42 }
  0xd4   :  { %2041 = vmatprep.subr.mxu0 %v2142_v25  ;;  %2072 = vmatprep.subr.mxu1 %v2142_v25 }
  0xd5   :  { %2042 = vmatpush3.msra.mxu0 %v447_v28  ;;  %2073 = vmatpush3.msra.mxu1 %v1383_v43 }
  0xd6   :  { %2043 = vmatprep.subr.mxu0 %v2142_v25  ;;  %2074 = vmatprep.subr.mxu1 %v2142_v25 }
  0xd7   :  { %2044 = vmatpush3.msra.mxu0 %v446_v29  ;;  %2075 = vmatpush3.msra.mxu1 %v1382_v44 }
  0xd8   :  { %2045 = vmatprep.subr.mxu0 %v2142_v25  ;;  %2076 = vmatprep.subr.mxu1 %v2142_v25 }
  0xd9   :  { %2046 = vmatpush3.msra.mxu0 %v445_v30  ;;  %2077 = vmatpush3.msra.mxu1 %v1381_v45 }
  0xda   :  { %2047 = vmatprep.subr.mxu0 %v2142_v25  ;;  %2078 = vmatprep.subr.mxu1 %v2142_v25 }
  0xdb   :  { %2048 = vmatpush3.msra.mxu0 %v444_v31  ;;  %2079 = vmatpush3.msra.mxu1 %v1380_v46 }
  0xdc   :  { %2049 = vmatprep.subr.mxu0 %v2142_v25  ;;  %2080 = vmatprep.subr.mxu1 %v2142_v25 }
  0xdd   :  { %2050 = vmatpush3.msra.mxu0 %v443_v32  ;;  %2081 = vmatpush3.msra.mxu1 %v1379_v47 }
  0xde   :  { %2051 = vmatprep.subr.mxu0 %v2142_v25  ;;  %2082 = vmatprep.subr.mxu1 %v2142_v25 }
  0xdf   :  { %2052 = vmatpush3.msra.mxu0 %v442_v33  ;;  %2083 = vmatpush3.msra.mxu1 %v1378_v48 }
  0xe0   :  { %2053 = vmatprep.subr.mxu0 %v2142_v25  ;;  %2084 = vmatprep.subr.mxu1 %v2142_v25 }
  0xe1   :  { %2054 = vmatpush3.msra.mxu0 %v441_v34  ;;  %2085 = vmatpush3.msra.mxu1 %v1377_v49 }
  0xe2   :  { %2055 = vmatprep.subr.mxu0 %v2142_v25  ;;  %2086 = vmatprep.subr.mxu1 %v2142_v25  ;;  %v1596_v7 = vpop.f32.mrf.mxu0 }
  0xe3   :  { %2056 = vmatpush3.msra.mxu0 %v440_v35  ;;  %2087 = vmatpush3.msra.mxu1 %v1376_v50 }
  0xe4   :  { %2057 = vmatprep.subr.mxu0 %v2142_v25  ;;  %2088 = vmatprep.subr.mxu1 %v2142_v25  ;;  %v1597_v8 = vpop.f32.mrf.mxu0 }
  0xe5   :  { %2058 = vmatpush3.msra.mxu0 %v439_v36  ;;  %2089 = vmatpush3.msra.mxu1 %v1375_v51  ;;  %v1631_v9 = vpop.f32.mrf.mxu1  ;;  %v1598_v11 = vadd.f32 %v1597_v8, %v1596_v7 }
  0xe6   :  { %2059 = vmatprep.subr.mxu0 %v2142_v25  ;;  %2090 = vmatprep.subr.mxu1 %v2142_v25 }
  0xe7   :  { %2060 = vmatpush3.msra.mxu0 %v438_v37  ;;  %2091 = vmatpush3.msra.mxu1 %v1374_v52  ;;  %v1632_v13 = vpop.f32.mrf.mxu1  ;;  %v525_v16 = vadd.f32 %v1598_v11, %v1561_v12 }
  0xe8   :  { %2061 = vmatprep.subr.mxu0 %v2142_v25  ;;  %2092 = vmatprep.subr.mxu1 %v2142_v25  ;;  %v1633_v17 = vadd.f32 %v1632_v13, %v1631_v9 }
  0xe9   :  { %2062 = vmatpush3.msra.mxu0 %v437_v38  ;;  %2093 = vmatpush3.msra.mxu1 %v1373_v53 }
  0xea   :  { %2063 = vmatprep.subr.mxu0 %v2142_v25  ;;  %2094 = vmatprep.subr.mxu1 %v2142_v25  ;;  %v595_v21 = vadd.f32 %v1633_v17, %v525_v16 }
  0xeb   :  { %2064 = vmatpush3.msra.mxu0 %v436_v39  ;;  %2095 = vmatpush3.msra.mxu1 %v1372_v54 }
  0xec   :  { %2065 = vmatprep.subr.mxu0 %v2142_v25  ;;  %2096 = vmatprep.subr.mxu1 %v2142_v25 }
  0xed   :  { %2066 = vmatpush3.msra.mxu0 %v435_v40  ;;  %2097 = vmatpush3.msra.mxu1 %v1371_v55 }
  0xee   :  { %2068 = vmatmul.mubr.f32.vlgmr.msra.gmra.mxu0 %v50_v41  ;;  %2105 = vmatprep.subr.mxu0 %v2142_v25 }
  0xef   :  { %2137 = vmatprep.mubr.msk.f32.mxu0 %vm2143_vm0, %v2142_v25  ;;  %2098 = vmatprep.subr.mxu1 %v2142_v25 }
  0xf0   :  { %2099 = vmatpush3.msra.mxu1 %v1370_v56  ;;  %2106 = vmatpush3.msra.mxu0 %v1478_v58 }
  0xf1   :  { %2100 = vmatprep.subr.mxu1 %v2142_v25  ;;  %2107 = vmatprep.subr.mxu0 %v2142_v25 }
  0xf2   :  { %2101 = vmatpush3.msra.mxu1 %v1369_v57  ;;  %2108 = vmatpush3.msra.mxu0 %v1477_v59 }
  0xf3   :  { %2109 = vmatprep.subr.mxu0 %v2142_v25 }
  0xf4   :  { %2110 = vmatpush3.msra.mxu0 %v1476_v60 }
  0xf5   :  { %2111 = vmatprep.subr.mxu0 %v2142_v25 }
  0xf6   :  { %2112 = vmatpush3.msra.mxu0 %v1475_v61  ;;  %v1465_v61 = vld [vmem:[%s3624_s5 + $0x10] sm:$0xff] }
  0xf7   :  { %2113 = vmatprep.subr.mxu0 %v2142_v25 }
  0xf8   :  { %2114 = vmatpush3.msra.mxu0 %v1474_v62  ;;  %v1464_v62 = vld [vmem:[%s3624_s5 + $0x8] sm:$0xff] }
  0xf9   :  { %2115 = vmatprep.subr.mxu0 %v2142_v25 }
  0xfa   :  { %2116 = vmatpush3.msra.mxu0 %v1473_v63  ;;  %v1463_v63 = vld [vmem:[%s3624_s5] sm:$0xff] }
  0xfb   :  { %2117 = vmatprep.subr.mxu0 %v2142_v25 }
  0xfc   :  { %2118 = vmatpush3.msra.mxu0 %v1472_v0  ;;  %v1562_v0 = vld [vmem:[%s3626_s4] ss:$0 sm:$0xff] }
  0xfd   :  { %2119 = vmatprep.subr.mxu0 %v2142_v25 }
  0xfe   :  { %2120 = vmatpush3.msra.mxu0 %v1471_v1 }
  0xff   :  { %2121 = vmatprep.subr.mxu0 %v2142_v25 }
 0x100   :  { %2122 = vmatpush3.msra.mxu0 %v1470_v2 }
 0x101   :  { %2123 = vmatprep.subr.mxu0 %v2142_v25 }
 0x102   :  { %2124 = vmatpush3.msra.mxu0 %v1469_v3 }
 0x103   :  { %2125 = vmatprep.subr.mxu0 %v2142_v25 }
 0x104   :  { %2126 = vmatpush3.msra.mxu0 %v1468_v4  ;;  %v1666_v10 = vpop.f32.mrf.mxu0 }
 0x105   :  { %2127 = vmatprep.subr.mxu0 %v2142_v25 }
 0x106   :  { %2128 = vmatpush3.msra.mxu0 %v1467_v5  ;;  %v1667_v14 = vpop.f32.mrf.mxu0  ;;  %v1563_v5 = vld [vmem:[%s3627_s6] ss:$0 sm:$0xff] }
 0x107   :  { %2129 = vmatprep.subr.mxu0 %v2142_v25  ;;  %v1701_v15 = vpop.f32.mrf.mxu1  ;;  %v1668_v19 = vadd.f32 %v1667_v14, %v1666_v10 }
 0x108   :  { %2130 = vmatpush3.msra.mxu0 %v1466_v6 }
 0x109   :  { %2131 = vmatprep.subr.mxu0 %v2142_v25  ;;  %v1702_v20 = vpop.f32.mrf.mxu1  ;;  %v665_v24 = vadd.f32 %v1668_v19, %v595_v21 }
 0x10a   :  { %v1703_v26 = vadd.f32 %v1702_v20, %v1701_v15  ;;  %2132 = vmatpush3.msra.mxu0 %v1465_v61 }
 0x10b   :  { %2133 = vmatprep.subr.mxu0 %v2142_v25 }
 0x10c   :  { %v735_v30 = vadd.f32 %v1703_v26, %v665_v24  ;;  %2134 = vmatpush3.msra.mxu0 %v1464_v62 }
 0x10d   :  { %2135 = vmatprep.subr.mxu0 %v2142_v25 }
 0x10e   :  { %2136 = vmatpush3.msra.mxu0 %v1463_v63 }
 0x126   :  { %v1736_v18 = vpop.f32.mrf.mxu0 }
 0x128   :  { %v1737_v22 = vpop.f32.mrf.mxu0 }
 0x129   :  { %v1771_v23 = vpop.f32.mrf.mxu1  ;;  %v1738_v28 = vadd.f32 %v1737_v22, %v1736_v18 }
 0x12b   :  { %v1772_v29 = vpop.f32.mrf.mxu1  ;;  %v805_v33 = vadd.f32 %v1738_v28, %v735_v30 }
 0x12c   :  { %v1773_v34 = vadd.f32 %v1772_v29, %v1771_v23 }
 0x12e   :  { %v875_v38 = vadd.f32 %v1773_v34, %v805_v33 }
 0x148   :  { %v1806_v27 = vpop.f32.mrf.mxu0 }
 0x14a   :  { %v1807_v31 = vpop.f32.mrf.mxu0 }
 0x14b   :  { %v1841_v32 = vpop.f32.mrf.mxu1  ;;  %v1808_v36 = vadd.f32 %v1807_v31, %v1806_v27 }
 0x14d   :  { %v1842_v37 = vpop.f32.mrf.mxu1  ;;  %v945_v41 = vadd.f32 %v1808_v36, %v875_v38 }
 0x14e   :  { %v1843_v42 = vadd.f32 %v1842_v37, %v1841_v32 }
 0x150   :  { %v1015_v46 = vadd.f32 %v1843_v42, %v945_v41 }
 0x16a   :  { %v1876_v35 = vpop.f32.mrf.mxu0 }
 0x16c   :  { %v1877_v39 = vpop.f32.mrf.mxu0 }
 0x16d   :  { %v1911_v40 = vpop.f32.mrf.mxu1  ;;  %v1878_v44 = vadd.f32 %v1877_v39, %v1876_v35 }
 0x16f   :  { %v1912_v45 = vpop.f32.mrf.mxu1  ;;  %v1085_v49 = vadd.f32 %v1878_v44, %v1015_v46 }
 0x170   :  { %v1913_v50 = vadd.f32 %v1912_v45, %v1911_v40 }
 0x172   :  { %v1155_v53 = vadd.f32 %v1913_v50, %v1085_v49 }
 0x18c   :  { %v1946_v43 = vpop.f32.mrf.mxu0 }
 0x18e   :  { %v1947_v47 = vpop.f32.mrf.mxu0 }
 0x18f   :  { %v1981_v48 = vpop.f32.mrf.mxu1  ;;  %v1948_v51 = vadd.f32 %v1947_v47, %v1946_v43 }
 0x191   :  { %v1982_v52 = vpop.f32.mrf.mxu1  ;;  %v1225_v54 = vadd.f32 %v1948_v51, %v1155_v53 }
 0x192   :  { %v1983_v55 = vadd.f32 %v1982_v52, %v1981_v48 }
 0x194   :  { %v1295_v56 = vadd.f32 %v1983_v55, %v1225_v54 }
 0x1ae   :  { %v1364_v57 = vpop.f32.mrf.mxu0 }
 0x1af   :  { %v1365_v58 = vadd.f32 %v1364_v57, %v1295_v56 }
 0x1b0   :  { %v2069_v59 = vpop.f32.mrf.mxu0 }
 0x1b1   :  { %v1368_v60 = vmax.f32 %v1365_v58, 0.0 }
 0x1b3   :  { %2103 = vmatmul.mubr.f32.vlgmr.msra.gmra.mxu1 %v1368_v60 }
 0x273   :  { %v1458_v1 = vpop.f32.mrf.mxu1 }
 0x274   :  { %v1459_v2 = vadd.f32 %v1562_v0, %v1458_v1 }
 0x275   :  { %v2104_v3 = vpop.f32.mrf.mxu1 }
 0x276   :  { %v1462_v4 = vmax.f32 %v1459_v2, 0.0 }
 0x278   :  { %2138 = vmatmul.mubr.f32.vlgmr.msra.gmra.mxu0 %v1462_v4 }
 0x338   :  { %v1552_v6 = vpop.f32.mrf.mxu0 }
 0x339   :  { %v1553_v25 = vadd.f32 %v1563_v5, %v1552_v6 }
 0x33a   :  { %v2139_v7 = vpop.f32.mrf.mxu0 }
 0x33b   :  { %1556 = vst [vmem:[%s3628_s7] sm:$0xff] %v1553_v25 }

</bundles_post_ra>
